<compile_context>
chip_gen: v6e
topology: v6e:2x2x1
jax: 0.10.0
libtpu: 0.0.40
codegen_flags: <defaults>
</compile_context>

<pallas_src>
import functools

import jax
import jax.numpy as jnp
from jax.experimental import pallas as pl
from jax.experimental.pallas import tpu as pltpu


def _round_up(x, m):
    return (x + m - 1) // m * m


# ---------------- Pallas kernels (hot paths) ----------------

def conv_bn_matmul_kernel(p_ref, w_ref, scale_ref, bias_ref, o_ref, acc_ref):
    """(TM, TN) output tile of (patches @ W) * scale + bias.

    bf16 MXU inputs, f32 accumulator, fused BatchNorm epilogue on the VPU.
    """
    @pl.when(pl.program_id(2) == 0)
    def _init():
        acc_ref[...] = jnp.zeros_like(acc_ref)

    acc_ref[...] += jnp.dot(p_ref[...], w_ref[...],
                            preferred_element_type=jnp.float32)

    @pl.when(pl.program_id(2) == pl.num_programs(2) - 1)
    def _finalize():
        o_ref[...] = (acc_ref[...] * scale_ref[...]
                      + bias_ref[...]).astype(o_ref.dtype)


def maxpool9_kernel(t0, t1, t2, t3, t4, t5, t6, t7, t8, o_ref):
    """Elementwise max over the 9 taps of a 3x3 / stride-2 window (VPU)."""
    acc = jnp.maximum(t0[...], t1[...])
    for t in (t2, t3, t4, t5, t6, t7, t8):
        acc = jnp.maximum(acc, t[...])
    o_ref[...] = acc


# ---------------- wrappers / glue ----------------

def _extract_patches(x_nhwc, ksize, stride, padding):
    """im2col: (N*Ho*Wo, ksize*ksize*C) patches, K order = (kh, kw, c)."""
    if padding:
        x_nhwc = jnp.pad(x_nhwc,
                         ((0, 0), (padding, padding), (padding, padding), (0, 0)))
    N, H, W, C = x_nhwc.shape
    Ho = (H - ksize) // stride + 1
    Wo = (W - ksize) // stride + 1
    taps = []
    for i in range(ksize):
        for j in range(ksize):
            taps.append(x_nhwc[:, i:i + stride * (Ho - 1) + 1:stride,
                               j:j + stride * (Wo - 1) + 1:stride, :])
    patches = jnp.stack(taps, axis=3)               # (N, Ho, Wo, k*k, C)
    return patches.reshape(N * Ho * Wo, ksize * ksize * C), (N, Ho, Wo)


def pallas_conv2d_bn(x_nhwc, w_oihw, out_scale, out_bias, stride=1, padding=0,
                     tm_target=256):
    """Conv2d (bias=False) + fused per-Cout scale/shift epilogue as a tiled MXU matmul."""
    Cout, Cin, KH, KW = w_oihw.shape

    # bf16 MXU inputs (halves patch/weight HBM+VMEM traffic); f32 accumulation in-kernel.
    patches, (N, Ho, Wo) = _extract_patches(x_nhwc.astype(jnp.bfloat16),
                                            KH, stride, padding)
    M, K = patches.shape

    # (Cout, Cin, KH, KW) -> (KH, KW, Cin, Cout) -> (KH*KW*Cin, Cout)
    w_mat = jnp.transpose(w_oihw, (2, 3, 1, 0)).reshape(KH * KW * Cin, Cout)
    w_mat = w_mat.astype(jnp.bfloat16)

    # --- tile selection (lane-dense output, full tiles everywhere) ---
    cout_p = _round_up(Cout, 128)                   # lane-dense output channels
    k_p = _round_up(K, 128)
    if k_p <= 2048:
        tk = k_p                                    # single reduction step
    else:
        tk = 512
        k_p = _round_up(K, tk)

    # Single Cout tile whenever the double-buffered weight block stays small:
    # patches are then read from HBM exactly once (no re-stream per Cout tile).
    tn = cout_p if (2 * 2 * tk * cout_p) <= (8 << 20) else 128

    tm = min(tm_target, _round_up(M, 8))
    if _round_up(M, tm) // tm < 2 and M > 8:
        # Ensure >= 2 M tiles so both v7x TensorCores get work.
        tm = _round_up((M + 1) // 2, 8)
    m_p = _round_up(M, tm)

    # zero-pad so every block is full (zero K/Cout columns contribute nothing)
    patches_p = jnp.pad(patches, ((0, m_p - M), (0, k_p - K)))
    w_p = jnp.pad(w_mat, ((0, k_p - K), (0, cout_p - Cout)))
    scale_p = jnp.pad(out_scale.astype(jnp.float32).reshape(1, Cout),
                      ((0, 0), (0, cout_p - Cout)))
    bias_p = jnp.pad(out_bias.astype(jnp.float32).reshape(1, Cout),
                     ((0, 0), (0, cout_p - Cout)))

    grid = (m_p // tm, cout_p // tn, k_p // tk)
    ni, nj, nk = grid

    flops = 2 * m_p * k_p * cout_p
    bytes_accessed = (2 * m_p * k_p * nj            # bf16 patches (re-read per Cout tile)
                      + 2 * k_p * cout_p * ni       # bf16 weights (re-read per M tile)
                      + 4 * m_p * cout_p            # f32 output
                      + 2 * 4 * cout_p * ni)        # f32 scale/bias
    vmem_need = (2 * 2 * (tm * tk + tk * tn)        # double-buffered bf16 matmul inputs
                 + 2 * 2 * 4 * tn                   # double-buffered scale/bias
                 + 4 * tm * tn                      # f32 accumulator scratch
                 + 2 * 4 * tm * tn)                 # double-buffered f32 output
    vmem_limit = int(min(32 << 20, max(16 << 20, 4 * vmem_need)))

    out = pl.pallas_call(
        conv_bn_matmul_kernel,
        out_shape=jax.ShapeDtypeStruct((m_p, cout_p), jnp.float32),
        grid_spec=pltpu.PrefetchScalarGridSpec(
            num_scalar_prefetch=0,
            grid=grid,
            in_specs=[
                pl.BlockSpec((tm, tk), lambda i, j, k: (i, k)),
                pl.BlockSpec((tk, tn), lambda i, j, k: (k, j)),
                pl.BlockSpec((1, tn), lambda i, j, k: (0, j)),
                pl.BlockSpec((1, tn), lambda i, j, k: (0, j)),
            ],
            out_specs=pl.BlockSpec((tm, tn), lambda i, j, k: (i, j)),
            scratch_shapes=[pltpu.VMEM((tm, tn), jnp.float32)]),
        compiler_params=pltpu.CompilerParams(
            dimension_semantics=("parallel", "parallel", "arbitrary"),
            vmem_limit_bytes=vmem_limit),
        cost_estimate=pl.CostEstimate(flops=flops, transcendentals=0,
                                      bytes_accessed=bytes_accessed),
    )(patches_p, w_p, scale_p, bias_p)

    return out[:M, :Cout].reshape(N, Ho, Wo, Cout)


def pallas_maxpool3x3s2(x_nhwc):
    """F.max_pool2d(kernel_size=3, stride=2), floor mode, no padding."""
    N, H, W, C = x_nhwc.shape
    ksize, stride = 3, 2
    Ho = (H - ksize) // stride + 1
    Wo = (W - ksize) // stride + 1
    # TODO(synk): replace these 9 XLA-materialized tap views with in-kernel
    # strided reads (ref[pl.ds(start, size, stride=2)]) to cut input traffic.
    taps = [x_nhwc[:, i:i + stride * (Ho - 1) + 1:stride,
                   j:j + stride * (Wo - 1) + 1:stride, :].reshape(N, Ho * Wo, C)
            for i in range(ksize) for j in range(ksize)]
    spec = pl.BlockSpec((1, Ho * Wo, C), lambda n: (n, 0, 0))
    out = pl.pallas_call(
        maxpool9_kernel,
        out_shape=jax.ShapeDtypeStruct((N, Ho * Wo, C), x_nhwc.dtype),
        grid=(N,),
        in_specs=[spec] * 9,
        out_specs=spec,
        compiler_params=pltpu.CompilerParams(
            dimension_semantics=("parallel",)),
    )(*taps)
    return out.reshape(N, Ho, Wo, C)


# ---------------- BatchNorm fusion (eval mode) ----------------

def _fold_bn(gamma, beta, mean, var, eps=1e-3):
    s = gamma / jnp.sqrt(var + eps)
    t = beta - mean * s
    return s, t


def fuse_inception_b_params(params):
    """Fold every eval-mode BatchNorm into conv weights / per-Cout epilogues."""
    s_in, t_in = _fold_bn(*params["bn"])
    s2, t2 = _fold_bn(*params["dbl2_bn"])
    s3, t3 = _fold_bn(*params["dbl3_bn"])

    w_b3 = params["branch3x3_w"]
    w_d1 = params["dbl1_w"]
    w_d2 = params["dbl2_w"]
    w_d3 = params["dbl3_w"]

    return {
        # branch3x3 = conv(bn(x)), padding=0  -> fold BN into weights + bias
        "b3": (w_b3 * s_in[None, :, None, None],
               jnp.ones((w_b3.shape[0],), jnp.float32),
               jnp.einsum("oikl,i->o", w_b3, t_in)),
        # dbl1 = conv1x1(bn(x)); apply dbl2's input BN as this conv's epilogue
        "d1": (w_d1 * s_in[None, :, None, None],
               s2,
               jnp.einsum("oikl,i->o", w_d1, t_in) * s2 + t2),
        # dbl2 conv (input already normalized); apply dbl3's BN as epilogue
        "d2": (w_d2, s3, t3),
        # dbl3 plain conv
        "d3": (w_d3,
               jnp.ones((w_d3.shape[0],), jnp.float32),
               jnp.zeros((w_d3.shape[0],), jnp.float32)),
    }


# ---------------- parameters & module forward ----------------

def init_params(key, in_channels):
    keys = jax.random.split(key, 7)

    def bn_params(k, c):
        k1, k2, k3, k4 = jax.random.split(k, 4)
        gamma = 1.0 + 0.1 * jax.random.normal(k1, (c,), jnp.float32)
        beta = 0.1 * jax.random.normal(k2, (c,), jnp.float32)
        mean = 0.1 * jax.random.normal(k3, (c,), jnp.float32)
        var = 1.0 + 0.1 * jax.random.uniform(k4, (c,), jnp.float32)
        return gamma, beta, mean, var

    def conv_w(k, cout, cin, ks):
        fan_in = cin * ks * ks
        return (jax.random.normal(k, (cout, cin, ks, ks), jnp.float32)
                / jnp.sqrt(fan_in))

    return {
        "bn": bn_params(keys[0], in_channels),          # InceptionB.bn
        "branch3x3_w": conv_w(keys[1], 384, in_channels, 3),
        "dbl1_w": conv_w(keys[2], 64, in_channels, 1),
        "dbl2_bn": bn_params(keys[3], 64),              # branch3x3dbl_2.bn
        "dbl2_w": conv_w(keys[4], 96, 64, 3),
        "dbl3_bn": bn_params(keys[5], 96),              # branch3x3dbl_3.bn
        "dbl3_w": conv_w(keys[6], 96, 96, 3),
    }


def inception_b_forward(x_nchw, fused):
    x = jnp.transpose(x_nchw, (0, 2, 3, 1))              # NCHW -> NHWC (boundary only)

    # branch_pool uses the *un-normalized* input (matches PyTorch forward order)
    branch_pool = pallas_maxpool3x3s2(x)

    w, s, b = fused["b3"]
    branch3x3 = pallas_conv2d_bn(x, w, s, b, stride=2, padding=0)

    w, s, b = fused["d1"]
    dbl = pallas_conv2d_bn(x, w, s, b, stride=1, padding=0)
    w, s, b = fused["d2"]
    dbl = pallas_conv2d_bn(dbl, w, s, b, stride=1, padding=1)
    w, s, b = fused["d3"]
    dbl = pallas_conv2d_bn(dbl, w, s, b, stride=2, padding=0)

    out = jnp.concatenate([branch3x3, dbl, branch_pool], axis=-1)   # NHWC
    return jnp.transpose(out, (0, 3, 1, 2))               # back to NCHW


def make_inception_b(params):
    """BN-fusion / weight prep hoisted out of the per-step forward (done once)."""
    fused = fuse_inception_b_params(params)
    return jax.jit(functools.partial(inception_b_forward, fused=fused))


# ---------------- pure-JAX reference for verification ----------------

def reference_forward(x_nchw, params):
    x = jnp.transpose(x_nchw, (0, 2, 3, 1))

    def bn(h, gamma, beta, mean, var, eps=1e-3):
        return (h - mean) / jnp.sqrt(var + eps) * gamma + beta

    def conv(h, w, stride, padding):
        w_hwio = jnp.transpose(w, (2, 3, 1, 0))
        return jax.lax.conv_general_dilated(
            h, w_hwio, (stride, stride),
            [(padding, padding), (padding, padding)],
            dimension_numbers=("NHWC", "HWIO", "NHWC"))

    pool = jax.lax.reduce_window(x, -jnp.inf, jax.lax.max,
                                 (1, 3, 3, 1), (1, 2, 2, 1), "VALID")
    xb = bn(x, *params["bn"])
    b3 = conv(xb, params["branch3x3_w"], 2, 0)
    d = conv(xb, params["dbl1_w"], 1, 0)
    d = bn(d, *params["dbl2_bn"])
    d = conv(d, params["dbl2_w"], 1, 1)
    d = bn(d, *params["dbl3_bn"])
    d = conv(d, params["dbl3_w"], 2, 0)
    out = jnp.concatenate([b3, d, pool], axis=-1)
    return jnp.transpose(out, (0, 3, 1, 2))


if __name__ == "__main__":
    key = jax.random.PRNGKey(0)
    kx, kp = jax.random.split(key)
    N, C, H, W = 2, 8, 16, 16
    x = jax.random.normal(kx, (N, C, H, W), jnp.float32)
    params = init_params(kp, C)

    fwd = make_inception_b(params)
    out = jax.block_until_ready(fwd(x))

    assert out.shape == (N, 384 + 96 + C, 7, 7), out.shape
    ref = reference_forward(x, params)
    err = float(jnp.max(jnp.abs(out - ref)))
    # bf16 MXU inputs with f32 accumulation: tolerance widened vs the pure-f32 path.
    assert err < 6e-2, f"max abs error too large: {err}"
    print("KERNEL_OK")
</pallas_src>

<mosaic_0001>
module attributes {stable_mosaic.version = 11 : i64} {
  func.func @conv_bn_matmul_kernel(%arg0: i32, %arg1: i32, %arg2: i32, %arg3: memref<256x128xbf16, #tpu.memory_space<vmem>>, %arg4: memref<128x128xbf16, #tpu.memory_space<vmem>>, %arg5: memref<1x128xf32, #tpu.memory_space<vmem>>, %arg6: memref<1x128xf32, #tpu.memory_space<vmem>>, %arg7: memref<256x128xf32, #tpu.memory_space<vmem>>, %arg8: memref<256x128xf32, #tpu.memory_space<vmem>>) attributes {dimension_semantics = [#tpu.dimension_semantics<parallel>, #tpu.dimension_semantics<parallel>, #tpu.dimension_semantics<arbitrary>], iteration_bounds = array<i64: 2, 1, 1>, scalar_prefetch = 0 : i64, scratch_operands = 1 : i64, tpu.core_type = #tpu.core_type<tc>, window_params = [{transform_indices = @transform_0, window_bounds = array<i64: 256, 128>}, {transform_indices = @transform_1, window_bounds = array<i64: 128, 128>}, {transform_indices = @transform_2, window_bounds = array<i64: 1, 128>}, {transform_indices = @transform_3, window_bounds = array<i64: 1, 128>}, {transform_indices = @transform_4, window_bounds = array<i64: 256, 128>}]} {
    %c0_i32 = arith.constant 0 : i32
    %0 = arith.cmpi eq, %arg2, %c0_i32 : i32
    %1 = arith.extui %0 : i1 to i32
    %c0_i32_0 = arith.constant 0 : i32
    %2 = arith.cmpi ne, %1, %c0_i32_0 : i32
    scf.if %2 {
      %cst_10 = arith.constant 0.000000e+00 : f32
      %12 = vector.broadcast %cst_10 : f32 to vector<256x128xf32>
      %c0_11 = arith.constant 0 : index
      %c0_12 = arith.constant 0 : index
      %13 = vector.load %arg8[%c0_11, %c0_12] : memref<256x128xf32, #tpu.memory_space<vmem>>, vector<256x128xf32>
      tpu.vector_store %arg8[%c0_11, %c0_12], %12 {strides = array<i32>} : memref<256x128xf32, #tpu.memory_space<vmem>>, vector<256x128xf32>,
    } else {
    }
    %c0 = arith.constant 0 : index
    %c0_1 = arith.constant 0 : index
    %3 = vector.load %arg8[%c0, %c0_1] : memref<256x128xf32, #tpu.memory_space<vmem>>, vector<256x128xf32>
    %c0_2 = arith.constant 0 : index
    %c0_3 = arith.constant 0 : index
    %4 = vector.load %arg3[%c0_2, %c0_3] : memref<256x128xbf16, #tpu.memory_space<vmem>>, vector<256x128xbf16>
    %c0_4 = arith.constant 0 : index
    %c0_5 = arith.constant 0 : index
    %5 = vector.load %arg4[%c0_4, %c0_5] : memref<128x128xbf16, #tpu.memory_space<vmem>>, vector<128x128xbf16>
    %cst = arith.constant dense<0.000000e+00> : vector<256x128xf32>
    %6 = tpu.matmul %4, %5, %cst {dimension_numbers = #tpu.dot_dimension_numbers<[1], [0], [0], [1], [0, 0, 1, 1], [], []>} : vector<256x128xbf16>, vector<128x128xbf16>, vector<256x128xf32> -> vector<256x128xf32>
    %7 = arith.addf %3, %6 : vector<256x128xf32>
    %c0_6 = arith.constant 0 : index
    %c0_7 = arith.constant 0 : index
    %8 = vector.load %arg8[%c0_6, %c0_7] : memref<256x128xf32, #tpu.memory_space<vmem>>, vector<256x128xf32>
    tpu.vector_store %arg8[%c0_6, %c0_7], %7 {strides = array<i32>} : memref<256x128xf32, #tpu.memory_space<vmem>>, vector<256x128xf32>,
    %c0_i32_8 = arith.constant 0 : i32
    %9 = arith.cmpi eq, %arg2, %c0_i32_8 : i32
    %10 = arith.extui %9 : i1 to i32
    %c0_i32_9 = arith.constant 0 : i32
    %11 = arith.cmpi ne, %10, %c0_i32_9 : i32
    scf.if %11 {
      %c0_10 = arith.constant 0 : index
      %c0_11 = arith.constant 0 : index
      %12 = vector.load %arg8[%c0_10, %c0_11] : memref<256x128xf32, #tpu.memory_space<vmem>>, vector<256x128xf32>
      %c0_12 = arith.constant 0 : index
      %c0_13 = arith.constant 0 : index
      %13 = vector.load %arg5[%c0_12, %c0_13] : memref<1x128xf32, #tpu.memory_space<vmem>>, vector<1x128xf32>
      %14 = vector.broadcast %13 : vector<1x128xf32> to vector<256x128xf32>
      %15 = arith.mulf %12, %14 : vector<256x128xf32>
      %c0_14 = arith.constant 0 : index
      %c0_15 = arith.constant 0 : index
      %16 = vector.load %arg6[%c0_14, %c0_15] : memref<1x128xf32, #tpu.memory_space<vmem>>, vector<1x128xf32>
      %17 = vector.broadcast %16 : vector<1x128xf32> to vector<256x128xf32>
      %18 = arith.addf %15, %17 : vector<256x128xf32>
      %c0_16 = arith.constant 0 : index
      %c0_17 = arith.constant 0 : index
      %19 = vector.load %arg7[%c0_16, %c0_17] : memref<256x128xf32, #tpu.memory_space<vmem>>, vector<256x128xf32>
      tpu.vector_store %arg7[%c0_16, %c0_17], %18 {strides = array<i32>} : memref<256x128xf32, #tpu.memory_space<vmem>>, vector<256x128xf32>,
    } else {
    }
    return
  }
  func.func @transform_0(%arg0: i32, %arg1: i32, %arg2: i32) -> (i32, i32) {
    %c0_i32 = arith.constant 0 : i32
    return %arg0, %arg2 : i32, i32
  }
  func.func @transform_1(%arg0: i32, %arg1: i32, %arg2: i32) -> (i32, i32) {
    %c0_i32 = arith.constant 0 : i32
    return %arg2, %arg1 : i32, i32
  }
  func.func @transform_2(%arg0: i32, %arg1: i32, %arg2: i32) -> (i32, i32) {
    %c0_i32 = arith.constant 0 : i32
    %c0_i32_0 = arith.constant 0 : i32
    return %c0_i32, %arg1 : i32, i32
  }
  func.func @transform_3(%arg0: i32, %arg1: i32, %arg2: i32) -> (i32, i32) {
    %c0_i32 = arith.constant 0 : i32
    %c0_i32_0 = arith.constant 0 : i32
    return %c0_i32, %arg1 : i32, i32
  }
  func.func @transform_4(%arg0: i32, %arg1: i32, %arg2: i32) -> (i32, i32) {
    %c0_i32 = arith.constant 0 : i32
    return %arg0, %arg1 : i32, i32
  }
}

module attributes {stable_mosaic.version = 11 : i64} {
  func.func @conv_bn_matmul_kernel(%arg0: i32, %arg1: i32, %arg2: i32, %arg3: memref<256x640xbf16, #tpu.memory_space<vmem>>, %arg4: memref<640x128xbf16, #tpu.memory_space<vmem>>, %arg5: memref<1x128xf32, #tpu.memory_space<vmem>>, %arg6: memref<1x128xf32, #tpu.memory_space<vmem>>, %arg7: memref<256x128xf32, #tpu.memory_space<vmem>>, %arg8: memref<256x128xf32, #tpu.memory_space<vmem>>) attributes {dimension_semantics = [#tpu.dimension_semantics<parallel>, #tpu.dimension_semantics<parallel>, #tpu.dimension_semantics<arbitrary>], iteration_bounds = array<i64: 2, 1, 1>, scalar_prefetch = 0 : i64, scratch_operands = 1 : i64, tpu.core_type = #tpu.core_type<tc>, window_params = [{transform_indices = @transform_0, window_bounds = array<i64: 256, 640>}, {transform_indices = @transform_1, window_bounds = array<i64: 640, 128>}, {transform_indices = @transform_2, window_bounds = array<i64: 1, 128>}, {transform_indices = @transform_3, window_bounds = array<i64: 1, 128>}, {transform_indices = @transform_4, window_bounds = array<i64: 256, 128>}]} {
    %c0_i32 = arith.constant 0 : i32
    %0 = arith.cmpi eq, %arg2, %c0_i32 : i32
    %1 = arith.extui %0 : i1 to i32
    %c0_i32_0 = arith.constant 0 : i32
    %2 = arith.cmpi ne, %1, %c0_i32_0 : i32
    scf.if %2 {
      %cst_10 = arith.constant 0.000000e+00 : f32
      %12 = vector.broadcast %cst_10 : f32 to vector<256x128xf32>
      %c0_11 = arith.constant 0 : index
      %c0_12 = arith.constant 0 : index
      %13 = vector.load %arg8[%c0_11, %c0_12] : memref<256x128xf32, #tpu.memory_space<vmem>>, vector<256x128xf32>
      tpu.vector_store %arg8[%c0_11, %c0_12], %12 {strides = array<i32>} : memref<256x128xf32, #tpu.memory_space<vmem>>, vector<256x128xf32>,
    } else {
    }
    %c0 = arith.constant 0 : index
    %c0_1 = arith.constant 0 : index
    %3 = vector.load %arg8[%c0, %c0_1] : memref<256x128xf32, #tpu.memory_space<vmem>>, vector<256x128xf32>
    %c0_2 = arith.constant 0 : index
    %c0_3 = arith.constant 0 : index
    %4 = vector.load %arg3[%c0_2, %c0_3] : memref<256x640xbf16, #tpu.memory_space<vmem>>, vector<256x640xbf16>
    %c0_4 = arith.constant 0 : index
    %c0_5 = arith.constant 0 : index
    %5 = vector.load %arg4[%c0_4, %c0_5] : memref<640x128xbf16, #tpu.memory_space<vmem>>, vector<640x128xbf16>
    %cst = arith.constant dense<0.000000e+00> : vector<256x128xf32>
    %6 = tpu.matmul %4, %5, %cst {dimension_numbers = #tpu.dot_dimension_numbers<[1], [0], [0], [1], [0, 0, 1, 1], [], []>} : vector<256x640xbf16>, vector<640x128xbf16>, vector<256x128xf32> -> vector<256x128xf32>
    %7 = arith.addf %3, %6 : vector<256x128xf32>
    %c0_6 = arith.constant 0 : index
    %c0_7 = arith.constant 0 : index
    %8 = vector.load %arg8[%c0_6, %c0_7] : memref<256x128xf32, #tpu.memory_space<vmem>>, vector<256x128xf32>
    tpu.vector_store %arg8[%c0_6, %c0_7], %7 {strides = array<i32>} : memref<256x128xf32, #tpu.memory_space<vmem>>, vector<256x128xf32>,
    %c0_i32_8 = arith.constant 0 : i32
    %9 = arith.cmpi eq, %arg2, %c0_i32_8 : i32
    %10 = arith.extui %9 : i1 to i32
    %c0_i32_9 = arith.constant 0 : i32
    %11 = arith.cmpi ne, %10, %c0_i32_9 : i32
    scf.if %11 {
      %c0_10 = arith.constant 0 : index
      %c0_11 = arith.constant 0 : index
      %12 = vector.load %arg8[%c0_10, %c0_11] : memref<256x128xf32, #tpu.memory_space<vmem>>, vector<256x128xf32>
      %c0_12 = arith.constant 0 : index
      %c0_13 = arith.constant 0 : index
      %13 = vector.load %arg5[%c0_12, %c0_13] : memref<1x128xf32, #tpu.memory_space<vmem>>, vector<1x128xf32>
      %14 = vector.broadcast %13 : vector<1x128xf32> to vector<256x128xf32>
      %15 = arith.mulf %12, %14 : vector<256x128xf32>
      %c0_14 = arith.constant 0 : index
      %c0_15 = arith.constant 0 : index
      %16 = vector.load %arg6[%c0_14, %c0_15] : memref<1x128xf32, #tpu.memory_space<vmem>>, vector<1x128xf32>
      %17 = vector.broadcast %16 : vector<1x128xf32> to vector<256x128xf32>
      %18 = arith.addf %15, %17 : vector<256x128xf32>
      %c0_16 = arith.constant 0 : index
      %c0_17 = arith.constant 0 : index
      %19 = vector.load %arg7[%c0_16, %c0_17] : memref<256x128xf32, #tpu.memory_space<vmem>>, vector<256x128xf32>
      tpu.vector_store %arg7[%c0_16, %c0_17], %18 {strides = array<i32>} : memref<256x128xf32, #tpu.memory_space<vmem>>, vector<256x128xf32>,
    } else {
    }
    return
  }
  func.func @transform_0(%arg0: i32, %arg1: i32, %arg2: i32) -> (i32, i32) {
    %c0_i32 = arith.constant 0 : i32
    return %arg0, %arg2 : i32, i32
  }
  func.func @transform_1(%arg0: i32, %arg1: i32, %arg2: i32) -> (i32, i32) {
    %c0_i32 = arith.constant 0 : i32
    return %arg2, %arg1 : i32, i32
  }
  func.func @transform_2(%arg0: i32, %arg1: i32, %arg2: i32) -> (i32, i32) {
    %c0_i32 = arith.constant 0 : i32
    %c0_i32_0 = arith.constant 0 : i32
    return %c0_i32, %arg1 : i32, i32
  }
  func.func @transform_3(%arg0: i32, %arg1: i32, %arg2: i32) -> (i32, i32) {
    %c0_i32 = arith.constant 0 : i32
    %c0_i32_0 = arith.constant 0 : i32
    return %c0_i32, %arg1 : i32, i32
  }
  func.func @transform_4(%arg0: i32, %arg1: i32, %arg2: i32) -> (i32, i32) {
    %c0_i32 = arith.constant 0 : i32
    return %arg0, %arg1 : i32, i32
  }
}

module attributes {stable_mosaic.version = 11 : i64} {
  func.func @conv_bn_matmul_kernel(%arg0: i32, %arg1: i32, %arg2: i32, %arg3: memref<56x896xbf16, #tpu.memory_space<vmem>>, %arg4: memref<896x128xbf16, #tpu.memory_space<vmem>>, %arg5: memref<1x128xf32, #tpu.memory_space<vmem>>, %arg6: memref<1x128xf32, #tpu.memory_space<vmem>>, %arg7: memref<56x128xf32, #tpu.memory_space<vmem>>, %arg8: memref<56x128xf32, #tpu.memory_space<vmem>>) attributes {dimension_semantics = [#tpu.dimension_semantics<parallel>, #tpu.dimension_semantics<parallel>, #tpu.dimension_semantics<arbitrary>], iteration_bounds = array<i64: 2, 1, 1>, scalar_prefetch = 0 : i64, scratch_operands = 1 : i64, tpu.core_type = #tpu.core_type<tc>, window_params = [{transform_indices = @transform_0, window_bounds = array<i64: 56, 896>}, {transform_indices = @transform_1, window_bounds = array<i64: 896, 128>}, {transform_indices = @transform_2, window_bounds = array<i64: 1, 128>}, {transform_indices = @transform_3, window_bounds = array<i64: 1, 128>}, {transform_indices = @transform_4, window_bounds = array<i64: 56, 128>}]} {
    %c0_i32 = arith.constant 0 : i32
    %0 = arith.cmpi eq, %arg2, %c0_i32 : i32
    %1 = arith.extui %0 : i1 to i32
    %c0_i32_0 = arith.constant 0 : i32
    %2 = arith.cmpi ne, %1, %c0_i32_0 : i32
    scf.if %2 {
      %cst_10 = arith.constant 0.000000e+00 : f32
      %12 = vector.broadcast %cst_10 : f32 to vector<56x128xf32>
      %c0_11 = arith.constant 0 : index
      %c0_12 = arith.constant 0 : index
      %13 = vector.load %arg8[%c0_11, %c0_12] : memref<56x128xf32, #tpu.memory_space<vmem>>, vector<56x128xf32>
      tpu.vector_store %arg8[%c0_11, %c0_12], %12 {strides = array<i32>} : memref<56x128xf32, #tpu.memory_space<vmem>>, vector<56x128xf32>,
    } else {
    }
    %c0 = arith.constant 0 : index
    %c0_1 = arith.constant 0 : index
    %3 = vector.load %arg8[%c0, %c0_1] : memref<56x128xf32, #tpu.memory_space<vmem>>, vector<56x128xf32>
    %c0_2 = arith.constant 0 : index
    %c0_3 = arith.constant 0 : index
    %4 = vector.load %arg3[%c0_2, %c0_3] : memref<56x896xbf16, #tpu.memory_space<vmem>>, vector<56x896xbf16>
    %c0_4 = arith.constant 0 : index
    %c0_5 = arith.constant 0 : index
    %5 = vector.load %arg4[%c0_4, %c0_5] : memref<896x128xbf16, #tpu.memory_space<vmem>>, vector<896x128xbf16>
    %cst = arith.constant dense<0.000000e+00> : vector<56x128xf32>
    %6 = tpu.matmul %4, %5, %cst {dimension_numbers = #tpu.dot_dimension_numbers<[1], [0], [0], [1], [0, 0, 1, 1], [], []>} : vector<56x896xbf16>, vector<896x128xbf16>, vector<56x128xf32> -> vector<56x128xf32>
    %7 = arith.addf %3, %6 : vector<56x128xf32>
    %c0_6 = arith.constant 0 : index
    %c0_7 = arith.constant 0 : index
    %8 = vector.load %arg8[%c0_6, %c0_7] : memref<56x128xf32, #tpu.memory_space<vmem>>, vector<56x128xf32>
    tpu.vector_store %arg8[%c0_6, %c0_7], %7 {strides = array<i32>} : memref<56x128xf32, #tpu.memory_space<vmem>>, vector<56x128xf32>,
    %c0_i32_8 = arith.constant 0 : i32
    %9 = arith.cmpi eq, %arg2, %c0_i32_8 : i32
    %10 = arith.extui %9 : i1 to i32
    %c0_i32_9 = arith.constant 0 : i32
    %11 = arith.cmpi ne, %10, %c0_i32_9 : i32
    scf.if %11 {
      %c0_10 = arith.constant 0 : index
      %c0_11 = arith.constant 0 : index
      %12 = vector.load %arg8[%c0_10, %c0_11] : memref<56x128xf32, #tpu.memory_space<vmem>>, vector<56x128xf32>
      %c0_12 = arith.constant 0 : index
      %c0_13 = arith.constant 0 : index
      %13 = vector.load %arg5[%c0_12, %c0_13] : memref<1x128xf32, #tpu.memory_space<vmem>>, vector<1x128xf32>
      %14 = vector.broadcast %13 : vector<1x128xf32> to vector<56x128xf32>
      %15 = arith.mulf %12, %14 : vector<56x128xf32>
      %c0_14 = arith.constant 0 : index
      %c0_15 = arith.constant 0 : index
      %16 = vector.load %arg6[%c0_14, %c0_15] : memref<1x128xf32, #tpu.memory_space<vmem>>, vector<1x128xf32>
      %17 = vector.broadcast %16 : vector<1x128xf32> to vector<56x128xf32>
      %18 = arith.addf %15, %17 : vector<56x128xf32>
      %c0_16 = arith.constant 0 : index
      %c0_17 = arith.constant 0 : index
      %19 = vector.load %arg7[%c0_16, %c0_17] : memref<56x128xf32, #tpu.memory_space<vmem>>, vector<56x128xf32>
      tpu.vector_store %arg7[%c0_16, %c0_17], %18 {strides = array<i32>} : memref<56x128xf32, #tpu.memory_space<vmem>>, vector<56x128xf32>,
    } else {
    }
    return
  }
  func.func @transform_0(%arg0: i32, %arg1: i32, %arg2: i32) -> (i32, i32) {
    %c0_i32 = arith.constant 0 : i32
    return %arg0, %arg2 : i32, i32
  }
  func.func @transform_1(%arg0: i32, %arg1: i32, %arg2: i32) -> (i32, i32) {
    %c0_i32 = arith.constant 0 : i32
    return %arg2, %arg1 : i32, i32
  }
  func.func @transform_2(%arg0: i32, %arg1: i32, %arg2: i32) -> (i32, i32) {
    %c0_i32 = arith.constant 0 : i32
    %c0_i32_0 = arith.constant 0 : i32
    return %c0_i32, %arg1 : i32, i32
  }
  func.func @transform_3(%arg0: i32, %arg1: i32, %arg2: i32) -> (i32, i32) {
    %c0_i32 = arith.constant 0 : i32
    %c0_i32_0 = arith.constant 0 : i32
    return %c0_i32, %arg1 : i32, i32
  }
  func.func @transform_4(%arg0: i32, %arg1: i32, %arg2: i32) -> (i32, i32) {
    %c0_i32 = arith.constant 0 : i32
    return %arg0, %arg1 : i32, i32
  }
}

module attributes {stable_mosaic.version = 11 : i64} {
  func.func @conv_bn_matmul_kernel(%arg0: i32, %arg1: i32, %arg2: i32, %arg3: memref<56x128xbf16, #tpu.memory_space<vmem>>, %arg4: memref<128x384xbf16, #tpu.memory_space<vmem>>, %arg5: memref<1x384xf32, #tpu.memory_space<vmem>>, %arg6: memref<1x384xf32, #tpu.memory_space<vmem>>, %arg7: memref<56x384xf32, #tpu.memory_space<vmem>>, %arg8: memref<56x384xf32, #tpu.memory_space<vmem>>) attributes {dimension_semantics = [#tpu.dimension_semantics<parallel>, #tpu.dimension_semantics<parallel>, #tpu.dimension_semantics<arbitrary>], iteration_bounds = array<i64: 2, 1, 1>, scalar_prefetch = 0 : i64, scratch_operands = 1 : i64, tpu.core_type = #tpu.core_type<tc>, window_params = [{transform_indices = @transform_0, window_bounds = array<i64: 56, 128>}, {transform_indices = @transform_1, window_bounds = array<i64: 128, 384>}, {transform_indices = @transform_2, window_bounds = array<i64: 1, 384>}, {transform_indices = @transform_3, window_bounds = array<i64: 1, 384>}, {transform_indices = @transform_4, window_bounds = array<i64: 56, 384>}]} {
    %c0_i32 = arith.constant 0 : i32
    %0 = arith.cmpi eq, %arg2, %c0_i32 : i32
    %1 = arith.extui %0 : i1 to i32
    %c0_i32_0 = arith.constant 0 : i32
    %2 = arith.cmpi ne, %1, %c0_i32_0 : i32
    scf.if %2 {
      %cst_10 = arith.constant 0.000000e+00 : f32
      %12 = vector.broadcast %cst_10 : f32 to vector<56x384xf32>
      %c0_11 = arith.constant 0 : index
      %c0_12 = arith.constant 0 : index
      %13 = vector.load %arg8[%c0_11, %c0_12] : memref<56x384xf32, #tpu.memory_space<vmem>>, vector<56x384xf32>
      tpu.vector_store %arg8[%c0_11, %c0_12], %12 {strides = array<i32>} : memref<56x384xf32, #tpu.memory_space<vmem>>, vector<56x384xf32>,
    } else {
    }
    %c0 = arith.constant 0 : index
    %c0_1 = arith.constant 0 : index
    %3 = vector.load %arg8[%c0, %c0_1] : memref<56x384xf32, #tpu.memory_space<vmem>>, vector<56x384xf32>
    %c0_2 = arith.constant 0 : index
    %c0_3 = arith.constant 0 : index
    %4 = vector.load %arg3[%c0_2, %c0_3] : memref<56x128xbf16, #tpu.memory_space<vmem>>, vector<56x128xbf16>
    %c0_4 = arith.constant 0 : index
    %c0_5 = arith.constant 0 : index
    %5 = vector.load %arg4[%c0_4, %c0_5] : memref<128x384xbf16, #tpu.memory_space<vmem>>, vector<128x384xbf16>
    %cst = arith.constant dense<0.000000e+00> : vector<56x384xf32>
    %6 = tpu.matmul %4, %5, %cst {dimension_numbers = #tpu.dot_dimension_numbers<[1], [0], [0], [1], [0, 0, 1, 1], [], []>} : vector<56x128xbf16>, vector<128x384xbf16>, vector<56x384xf32> -> vector<56x384xf32>
    %7 = arith.addf %3, %6 : vector<56x384xf32>
    %c0_6 = arith.constant 0 : index
    %c0_7 = arith.constant 0 : index
    %8 = vector.load %arg8[%c0_6, %c0_7] : memref<56x384xf32, #tpu.memory_space<vmem>>, vector<56x384xf32>
    tpu.vector_store %arg8[%c0_6, %c0_7], %7 {strides = array<i32>} : memref<56x384xf32, #tpu.memory_space<vmem>>, vector<56x384xf32>,
    %c0_i32_8 = arith.constant 0 : i32
    %9 = arith.cmpi eq, %arg2, %c0_i32_8 : i32
    %10 = arith.extui %9 : i1 to i32
    %c0_i32_9 = arith.constant 0 : i32
    %11 = arith.cmpi ne, %10, %c0_i32_9 : i32
    scf.if %11 {
      %c0_10 = arith.constant 0 : index
      %c0_11 = arith.constant 0 : index
      %12 = vector.load %arg8[%c0_10, %c0_11] : memref<56x384xf32, #tpu.memory_space<vmem>>, vector<56x384xf32>
      %c0_12 = arith.constant 0 : index
      %c0_13 = arith.constant 0 : index
      %13 = vector.load %arg5[%c0_12, %c0_13] : memref<1x384xf32, #tpu.memory_space<vmem>>, vector<1x384xf32>
      %14 = vector.broadcast %13 : vector<1x384xf32> to vector<56x384xf32>
      %15 = arith.mulf %12, %14 : vector<56x384xf32>
      %c0_14 = arith.constant 0 : index
      %c0_15 = arith.constant 0 : index
      %16 = vector.load %arg6[%c0_14, %c0_15] : memref<1x384xf32, #tpu.memory_space<vmem>>, vector<1x384xf32>
      %17 = vector.broadcast %16 : vector<1x384xf32> to vector<56x384xf32>
      %18 = arith.addf %15, %17 : vector<56x384xf32>
      %c0_16 = arith.constant 0 : index
      %c0_17 = arith.constant 0 : index
      %19 = vector.load %arg7[%c0_16, %c0_17] : memref<56x384xf32, #tpu.memory_space<vmem>>, vector<56x384xf32>
      tpu.vector_store %arg7[%c0_16, %c0_17], %18 {strides = array<i32>} : memref<56x384xf32, #tpu.memory_space<vmem>>, vector<56x384xf32>,
    } else {
    }
    return
  }
  func.func @transform_0(%arg0: i32, %arg1: i32, %arg2: i32) -> (i32, i32) {
    %c0_i32 = arith.constant 0 : i32
    return %arg0, %arg2 : i32, i32
  }
  func.func @transform_1(%arg0: i32, %arg1: i32, %arg2: i32) -> (i32, i32) {
    %c0_i32 = arith.constant 0 : i32
    return %arg2, %arg1 : i32, i32
  }
  func.func @transform_2(%arg0: i32, %arg1: i32, %arg2: i32) -> (i32, i32) {
    %c0_i32 = arith.constant 0 : i32
    %c0_i32_0 = arith.constant 0 : i32
    return %c0_i32, %arg1 : i32, i32
  }
  func.func @transform_3(%arg0: i32, %arg1: i32, %arg2: i32) -> (i32, i32) {
    %c0_i32 = arith.constant 0 : i32
    %c0_i32_0 = arith.constant 0 : i32
    return %c0_i32, %arg1 : i32, i32
  }
  func.func @transform_4(%arg0: i32, %arg1: i32, %arg2: i32) -> (i32, i32) {
    %c0_i32 = arith.constant 0 : i32
    return %arg0, %arg1 : i32, i32
  }
}

module attributes {stable_mosaic.version = 11 : i64} {
  func.func @maxpool9_kernel(%arg0: i32, %arg1: memref<1x49x8xf32, #tpu.memory_space<vmem>>, %arg2: memref<1x49x8xf32, #tpu.memory_space<vmem>>, %arg3: memref<1x49x8xf32, #tpu.memory_space<vmem>>, %arg4: memref<1x49x8xf32, #tpu.memory_space<vmem>>, %arg5: memref<1x49x8xf32, #tpu.memory_space<vmem>>, %arg6: memref<1x49x8xf32, #tpu.memory_space<vmem>>, %arg7: memref<1x49x8xf32, #tpu.memory_space<vmem>>, %arg8: memref<1x49x8xf32, #tpu.memory_space<vmem>>, %arg9: memref<1x49x8xf32, #tpu.memory_space<vmem>>, %arg10: memref<1x49x8xf32, #tpu.memory_space<vmem>>) attributes {dimension_semantics = [#tpu.dimension_semantics<parallel>], iteration_bounds = array<i64: 2>, scalar_prefetch = 0 : i64, scratch_operands = 0 : i64, tpu.core_type = #tpu.core_type<tc>, window_params = [{transform_indices = @transform_0, window_bounds = array<i64: 1, 49, 8>}, {transform_indices = @transform_1, window_bounds = array<i64: 1, 49, 8>}, {transform_indices = @transform_2, window_bounds = array<i64: 1, 49, 8>}, {transform_indices = @transform_3, window_bounds = array<i64: 1, 49, 8>}, {transform_indices = @transform_4, window_bounds = array<i64: 1, 49, 8>}, {transform_indices = @transform_5, window_bounds = array<i64: 1, 49, 8>}, {transform_indices = @transform_6, window_bounds = array<i64: 1, 49, 8>}, {transform_indices = @transform_7, window_bounds = array<i64: 1, 49, 8>}, {transform_indices = @transform_8, window_bounds = array<i64: 1, 49, 8>}, {transform_indices = @transform_9, window_bounds = array<i64: 1, 49, 8>}]} {
    %c0 = arith.constant 0 : index
    %c0_0 = arith.constant 0 : index
    %c0_1 = arith.constant 0 : index
    %0 = vector.load %arg1[%c0, %c0_0, %c0_1] : memref<1x49x8xf32, #tpu.memory_space<vmem>>, vector<1x49x8xf32>
    %c0_2 = arith.constant 0 : index
    %c0_3 = arith.constant 0 : index
    %c0_4 = arith.constant 0 : index
    %1 = vector.load %arg2[%c0_2, %c0_3, %c0_4] : memref<1x49x8xf32, #tpu.memory_space<vmem>>, vector<1x49x8xf32>
    %2 = arith.maximumf %0, %1 : vector<1x49x8xf32>
    %c0_5 = arith.constant 0 : index
    %c0_6 = arith.constant 0 : index
    %c0_7 = arith.constant 0 : index
    %3 = vector.load %arg3[%c0_5, %c0_6, %c0_7] : memref<1x49x8xf32, #tpu.memory_space<vmem>>, vector<1x49x8xf32>
    %4 = arith.maximumf %2, %3 : vector<1x49x8xf32>
    %c0_8 = arith.constant 0 : index
    %c0_9 = arith.constant 0 : index
    %c0_10 = arith.constant 0 : index
    %5 = vector.load %arg4[%c0_8, %c0_9, %c0_10] : memref<1x49x8xf32, #tpu.memory_space<vmem>>, vector<1x49x8xf32>
    %6 = arith.maximumf %4, %5 : vector<1x49x8xf32>
    %c0_11 = arith.constant 0 : index
    %c0_12 = arith.constant 0 : index
    %c0_13 = arith.constant 0 : index
    %7 = vector.load %arg5[%c0_11, %c0_12, %c0_13] : memref<1x49x8xf32, #tpu.memory_space<vmem>>, vector<1x49x8xf32>
    %8 = arith.maximumf %6, %7 : vector<1x49x8xf32>
    %c0_14 = arith.constant 0 : index
    %c0_15 = arith.constant 0 : index
    %c0_16 = arith.constant 0 : index
    %9 = vector.load %arg6[%c0_14, %c0_15, %c0_16] : memref<1x49x8xf32, #tpu.memory_space<vmem>>, vector<1x49x8xf32>
    %10 = arith.maximumf %8, %9 : vector<1x49x8xf32>
    %c0_17 = arith.constant 0 : index
    %c0_18 = arith.constant 0 : index
    %c0_19 = arith.constant 0 : index
    %11 = vector.load %arg7[%c0_17, %c0_18, %c0_19] : memref<1x49x8xf32, #tpu.memory_space<vmem>>, vector<1x49x8xf32>
    %12 = arith.maximumf %10, %11 : vector<1x49x8xf32>
    %c0_20 = arith.constant 0 : index
    %c0_21 = arith.constant 0 : index
    %c0_22 = arith.constant 0 : index
    %13 = vector.load %arg8[%c0_20, %c0_21, %c0_22] : memref<1x49x8xf32, #tpu.memory_space<vmem>>, vector<1x49x8xf32>
    %14 = arith.maximumf %12, %13 : vector<1x49x8xf32>
    %c0_23 = arith.constant 0 : index
    %c0_24 = arith.constant 0 : index
    %c0_25 = arith.constant 0 : index
    %15 = vector.load %arg9[%c0_23, %c0_24, %c0_25] : memref<1x49x8xf32, #tpu.memory_space<vmem>>, vector<1x49x8xf32>
    %16 = arith.maximumf %14, %15 : vector<1x49x8xf32>
    %c0_26 = arith.constant 0 : index
    %c0_27 = arith.constant 0 : index
    %c0_28 = arith.constant 0 : index
    %17 = vector.load %arg10[%c0_26, %c0_27, %c0_28] : memref<1x49x8xf32, #tpu.memory_space<vmem>>, vector<1x49x8xf32>
    tpu.vector_store %arg10[%c0_26, %c0_27, %c0_28], %16 {strides = array<i32>} : memref<1x49x8xf32, #tpu.memory_space<vmem>>, vector<1x49x8xf32>,
    return
  }
  func.func @transform_0(%arg0: i32) -> (i32, i32, i32) {
    %c0_i32 = arith.constant 0 : i32
    %c0_i32_0 = arith.constant 0 : i32
    %c0_i32_1 = arith.constant 0 : i32
    return %arg0, %c0_i32, %c0_i32_0 : i32, i32, i32
  }
  func.func @transform_1(%arg0: i32) -> (i32, i32, i32) {
    %c0_i32 = arith.constant 0 : i32
    %c0_i32_0 = arith.constant 0 : i32
    %c0_i32_1 = arith.constant 0 : i32
    return %arg0, %c0_i32, %c0_i32_0 : i32, i32, i32
  }
  func.func @transform_2(%arg0: i32) -> (i32, i32, i32) {
    %c0_i32 = arith.constant 0 : i32
    %c0_i32_0 = arith.constant 0 : i32
    %c0_i32_1 = arith.constant 0 : i32
    return %arg0, %c0_i32, %c0_i32_0 : i32, i32, i32
  }
  func.func @transform_3(%arg0: i32) -> (i32, i32, i32) {
    %c0_i32 = arith.constant 0 : i32
    %c0_i32_0 = arith.constant 0 : i32
    %c0_i32_1 = arith.constant 0 : i32
    return %arg0, %c0_i32, %c0_i32_0 : i32, i32, i32
  }
  func.func @transform_4(%arg0: i32) -> (i32, i32, i32) {
    %c0_i32 = arith.constant 0 : i32
    %c0_i32_0 = arith.constant 0 : i32
    %c0_i32_1 = arith.constant 0 : i32
    return %arg0, %c0_i32, %c0_i32_0 : i32, i32, i32
  }
  func.func @transform_5(%arg0: i32) -> (i32, i32, i32) {
    %c0_i32 = arith.constant 0 : i32
    %c0_i32_0 = arith.constant 0 : i32
    %c0_i32_1 = arith.constant 0 : i32
    return %arg0, %c0_i32, %c0_i32_0 : i32, i32, i32
  }
  func.func @transform_6(%arg0: i32) -> (i32, i32, i32) {
    %c0_i32 = arith.constant 0 : i32
    %c0_i32_0 = arith.constant 0 : i32
    %c0_i32_1 = arith.constant 0 : i32
    return %arg0, %c0_i32, %c0_i32_0 : i32, i32, i32
  }
  func.func @transform_7(%arg0: i32) -> (i32, i32, i32) {
    %c0_i32 = arith.constant 0 : i32
    %c0_i32_0 = arith.constant 0 : i32
    %c0_i32_1 = arith.constant 0 : i32
    return %arg0, %c0_i32, %c0_i32_0 : i32, i32, i32
  }
  func.func @transform_8(%arg0: i32) -> (i32, i32, i32) {
    %c0_i32 = arith.constant 0 : i32
    %c0_i32_0 = arith.constant 0 : i32
    %c0_i32_1 = arith.constant 0 : i32
    return %arg0, %c0_i32, %c0_i32_0 : i32, i32, i32
  }
  func.func @transform_9(%arg0: i32) -> (i32, i32, i32) {
    %c0_i32 = arith.constant 0 : i32
    %c0_i32_0 = arith.constant 0 : i32
    %c0_i32_1 = arith.constant 0 : i32
    return %arg0, %c0_i32, %c0_i32_0 : i32, i32, i32
  }
}

</mosaic_0001>

<bundles_post_ra>
// kernel: inception_b_forward.7
= control target key start
LH: loop header
LB: loop body
LE: loop exit
PB: predicated region body
PF: predicated region fallthrough
CT: control target
= control target key end

     0   :  { %9 = vsyncpa [#allocation4], 0  ;;  %s1627_s0 = inlined_call_operand.vmem [shape: bf16[512,128], index: 0, kind: input, shape index: {}]   ;;  %s1628_s1 = inlined_call_operand.hbm [shape: bf16[128,128], index: 1, kind: input, shape index: {}]   ;;  %s1629_s2 = inlined_call_operand.hbm [shape: f32[1,128], index: 2, kind: input, shape index: {}]   ;;  %s1630_s3 = inlined_call_operand.hbm [shape: f32[1,128], index: 3, kind: input, shape index: {}]   ;;  %s1631_s4 = inlined_call_operand.vmem [shape: f32[512,128], index: 4, kind: output, shape index: {}]  }
   0x1   :  { %10 = vsyncpa [#allocation6], 0  ;;  %s1408_s15 = smov 0   ;;  %s1410_s16 = smov 0  }
   0x2   :  { %s1412_s17 = smov 0  }
   0x3 LB: > { %s1378_s18 = smov [#allocation5]   ;;  %s1056_s20 = sadd.s32 4294967295, %s1376_s17   ;;  %s1376_s17 = sphi %s1412_s17, %s16_s17   ;;  %s1372_s16 = sphi %s1410_s16, %s1637_s16   ;;  %s1368_s15 = sphi %s1408_s15, %s1636_s15  }
   0x4   : > { %s208_s19 = sshll.u32 %s1378_s18, 4  ;;  %p1058_p0 = scmp.ge.s32.totalorder %s1376_s17, 1  ;;  %s209_s19 = int_to_ptr.vmem [resolvable:$true] %s208_s19 }
   0x5   : > { %p176_p1 = scmp.lt.s32.totalorder %s1376_s17, 3  ;;  %p1426_p2 = scmp.eq.s32.totalorder %s1056_s20, 0 }
   0x6   : > { %s35_s23 = sadd.s32 1, %s1372_s16  ;;  %s1379_s26 = smov [#allocation3]  }
   0x7   : > { %p1430_p3 = pnand %p1058_p0, %p176_p1  ;;  %p1443_p6 = scmp.ge.s32.totalorder %s35_s23, 2 }
   0x8   : > { %s192_s27 = sshll.u32 %s1379_s26, 4  ;;  %s1279_s28 = scalar_lea.vmem %s209_s19, 16  ;;  %s193_s27 = int_to_ptr.vmem [resolvable:$true] %s192_s27 }
   0x9   : > { %p1199_p4 = pneg %p1430_p3  ;;  %p1280_p8 = scmp.ne.s32.totalorder %s209_s19, %s1279_s28 }
   0xa   : > { %s1286_s29 = scalar_lea.vmem %s209_s19, 32  ;;  %p1287_p11 = scmp.lt.s32.totalorder %s209_s19, %s209_s19 }
   0xb   : > { %p1439_p5 = pnand %p1426_p2, %p1199_p4  ;;  %p1288_p12 = scmp.lt.s32.totalorder %s1286_s29, %s1279_s28 }
   0xd   : > { %p1270_p7 = pneg %p1439_p5  ;;  %p1289_p13 = por %p1288_p12, %p1287_p11 }
   0xf   : > { %p1282_p9 = pnand %p1280_p8, %p1270_p7 }
  0x11   : > { %p1283_p10 = pneg %p1282_p9 }
  0x13   : > { %p1290_p0 = pnand %p1289_p13, %p1283_p10 }
  0x15   : > { %1293 = shalt.err (!%p1290_p0)
}
  0x16   : > { %1205 = dma.hbm_to_vmem [thread:$0]  (!%p1439_p5), %s1629_s2, 16, %s209_s19, [#allocation6]  }
  0x17   : > { %s1639_s23 = smov (%p1443_p6, %s35_s23), 0  ;;  %s1305_s6 = scalar_lea.vmem %s193_s27, 1024 }
  0x18   : > { %p1306_p1 = scmp.ne.s32.totalorder %s193_s27, %s1305_s6  ;;  %p1313_p9 = scmp.lt.s32.totalorder %s193_s27, %s193_s27 }
  0x19   : > { %p1314_p10 = scmp.lt.s32.totalorder %s1305_s6, %s1305_s6 }
  0x1a   : > { %p1308_p4 = pnand %p1306_p1, %p1270_p7 }
  0x1b   : > { %p1315_p11 = por %p1314_p10, %p1313_p9 }
  0x1c   : > { %p1309_p8 = pneg %p1308_p4 }
  0x1e   : > { %p1316_p12 = pnand %p1315_p11, %p1309_p8 }
  0x20   : > { %1319 = shalt.err (!%p1316_p12)
}
  0x21   : > { %s1380_s7 = smov 64   ;;  %s1381_s8 = smov 4  }
  0x22   : > { %1202 = dma.hbm_to_vmem [thread:$0]  (!%p1439_p5), %s1628_s1, 1024, %s193_s27, [#allocation4], %s1380_s7, %s1380_s7, %s1381_s8  }
  0x23   : > { %s1382_s11 = smov [#allocation7]  }
  0x24   : > { %s221_s12 = sshll.u32 %s1382_s11, 4  ;;  %s222_s12 = int_to_ptr.vmem [resolvable:$true] %s221_s12 }
  0x25   : > { %s1331_s13 = scalar_lea.vmem %s222_s12, 16  ;;  %s1338_s14 = scalar_lea.vmem %s222_s12, 32 }
  0x26   : > { %p1332_p6 = scmp.ne.s32.totalorder %s222_s12, %s1331_s13  ;;  %p1339_p1 = scmp.lt.s32.totalorder %s222_s12, %s222_s12 }
  0x27   : > { %p1340_p4 = scmp.lt.s32.totalorder %s1338_s14, %s1331_s13 }
  0x28   : > { %p1334_p13 = pnand %p1332_p6, %p1270_p7 }
  0x29   : > { %p1341_p8 = por %p1340_p4, %p1339_p1 }
  0x2a   : > { %p1335_p0 = pneg %p1334_p13 }
  0x2c   : > { %p1342_p9 = pnand %p1341_p8, %p1335_p0 }
  0x2e   : > { %1345 = shalt.err (!%p1342_p9)
}
  0x2f   : > { %1208 = dma.hbm_to_vmem [thread:$0]  (!%p1439_p5), %s1630_s3, 16, %s222_s12, [#allocation6]  }
  0x30   : > { %246 = sbr.rel (%p1430_p3) target bundleno = 317 (0x13d), region = 36 }
  0x35   : > { %1359 = dma.done.wait (%p1426_p2), [#allocation4], 1024  }
  0x36   : > { %1361 = vsyncadd (%p1426_p2), [#allocation4], 4294966272 }
  0x37   : > { %1363 = dma.done.wait (%p1426_p2), [#allocation6], 32  }
  0x38   : > { %1365 = vsyncadd (%p1426_p2), [#allocation6], 4294967264  ;;  %s1067_s20 = sshll.u32 %s1368_s15, 5  ;;  %v1244_v0 = vld [vmem:[#allocation3 + $0x38] sm:$0xff]   ;;  %v1245_v1 = vld [vmem:[#allocation3 + $0x30] sm:$0xff]  }
  0x39   : > { %p287_p7 = scmp.lt.s32.totalorder %s1067_s20, 63  ;;  %1123 = vmatprep.subr.bf16.mxu0 %v1244_v0  ;;  %1171 = vmatprep.subr.bf16.mxu1 %v1244_v0  ;;  %v1246_v2 = vld [vmem:[#allocation3 + $0x28] sm:$0xff]   ;;  %v1247_v3 = vld [vmem:[#allocation3 + $0x20] sm:$0xff]   ;;  %v1248_v6 = vld [vmem:[#allocation3 + $0x18] sm:$0xff]  }
  0x3a   : > { %1124 = vmatpush3.bf16.msra.mxu0 %v1244_v0  ;;  %1179 = vmatpush3.bf16.msra.mxu1 %v1244_v0  ;;  %v1249_v7 = vld [vmem:[#allocation3 + $0x10] sm:$0xff]   ;;  %v1250_v8 = vld [vmem:[#allocation3 + $0x8] sm:$0xff]   ;;  %v1251_v9 = vld [vmem:[#allocation3] sm:$0xff]  }
  0x3b   : > { %s1641_s20 = smov (!%p287_p7, %s1067_s20), 63  ;;  %1125 = vmatprep.subr.bf16.mxu0 %v1245_v1  ;;  %1172 = vmatprep.subr.bf16.mxu1 %v1245_v1  ;;  %v1512_v24 = vld [vmem:[#allocation5] ss:$0 sm:$0xff]  ;;  %v1515_v26 = vld [vmem:[#allocation7] ss:$0 sm:$0xff] }
  0x3c   : > { %s1068_s22 = sshll.u32 %s1641_s20, 2  ;;  %s1070_s15 = sshll.u32 %s1641_s20, 3 }
  0x3d   : > { %s1494_s21 = scalar_lea.vmem %s1627_s0, %s1068_s22  ;;  %s1522_s28 = scalar_lea.vmem %s1631_s4, %s1070_s15 }
  0x3e   : > { %1126 = vmatpush3.bf16.msra.mxu0 %v1245_v1  ;;  %1180 = vmatpush3.bf16.msra.mxu1 %v1245_v1  ;;  %v1252_v4 = vld [vmem:[%s1494_s21] sm:$0xff]   ;;  %v1254_v10 = vld [vmem:[%s1494_s21 + $0x8] sm:$0xff]   ;;  %v1256_v12 = vld [vmem:[%s1494_s21 + $0x10] sm:$0xff]  }
  0x3f   : > { %1127 = vmatprep.subr.bf16.mxu0 %v1246_v2  ;;  %1173 = vmatprep.subr.bf16.mxu1 %v1246_v2  ;;  %v1253_v5 = vld [vmem:[%s1494_s21 + $0x40] sm:$0xff]   ;;  %v1255_v11 = vld [vmem:[%s1494_s21 + $0x48] sm:$0xff]   ;;  %v1257_v13 = vld [vmem:[%s1494_s21 + $0x50] sm:$0xff]  }
  0x40   : > { %1139 = vmatprep.mubr.bf16.mxu0 %v1252_v4  ;;  %1155 = vmatprep.mubr.bf16.mxu1 %v1253_v5  ;;  %v1258_v14 = vld [vmem:[%s1494_s21 + $0x18] sm:$0xff]   ;;  %v1260_v16 = vld [vmem:[%s1494_s21 + $0x20] sm:$0xff]   ;;  %v1262_v18 = vld [vmem:[%s1494_s21 + $0x28] sm:$0xff]  }
  0x41   : > { %v1259_v15 = vld [vmem:[%s1494_s21 + $0x58] sm:$0xff]   ;;  %v1261_v17 = vld [vmem:[%s1494_s21 + $0x60] sm:$0xff]   ;;  %v1263_v19 = vld [vmem:[%s1494_s21 + $0x68] sm:$0xff]  }
  0x42   : > { %1128 = vmatpush3.bf16.msra.mxu0 %v1246_v2  ;;  %1181 = vmatpush3.bf16.msra.mxu1 %v1246_v2  ;;  %v1264_v20 = vld [vmem:[%s1494_s21 + $0x30] sm:$0xff]   ;;  %v1266_v22 = vld [vmem:[%s1494_s21 + $0x38] sm:$0xff]  }
  0x43   : > { %1129 = vmatprep.subr.bf16.mxu0 %v1247_v3  ;;  %1174 = vmatprep.subr.bf16.mxu1 %v1247_v3  ;;  %v1265_v21 = vld [vmem:[%s1494_s21 + $0x70] sm:$0xff]   ;;  %v1267_v23 = vld [vmem:[%s1494_s21 + $0x78] sm:$0xff]  }
  0x46   : > { %1130 = vmatpush3.bf16.msra.mxu0 %v1247_v3  ;;  %1182 = vmatpush3.bf16.msra.mxu1 %v1247_v3 }
  0x47   : > { %1131 = vmatprep.subr.bf16.mxu0 %v1248_v6  ;;  %1175 = vmatprep.subr.bf16.mxu1 %v1248_v6 }
  0x4a   : > { %1132 = vmatpush3.bf16.msra.mxu0 %v1248_v6  ;;  %1183 = vmatpush3.bf16.msra.mxu1 %v1248_v6 }
  0x4b   : > { %1133 = vmatprep.subr.bf16.mxu0 %v1249_v7  ;;  %1176 = vmatprep.subr.bf16.mxu1 %v1249_v7 }
  0x4e   : > { %1134 = vmatpush3.bf16.msra.mxu0 %v1249_v7  ;;  %1184 = vmatpush3.bf16.msra.mxu1 %v1249_v7 }
  0x4f   : > { %1135 = vmatprep.subr.bf16.mxu0 %v1250_v8  ;;  %1177 = vmatprep.subr.bf16.mxu1 %v1250_v8 }
  0x52   : > { %1136 = vmatpush3.bf16.msra.mxu0 %v1250_v8  ;;  %1185 = vmatpush3.bf16.msra.mxu1 %v1250_v8 }
  0x53   : > { %1137 = vmatprep.subr.bf16.mxu0 %v1251_v9  ;;  %1178 = vmatprep.subr.bf16.mxu1 %v1251_v9 }
  0x56   : > { %1138 = vmatpush3.bf16.msra.mxu0 %v1251_v9  ;;  %1186 = vmatpush3.bf16.msra.mxu1 %v1251_v9 }
  0x59   : > { %1140 = vmatmul.mubr.bf16.vlgmr.msra.gmra.mxu0 %v1254_v10  ;;  %1156 = vmatmul.mubr.bf16.vlgmr.msra.gmra.mxu1 %v1255_v11 }
  0x5a   : > { %1143 = vmatprep.mubr.bf16.mxu0 %v1256_v12  ;;  %1159 = vmatprep.mubr.bf16.mxu1 %v1257_v13 }
  0x61   : > { %1144 = vmatmul.mubr.bf16.gmra.mxu0 %v1258_v14  ;;  %1160 = vmatmul.mubr.bf16.gmra.mxu1 %v1259_v15 }
  0x62   : > { %1147 = vmatprep.mubr.bf16.mxu0 %v1260_v16  ;;  %1163 = vmatprep.mubr.bf16.mxu1 %v1261_v17 }
  0x69   : > { %1148 = vmatmul.mubr.bf16.gmra.mxu0 %v1262_v18  ;;  %1164 = vmatmul.mubr.bf16.gmra.mxu1 %v1263_v19 }
  0x6a   : > { %1151 = vmatprep.mubr.bf16.mxu0 %v1264_v20  ;;  %1167 = vmatprep.mubr.bf16.mxu1 %v1265_v21 }
  0x71   : > { %1152 = vmatmul.mubr.bf16.gmra.mxu0 %v1266_v22  ;;  %1168 = vmatmul.mubr.bf16.gmra.mxu1 %v1267_v23 }
 0x119   : > { %v1141_v25 = vpop.f32.mrf.mxu0  ;;  %v1157_v27 = vpop.f32.mrf.mxu1 }
 0x11a   : > { %v835_v28 = vmul.f32 %v1141_v25, %v1512_v24  ;;  %v851_v29 = vmul.f32 %v1157_v27, %v1512_v24 }
 0x11b   : > { %v600_v30 = vpop.f32.mrf.mxu0  ;;  %v664_v31 = vpop.f32.mrf.mxu1 }
 0x11c   : > { %v874_v32 = vadd.f32 %v1515_v26, %v835_v28  ;;  %v890_v33 = vadd.f32 %v1515_v26, %v851_v29  ;;  %v833_v34 = vmul.f32 %v1512_v24, %v600_v30  ;;  %v849_v35 = vmul.f32 %v1512_v24, %v664_v31 }
 0x11d   : > { %v1142_v36 = vpop.f32.mrf.mxu0  ;;  %v1158_v37 = vpop.f32.mrf.mxu1 }
 0x11e   : > { %906 = vst [vmem:[%s1522_s28 + $0x10] sm:$0xff] %v874_v32  ;;  %922 = vst [vmem:[%s1522_s28 + $0x90] sm:$0xff] %v890_v33  ;;  %v872_v38 = vadd.f32 %v1515_v26, %v833_v34  ;;  %v888_v39 = vadd.f32 %v1515_v26, %v849_v35  ;;  %v836_v40 = vmul.f32 %v1142_v36, %v1512_v24 }
 0x11f   : > { %v852_v41 = vmul.f32 %v1158_v37, %v1512_v24  ;;  %v603_v42 = vpop.f32.mrf.mxu0  ;;  %v667_v43 = vpop.f32.mrf.mxu1 }
 0x120   : > { %904 = vst [vmem:[%s1522_s28] sm:$0xff] %v872_v38  ;;  %920 = vst [vmem:[%s1522_s28 + $0x80] sm:$0xff] %v888_v39  ;;  %v875_v44 = vadd.f32 %v1515_v26, %v836_v40  ;;  %v834_v46 = vmul.f32 %v1512_v24, %v603_v42  ;;  %v850_v47 = vmul.f32 %v1512_v24, %v667_v43 }
 0x121   : > { %v891_v45 = vadd.f32 %v1515_v26, %v852_v41  ;;  %v1145_v48 = vpop.f32.mrf.mxu0  ;;  %v1161_v49 = vpop.f32.mrf.mxu1 }
 0x122   : > { %907 = vst [vmem:[%s1522_s28 + $0x18] sm:$0xff] %v875_v44  ;;  %v873_v50 = vadd.f32 %v1515_v26, %v834_v46  ;;  %v889_v51 = vadd.f32 %v1515_v26, %v850_v47  ;;  %v839_v52 = vmul.f32 %v1145_v48, %v1512_v24  ;;  %v855_v53 = vmul.f32 %v1161_v49, %v1512_v24 }
 0x123   : > { %923 = vst [vmem:[%s1522_s28 + $0x98] sm:$0xff] %v891_v45  ;;  %v616_v54 = vpop.f32.mrf.mxu0  ;;  %v680_v55 = vpop.f32.mrf.mxu1 }
 0x124   : > { %905 = vst [vmem:[%s1522_s28 + $0x8] sm:$0xff] %v873_v50  ;;  %921 = vst [vmem:[%s1522_s28 + $0x88] sm:$0xff] %v889_v51  ;;  %v878_v56 = vadd.f32 %v1515_v26, %v839_v52  ;;  %v894_v57 = vadd.f32 %v1515_v26, %v855_v53  ;;  %v837_v58 = vmul.f32 %v1512_v24, %v616_v54 }
 0x125   : > { %v853_v59 = vmul.f32 %v1512_v24, %v680_v55  ;;  %v1146_v60 = vpop.f32.mrf.mxu0  ;;  %v1162_v61 = vpop.f32.mrf.mxu1 }
 0x126   : > { %910 = vst [vmem:[%s1522_s28 + $0x30] sm:$0xff] %v878_v56  ;;  %926 = vst [vmem:[%s1522_s28 + $0xb0] sm:$0xff] %v894_v57  ;;  %v876_v62 = vadd.f32 %v1515_v26, %v837_v58  ;;  %v840_v0 = vmul.f32 %v1146_v60, %v1512_v24  ;;  %v856_v1 = vmul.f32 %v1162_v61, %v1512_v24 }
 0x127   : > { %v892_v63 = vadd.f32 %v1515_v26, %v853_v59  ;;  %v619_v2 = vpop.f32.mrf.mxu0  ;;  %v683_v3 = vpop.f32.mrf.mxu1 }
 0x128   : > { %908 = vst [vmem:[%s1522_s28 + $0x20] sm:$0xff] %v876_v62  ;;  %v879_v4 = vadd.f32 %v1515_v26, %v840_v0  ;;  %v895_v5 = vadd.f32 %v1515_v26, %v856_v1  ;;  %v838_v6 = vmul.f32 %v1512_v24, %v619_v2  ;;  %v854_v7 = vmul.f32 %v1512_v24, %v683_v3 }
 0x129   : > { %924 = vst [vmem:[%s1522_s28 + $0xa0] sm:$0xff] %v892_v63  ;;  %v1149_v8 = vpop.f32.mrf.mxu0  ;;  %v1165_v9 = vpop.f32.mrf.mxu1 }
 0x12a   : > { %911 = vst [vmem:[%s1522_s28 + $0x38] sm:$0xff] %v879_v4  ;;  %927 = vst [vmem:[%s1522_s28 + $0xb8] sm:$0xff] %v895_v5  ;;  %v877_v10 = vadd.f32 %v1515_v26, %v838_v6  ;;  %v893_v11 = vadd.f32 %v1515_v26, %v854_v7  ;;  %v843_v12 = vmul.f32 %v1149_v8, %v1512_v24 }
 0x12b   : > { %v859_v13 = vmul.f32 %v1165_v9, %v1512_v24  ;;  %v632_v14 = vpop.f32.mrf.mxu0  ;;  %v696_v15 = vpop.f32.mrf.mxu1 }
 0x12c   : > { %909 = vst [vmem:[%s1522_s28 + $0x28] sm:$0xff] %v877_v10  ;;  %925 = vst [vmem:[%s1522_s28 + $0xa8] sm:$0xff] %v893_v11  ;;  %v882_v16 = vadd.f32 %v1515_v26, %v843_v12  ;;  %v841_v18 = vmul.f32 %v1512_v24, %v632_v14  ;;  %v857_v19 = vmul.f32 %v1512_v24, %v696_v15 }
 0x12d   : > { %v898_v17 = vadd.f32 %v1515_v26, %v859_v13  ;;  %v1150_v20 = vpop.f32.mrf.mxu0  ;;  %v1166_v21 = vpop.f32.mrf.mxu1 }
 0x12e   : > { %914 = vst [vmem:[%s1522_s28 + $0x50] sm:$0xff] %v882_v16  ;;  %v880_v22 = vadd.f32 %v1515_v26, %v841_v18  ;;  %v896_v23 = vadd.f32 %v1515_v26, %v857_v19  ;;  %v844_v25 = vmul.f32 %v1150_v20, %v1512_v24  ;;  %v860_v27 = vmul.f32 %v1166_v21, %v1512_v24 }
 0x12f   : > { %930 = vst [vmem:[%s1522_s28 + $0xd0] sm:$0xff] %v898_v17  ;;  %v635_v28 = vpop.f32.mrf.mxu0  ;;  %v699_v29 = vpop.f32.mrf.mxu1 }
 0x130   : > { %912 = vst [vmem:[%s1522_s28 + $0x40] sm:$0xff] %v880_v22  ;;  %928 = vst [vmem:[%s1522_s28 + $0xc0] sm:$0xff] %v896_v23  ;;  %v883_v30 = vadd.f32 %v1515_v26, %v844_v25  ;;  %v899_v31 = vadd.f32 %v1515_v26, %v860_v27  ;;  %v842_v32 = vmul.f32 %v1512_v24, %v635_v28 }
 0x131   : > { %v858_v33 = vmul.f32 %v1512_v24, %v699_v29  ;;  %v1153_v34 = vpop.f32.mrf.mxu0  ;;  %v1169_v35 = vpop.f32.mrf.mxu1 }
 0x132   : > { %915 = vst [vmem:[%s1522_s28 + $0x58] sm:$0xff] %v883_v30  ;;  %931 = vst [vmem:[%s1522_s28 + $0xd8] sm:$0xff] %v899_v31  ;;  %v881_v36 = vadd.f32 %v1515_v26, %v842_v32  ;;  %v847_v38 = vmul.f32 %v1153_v34, %v1512_v24  ;;  %v863_v39 = vmul.f32 %v1169_v35, %v1512_v24 }
 0x133   : > { %v897_v37 = vadd.f32 %v1515_v26, %v858_v33  ;;  %v648_v40 = vpop.f32.mrf.mxu0  ;;  %v712_v41 = vpop.f32.mrf.mxu1 }
 0x134   : > { %913 = vst [vmem:[%s1522_s28 + $0x48] sm:$0xff] %v881_v36  ;;  %v886_v42 = vadd.f32 %v1515_v26, %v847_v38  ;;  %v902_v43 = vadd.f32 %v1515_v26, %v863_v39  ;;  %v845_v44 = vmul.f32 %v1512_v24, %v648_v40  ;;  %v861_v45 = vmul.f32 %v1512_v24, %v712_v41 }
 0x135   : > { %929 = vst [vmem:[%s1522_s28 + $0xc8] sm:$0xff] %v897_v37  ;;  %v1154_v46 = vpop.f32.mrf.mxu0  ;;  %v1170_v47 = vpop.f32.mrf.mxu1 }
 0x136   : > { %918 = vst [vmem:[%s1522_s28 + $0x70] sm:$0xff] %v886_v42  ;;  %934 = vst [vmem:[%s1522_s28 + $0xf0] sm:$0xff] %v902_v43  ;;  %v884_v48 = vadd.f32 %v1515_v26, %v845_v44  ;;  %v900_v49 = vadd.f32 %v1515_v26, %v861_v45  ;;  %v848_v50 = vmul.f32 %v1154_v46, %v1512_v24 }
 0x137   : > { %v864_v51 = vmul.f32 %v1170_v47, %v1512_v24  ;;  %v651_v52 = vpop.f32.mrf.mxu0  ;;  %v715_v53 = vpop.f32.mrf.mxu1 }
 0x138   : > { %916 = vst [vmem:[%s1522_s28 + $0x60] sm:$0xff] %v884_v48  ;;  %932 = vst [vmem:[%s1522_s28 + $0xe0] sm:$0xff] %v900_v49  ;;  %v887_v54 = vadd.f32 %v1515_v26, %v848_v50  ;;  %v846_v56 = vmul.f32 %v1512_v24, %v651_v52  ;;  %v862_v57 = vmul.f32 %v1512_v24, %v715_v53 }
 0x139   : > { %v903_v55 = vadd.f32 %v1515_v26, %v864_v51 }
 0x13a   : > { %919 = vst [vmem:[%s1522_s28 + $0x78] sm:$0xff] %v887_v54  ;;  %v885_v58 = vadd.f32 %v1515_v26, %v846_v56  ;;  %v901_v59 = vadd.f32 %v1515_v26, %v862_v57 }
 0x13b   : > { %935 = vst [vmem:[%s1522_s28 + $0xf8] sm:$0xff] %v903_v55 }
 0x13c   : > { %917 = vst [vmem:[%s1522_s28 + $0x68] sm:$0xff] %v885_v58  ;;  %933 = vst [vmem:[%s1522_s28 + $0xe8] sm:$0xff] %v901_v59 }
 0x13d PF: > { %s16_s17 = sadd.s32 1, %s1376_s17   ;;  %s1636_s15 = smov %s1372_s16 }
 0x13e   : > { %p13_p2 = scmp.ge.s32.totalorder %s16_s17, 4   ;;  %s1637_s16 = smov %s1639_s23 }
 0x140   :  { %15 = sbr.rel (!%p13_p2) target bundleno = 3 (0x3), region = 90 }
 0x145   :  { %964 = vsyncpa [#allocation4], 1 }
 0x146   :  { %966 = vsyncpa [#allocation4 + $0x1], 1 }
 0x147   :  { %967 = vsyncpa [#allocation6], 1 }

// kernel: inception_b_forward.8
= control target key start
LH: loop header
LB: loop body
LE: loop exit
PB: predicated region body
PF: predicated region fallthrough
CT: control target
= control target key end

     0   :  { %s2701_s15 = smov 0   ;;  %s2703_s16 = smov 0   ;;  %s3282_s0 = inlined_call_operand.vmem [shape: bf16[512,640], index: 0, kind: input, shape index: {}]   ;;  %s3283_s1 = inlined_call_operand.vmem [shape: bf16[640,128], index: 1, kind: input, shape index: {}]   ;;  %s3284_s2 = inlined_call_operand.vmem [shape: f32[1,128], index: 2, kind: input, shape index: {}]   ;;  %s3285_s3 = inlined_call_operand.vmem [shape: f32[1,128], index: 3, kind: input, shape index: {}]   ;;  %s3286_s4 = inlined_call_operand.vmem [shape: f32[512,128], index: 4, kind: output, shape index: {}]  }
   0x1   :  { %s2705_s17 = smov 0  }
   0x2 LB: > { %s33_s18 = sadd.s32 1, %s2670_s16  ;;  %p2034_p0 = scmp.ge.s32.totalorder %s2674_s17, 1  ;;  %s2674_s17 = sphi %s2705_s17, %s14_s17   ;;  %s2670_s16 = sphi %s2703_s16, %s3324_s16   ;;  %s2666_s15 = sphi %s2701_s15, %s3323_s15  }
   0x3   : > { %p35_p1 = scmp.ge.s32.totalorder %s33_s18, 2  ;;  %p224_p2 = scmp.lt.s32.totalorder %s2674_s17, 3 }
   0x5   : > { %s3326_s18 = smov (%p35_p1, %s33_s18), 0  ;;  %p225_p3 = pnand %p2034_p0, %p224_p2 }
   0x7   : > { %228 = sbr.rel (%p225_p3) target bundleno = 407 (0x197), region = 36 }
   0xc   : > { %v2500_v0 = vld [vmem:[%s3283_s1 + $0x78] sm:$0xff]   ;;  %s2035_s21 = sshll.u32 %s2666_s15, 5  ;;  %v2502_v2 = vld [vmem:[%s3283_s1 + $0x70] sm:$0xff]   ;;  %v2504_v4 = vld [vmem:[%s3283_s1 + $0x68] sm:$0xff]  }
   0xd   : > { %v2501_v1 = vld [vmem:[%s3283_s1 + $0x38] sm:$0xff]   ;;  %2163 = vmatprep.subr.bf16.mxu0 %v2500_v0  ;;  %2459 = vmatprep.subr.bf16.mxu1 %v2500_v0  ;;  %p274_p4 = scmp.lt.s32.totalorder %s2035_s21, 63  ;;  %v2503_v3 = vld [vmem:[%s3283_s1 + $0x30] sm:$0xff]   ;;  %v2505_v5 = vld [vmem:[%s3283_s1 + $0x28] sm:$0xff]  }
   0xe   : > { %2164 = vmatpush3.bf16.msra.mxu0 %v2501_v1  ;;  %2467 = vmatpush3.bf16.msra.mxu1 %v2501_v1  ;;  %v2506_v6 = vld [vmem:[%s3283_s1 + $0x60] sm:$0xff]   ;;  %v2508_v8 = vld [vmem:[%s3283_s1 + $0x58] sm:$0xff]   ;;  %v2510_v10 = vld [vmem:[%s3283_s1 + $0x50] sm:$0xff]  }
   0xf   : > { %2165 = vmatprep.subr.bf16.mxu0 %v2502_v2  ;;  %2460 = vmatprep.subr.bf16.mxu1 %v2502_v2  ;;  %s3328_s21 = smov (!%p274_p4, %s2035_s21), 63  ;;  %v2507_v7 = vld [vmem:[%s3283_s1 + $0x20] sm:$0xff]   ;;  %v2509_v9 = vld [vmem:[%s3283_s1 + $0x18] sm:$0xff]   ;;  %v2511_v13 = vld [vmem:[%s3283_s1 + $0x10] sm:$0xff]  }
  0x10   : > { %s2475_s8 = smul.u32 20, %s3328_s21  ;;  %v2512_v14 = vld [vmem:[%s3283_s1 + $0x48] sm:$0xff]   ;;  %v2514_v16 = vld [vmem:[%s3283_s1 + $0x40] sm:$0xff]   ;;  %v2522_v18 = vld [vmem:[%s3283_s1 + $0xf8] sm:$0xff]   ;;  %s2038_s19 = sshll.u32 %s3328_s21, 3 }
  0x11   : > { %v2513_v15 = vld [vmem:[%s3283_s1 + $0x8] sm:$0xff]   ;;  %v2515_v17 = vld [vmem:[%s3283_s1] sm:$0xff]   ;;  %v2525_v19 = vld [vmem:[%s3283_s1 + $0x138] sm:$0xff]   ;;  %s3085_s21 = scalar_lea.vmem %s3286_s4, %s2038_s19 }
  0x12   : > { %2166 = vmatpush3.bf16.msra.mxu0 %v2503_v3  ;;  %2468 = vmatpush3.bf16.msra.mxu1 %v2503_v3  ;;  %s2752_s15 = scalar_lea.vmem %s3282_s0, %s2475_s8  ;;  %v2523_v22 = vld [vmem:[%s3283_s1 + $0xb8] sm:$0xff]   ;;  %v2524_v23 = vld [vmem:[%s3283_s1 + $0xf0] sm:$0xff]   ;;  %v2533_v29 = vld [vmem:[%s3283_s1 + $0xe8] sm:$0xff]  }
  0x13   : > { %2167 = vmatprep.subr.bf16.mxu0 %v2504_v4  ;;  %2461 = vmatprep.subr.bf16.mxu1 %v2504_v4  ;;  %v2518_v11 = vld [vmem:[%s2752_s15 + $0x4] ss:$20 sps:$4 sm:$0xff]   ;;  %v2516_v20 = vld [vmem:[%s2752_s15] ss:$20 sps:$4 sm:$0xff]   ;;  %v2531_v28 = vld [vmem:[%s2752_s15 + $0x28] ss:$20 sps:$4 sm:$0xff]  }
  0x14   : > { %v2521_v12 = vld [vmem:[%s2752_s15 + $0x1e4] ss:$20 sps:$4 sm:$0xff]   ;;  %1241 = vmatprep.mubr.bf16.mxu0 %v2518_v11  ;;  %v2519_v21 = vld [vmem:[%s2752_s15 + $0x1e0] ss:$20 sps:$4 sm:$0xff]   ;;  %v2532_v30 = vld [vmem:[%s2752_s15 + $0x208] ss:$20 sps:$4 sm:$0xff]  }
  0x15   : > { %1337 = vmatprep.mubr.bf16.mxu1 %v2521_v12  ;;  %v2527_v24 = vld [vmem:[%s2752_s15 + $0x2c] ss:$20 sps:$4 sm:$0xff]   ;;  %v2544_v26 = vld [vmem:[%s3283_s1 + $0x130] sm:$0xff]   ;;  %v2543_v36 = vld [vmem:[%s3283_s1 + $0xd8] sm:$0xff]  }
  0x16   : > { %2168 = vmatpush3.bf16.msra.mxu0 %v2505_v5  ;;  %2469 = vmatpush3.bf16.msra.mxu1 %v2505_v5  ;;  %v2529_v25 = vld [vmem:[%s2752_s15 + $0x20c] ss:$20 sps:$4 sm:$0xff]   ;;  %v2526_v27 = vld [vmem:[%s3283_s1 + $0xb0] sm:$0xff]   ;;  %v2545_v40 = vld [vmem:[%s3283_s1 + $0x98] sm:$0xff]  }
  0x17   : > { %2169 = vmatprep.subr.bf16.mxu0 %v2506_v6  ;;  %2462 = vmatprep.subr.bf16.mxu1 %v2506_v6  ;;  %v2534_v31 = vld [vmem:[%s3283_s1 + $0xa8] sm:$0xff]   ;;  %v2535_v33 = vld [vmem:[%s3283_s1 + $0xe0] sm:$0xff]   ;;  %v2546_v41 = vld [vmem:[%s3283_s1 + $0xd0] sm:$0xff]  }
  0x18   : > { %v2537_v32 = vld [vmem:[%s2752_s15 + $0x54] ss:$20 sps:$4 sm:$0xff]   ;;  %v2536_v35 = vld [vmem:[%s3283_s1 + $0xa0] sm:$0xff]   ;;  %v2548_v42 = vld [vmem:[%s2752_s15 + $0x7c] ss:$20 sps:$4 sm:$0xff]  }
  0x19   : > { %v2539_v34 = vld [vmem:[%s2752_s15 + $0x234] ss:$20 sps:$4 sm:$0xff]   ;;  %v2541_v37 = vld [vmem:[%s2752_s15 + $0x50] ss:$20 sps:$4 sm:$0xff]   ;;  %v2552_v46 = vld [vmem:[%s2752_s15 + $0x78] ss:$20 sps:$4 sm:$0xff]  }
  0x1a   : > { %2170 = vmatpush3.bf16.msra.mxu0 %v2507_v7  ;;  %2470 = vmatpush3.bf16.msra.mxu1 %v2507_v7  ;;  %v2557_v38 = vld [vmem:[%s3283_s1 + $0x128] sm:$0xff]   ;;  %v2542_v39 = vld [vmem:[%s2752_s15 + $0x230] ss:$20 sps:$4 sm:$0xff]   ;;  %v2578_v52 = vld [vmem:[%s3283_s1 + $0x118] sm:$0xff]  }
  0x1b   : > { %2171 = vmatprep.subr.bf16.mxu0 %v2508_v8  ;;  %2463 = vmatprep.subr.bf16.mxu1 %v2508_v8  ;;  %v2550_v43 = vld [vmem:[%s2752_s15 + $0x25c] ss:$20 sps:$4 sm:$0xff]   ;;  %v2571_v45 = vld [vmem:[%s3283_s1 + $0x120] sm:$0xff]   ;;  %v2553_v47 = vld [vmem:[%s2752_s15 + $0x258] ss:$20 sps:$4 sm:$0xff]  }
  0x1c   : > { %v2547_v44 = vld [vmem:[%s3283_s1 + $0x90] sm:$0xff]   ;;  %v2554_v48 = vld [vmem:[%s3283_s1 + $0xc8] sm:$0xff]   ;;  %v2556_v50 = vld [vmem:[%s3283_s1 + $0xc0] sm:$0xff]  }
  0x1d   : > { %v2555_v49 = vld [vmem:[%s3283_s1 + $0x88] sm:$0xff]   ;;  %v2559_v51 = vld [vmem:[%s2752_s15 + $0xa4] ss:$20 sps:$4 sm:$0xff]   ;;  %v2564_v56 = vld [vmem:[%s2752_s15 + $0xa0] ss:$20 sps:$4 sm:$0xff]  }
  0x1e   : > { %2172 = vmatpush3.bf16.msra.mxu0 %v2509_v9  ;;  %2471 = vmatpush3.bf16.msra.mxu1 %v2509_v9  ;;  %v2563_v53 = vld [vmem:[%s2752_s15 + $0xc] ss:$20 sps:$4 sm:$0xff]   ;;  %v2561_v55 = vld [vmem:[%s2752_s15 + $0x8] ss:$20 sps:$4 sm:$0xff]   ;;  %v2591_v57 = vld [vmem:[%s3283_s1 + $0x110] sm:$0xff]  }
  0x1f   : > { %2173 = vmatprep.subr.bf16.mxu0 %v2510_v10  ;;  %2464 = vmatprep.subr.bf16.mxu1 %v2510_v10  ;;  %v2558_v54 = vld [vmem:[%s3283_s1 + $0x80] sm:$0xff]   ;;  %v2567_v59 = vld [vmem:[%s2752_s15 + $0x34] ss:$20 sps:$4 sm:$0xff]   ;;  %v2574_v0 = vld [vmem:[%s2752_s15 + $0x5c] ss:$20 sps:$4 sm:$0xff]  }
  0x20   : > { %v2565_v58 = vld [vmem:[%s2752_s15 + $0xcc] ss:$20 sps:$4 sm:$0xff]   ;;  %v2569_v61 = vld [vmem:[%s2752_s15 + $0xc8] ss:$20 sps:$4 sm:$0xff]   ;;  %v2570_v62 = vld [vmem:[%s2752_s15 + $0x30] ss:$20 sps:$4 sm:$0xff]  }
  0x21   : > { %v2598_v60 = vld [vmem:[%s3283_s1 + $0x108] sm:$0xff]   ;;  %v2611_v1 = vld [vmem:[%s3283_s1 + $0x100] sm:$0xff]   ;;  %v2579_v4 = vld [vmem:[%s2752_s15 + $0x11c] ss:$20 sps:$4 sm:$0xff]  }
  0x22   : > { %2174 = vmatpush3.bf16.msra.mxu0 %v2511_v13  ;;  %2472 = vmatpush3.bf16.msra.mxu1 %v2511_v13  ;;  %v2572_v63 = vld [vmem:[%s2752_s15 + $0xf4] ss:$20 sps:$4 sm:$0xff]   ;;  %v2576_v2 = vld [vmem:[%s2752_s15 + $0xf0] ss:$20 sps:$4 sm:$0xff]   ;;  %v2577_v3 = vld [vmem:[%s2752_s15 + $0x58] ss:$20 sps:$4 sm:$0xff]  }
  0x23   : > { %2175 = vmatprep.subr.bf16.mxu0 %v2512_v14  ;;  %2465 = vmatprep.subr.bf16.mxu1 %v2512_v14  ;;  %v2581_v5 = vld [vmem:[%s2752_s15 + $0x84] ss:$20 sps:$4 sm:$0xff]   ;;  %v2584_v7 = vld [vmem:[%s2752_s15 + $0x80] ss:$20 sps:$4 sm:$0xff]   ;;  %v2590_v11 = vld [vmem:[%s2752_s15 + $0xa8] ss:$20 sps:$4 sm:$0xff]  }
  0x24   : > { %v2583_v6 = vld [vmem:[%s2752_s15 + $0x118] ss:$20 sps:$4 sm:$0xff]   ;;  %v2589_v10 = vld [vmem:[%s2752_s15 + $0x140] ss:$20 sps:$4 sm:$0xff]   ;;  %v2596_v14 = vld [vmem:[%s2752_s15 + $0x168] ss:$20 sps:$4 sm:$0xff]  }
  0x25   : > { %v2585_v8 = vld [vmem:[%s2752_s15 + $0x144] ss:$20 sps:$4 sm:$0xff]   ;;  %v2587_v9 = vld [vmem:[%s2752_s15 + $0xac] ss:$20 sps:$4 sm:$0xff]   ;;  %v2594_v13 = vld [vmem:[%s2752_s15 + $0xd4] ss:$20 sps:$4 sm:$0xff]  }
  0x26   : > { %2176 = vmatpush3.bf16.msra.mxu0 %v2513_v15  ;;  %2473 = vmatpush3.bf16.msra.mxu1 %v2513_v15  ;;  %v2592_v12 = vld [vmem:[%s2752_s15 + $0x16c] ss:$20 sps:$4 sm:$0xff]   ;;  %v2597_v15 = vld [vmem:[%s2752_s15 + $0xd0] ss:$20 sps:$4 sm:$0xff]  }
  0x27   : > { %2177 = vmatprep.subr.bf16.mxu0 %v2514_v16  ;;  %2466 = vmatprep.subr.bf16.mxu1 %v2514_v16  ;;  %v2599_v16 = vld [vmem:[%s2752_s15 + $0x194] ss:$20 sps:$4 sm:$0xff]  }
  0x2a   : > { %2178 = vmatpush3.bf16.msra.mxu0 %v2515_v17  ;;  %2474 = vmatpush3.bf16.msra.mxu1 %v2515_v17  ;;  %v2601_v17 = vld [vmem:[%s2752_s15 + $0xfc] ss:$20 sps:$4 sm:$0xff]  }
  0x2b   : > { %2275 = vmatprep.subr.bf16.mxu1 %v2522_v18  ;;  %2411 = vmatprep.subr.bf16.mxu0 %v2525_v19  ;;  %v2603_v18 = vld [vmem:[%s2752_s15 + $0x190] ss:$20 sps:$4 sm:$0xff]  }
  0x2d   : > { %1242 = vmatmul.mubr.bf16.vlgmr.msra.gmra.mxu0 %v2516_v20  ;;  %1338 = vmatmul.mubr.bf16.vlgmr.msra.gmra.mxu1 %v2519_v21  ;;  %v2605_v20 = vld [vmem:[%s2752_s15 + $0x1bc] ss:$20 sps:$4 sm:$0xff]   ;;  %v2607_v21 = vld [vmem:[%s2752_s15 + $0x124] ss:$20 sps:$4 sm:$0xff]  }
  0x2e   : > { %2276 = vmatpush3.bf16.msra.mxu1 %v2523_v22  ;;  %2412 = vmatpush3.bf16.msra.mxu0 %v2525_v19  ;;  %v2604_v19 = vld [vmem:[%s2752_s15 + $0xf8] ss:$20 sps:$4 sm:$0xff]  }
  0x2f   : > { %2277 = vmatprep.subr.bf16.mxu1 %v2524_v23  ;;  %1249 = vmatprep.mubr.bf16.mxu0 %v2527_v24  ;;  %v2609_v22 = vld [vmem:[%s2752_s15 + $0x1b8] ss:$20 sps:$4 sm:$0xff]   ;;  %v2610_v23 = vld [vmem:[%s2752_s15 + $0x120] ss:$20 sps:$4 sm:$0xff]  }
  0x30   : > { %1345 = vmatprep.mubr.bf16.mxu1 %v2529_v25  ;;  %2413 = vmatprep.subr.bf16.mxu0 %v2544_v26  ;;  %v2612_v24 = vld [vmem:[%s2752_s15 + $0x14c] ss:$20 sps:$4 sm:$0xff]   ;;  %v2614_v25 = vld [vmem:[%s2752_s15 + $0x10] ss:$20 sps:$4 sm:$0xff]  }
  0x32   : > { %2278 = vmatpush3.bf16.msra.mxu1 %v2526_v27  ;;  %2414 = vmatpush3.bf16.msra.mxu0 %v2544_v26  ;;  %v2615_v26 = vld [vmem:[%s2752_s15 + $0x148] ss:$20 sps:$4 sm:$0xff]   ;;  %v2616_v27 = vld [vmem:[%s2752_s15 + $0x38] ss:$20 sps:$4 sm:$0xff]  }
  0x33   : > { %2279 = vmatprep.subr.bf16.mxu1 %v2533_v29  ;;  %2415 = vmatprep.subr.bf16.mxu0 %v2557_v38  ;;  %v2619_v29 = vld [vmem:[%s2752_s15 + $0x60] ss:$20 sps:$4 sm:$0xff]  }
  0x35   : > { %1250 = vmatmul.mubr.bf16.gmra.mxu0 %v2531_v28  ;;  %1346 = vmatmul.mubr.bf16.gmra.mxu1 %v2532_v30  ;;  %v2617_v28 = vld [vmem:[%s2752_s15 + $0x174] ss:$20 sps:$4 sm:$0xff]   ;;  %v2620_v30 = vld [vmem:[%s2752_s15 + $0x170] ss:$20 sps:$4 sm:$0xff]  }
  0x36   : > { %2280 = vmatpush3.bf16.msra.mxu1 %v2534_v31  ;;  %1257 = vmatprep.mubr.bf16.mxu0 %v2537_v32  ;;  %v2621_v31 = vld [vmem:[%s2752_s15 + $0x88] ss:$20 sps:$4 sm:$0xff]  }
  0x37   : > { %2281 = vmatprep.subr.bf16.mxu1 %v2535_v33  ;;  %1353 = vmatprep.mubr.bf16.mxu1 %v2539_v34  ;;  %v2622_v32 = vld [vmem:[%s2752_s15 + $0x19c] ss:$20 sps:$4 sm:$0xff]   ;;  %v2625_v34 = vld [vmem:[%s2752_s15 + $0x198] ss:$20 sps:$4 sm:$0xff]  }
  0x38   : > { %2416 = vmatpush3.bf16.msra.mxu0 %v2557_v38  ;;  %v2624_v33 = vld [vmem:[%s2752_s15 + $0xb0] ss:$20 sps:$4 sm:$0xff]   ;;  %v2630_v38 = vld [vmem:[%s2752_s15 + $0x1c0] ss:$20 sps:$4 sm:$0xff]  }
  0x39   : > { %2417 = vmatprep.subr.bf16.mxu0 %v2571_v45 }
  0x3a   : > { %2282 = vmatpush3.bf16.msra.mxu1 %v2536_v35  ;;  %v2626_v35 = vld [vmem:[%s2752_s15 + $0xd8] ss:$20 sps:$4 sm:$0xff]  }
  0x3b   : > { %2283 = vmatprep.subr.bf16.mxu1 %v2543_v36  ;;  %v2627_v36 = vld [vmem:[%s2752_s15 + $0x1c4] ss:$20 sps:$4 sm:$0xff]  }
  0x3c   : > { %2418 = vmatpush3.bf16.msra.mxu0 %v2571_v45  ;;  %v2639_v45 = vld [vmem:[%s2752_s15 + $0x1a0] ss:$20 sps:$4 sm:$0xff]  }
  0x3d   : > { %1258 = vmatmul.mubr.bf16.gmra.mxu0 %v2541_v37  ;;  %1354 = vmatmul.mubr.bf16.gmra.mxu1 %v2542_v39  ;;  %v2629_v37 = vld [vmem:[%s2752_s15 + $0x100] ss:$20 sps:$4 sm:$0xff]   ;;  %v2631_v39 = vld [vmem:[%s2752_s15 + $0x128] ss:$20 sps:$4 sm:$0xff]  }
  0x3e   : > { %2284 = vmatpush3.bf16.msra.mxu1 %v2545_v40  ;;  %1265 = vmatprep.mubr.bf16.mxu0 %v2548_v42  ;;  %v2632_v40 = vld [vmem:[%s2752_s15 + $0x1ec] ss:$20 sps:$4 sm:$0xff]   ;;  %v2635_v42 = vld [vmem:[%s2752_s15 + $0x1e8] ss:$20 sps:$4 sm:$0xff]  }
  0x3f   : > { %2285 = vmatprep.subr.bf16.mxu1 %v2546_v41  ;;  %1361 = vmatprep.mubr.bf16.mxu1 %v2550_v43  ;;  %v2634_v41 = vld [vmem:[%s2752_s15 + $0x150] ss:$20 sps:$4 sm:$0xff]   ;;  %v2636_v43 = vld [vmem:[%s2752_s15 + $0x178] ss:$20 sps:$4 sm:$0xff]  }
  0x40   : > { %2419 = vmatprep.subr.bf16.mxu0 %v2578_v52 }
  0x41   : > { %2420 = vmatpush3.bf16.msra.mxu0 %v2578_v52  ;;  %v2647_v52 = vld [vmem:[%s2752_s15 + $0x264] ss:$20 sps:$4 sm:$0xff]  }
  0x42   : > { %2286 = vmatpush3.bf16.msra.mxu1 %v2547_v44  ;;  %2421 = vmatprep.subr.bf16.mxu0 %v2591_v57  ;;  %v2637_v44 = vld [vmem:[%s2752_s15 + $0x214] ss:$20 sps:$4 sm:$0xff]  }
  0x43   : > { %2287 = vmatprep.subr.bf16.mxu1 %v2554_v48  ;;  %v2642_v48 = vld [vmem:[%s2752_s15 + $0x23c] ss:$20 sps:$4 sm:$0xff]  }
  0x45   : > { %1266 = vmatmul.mubr.bf16.gmra.mxu0 %v2552_v46  ;;  %1362 = vmatmul.mubr.bf16.gmra.mxu1 %v2553_v47  ;;  %v2640_v46 = vld [vmem:[%s2752_s15 + $0x210] ss:$20 sps:$4 sm:$0xff]   ;;  %v2641_v47 = vld [vmem:[%s2752_s15 + $0x1c8] ss:$20 sps:$4 sm:$0xff]  }
  0x46   : > { %2288 = vmatpush3.bf16.msra.mxu1 %v2555_v49  ;;  %1273 = vmatprep.mubr.bf16.mxu0 %v2559_v51  ;;  %v2644_v49 = vld [vmem:[%s2752_s15 + $0x1f0] ss:$20 sps:$4 sm:$0xff]   ;;  %v2646_v51 = vld [vmem:[%s2752_s15 + $0x218] ss:$20 sps:$4 sm:$0xff]  }
  0x47   : > { %2289 = vmatprep.subr.bf16.mxu1 %v2556_v50  ;;  %1402 = vmatprep.mubr.bf16.mxu1 %v2563_v53  ;;  %v2645_v50 = vld [vmem:[%s2752_s15 + $0x238] ss:$20 sps:$4 sm:$0xff]   ;;  %v2649_v53 = vld [vmem:[%s2752_s15 + $0x240] ss:$20 sps:$4 sm:$0xff]  }
  0x48   : > { %2422 = vmatpush3.bf16.msra.mxu0 %v2591_v57 }
  0x49   : > { %2423 = vmatprep.subr.bf16.mxu0 %v2598_v60 }
  0x4a   : > { %2290 = vmatpush3.bf16.msra.mxu1 %v2558_v54  ;;  %v2650_v54 = vld [vmem:[%s2752_s15 + $0x260] ss:$20 sps:$4 sm:$0xff]  }
  0x4c   : > { %2424 = vmatpush3.bf16.msra.mxu0 %v2598_v60 }
  0x4d   : > { %1274 = vmatmul.mubr.bf16.gmra.mxu0 %v2564_v56  ;;  %1403 = vmatmul.mubr.bf16.vlgmr.msra.gmra.mxu1 %v2561_v55  ;;  %v2651_v55 = vld [vmem:[%s2752_s15 + $0x268] ss:$20 sps:$4 sm:$0xff]  }
  0x4e   : > { %1281 = vmatprep.mubr.bf16.mxu0 %v2565_v58  ;;  %1410 = vmatprep.mubr.bf16.mxu1 %v2567_v59 }
  0x4f   : > { %2425 = vmatprep.subr.bf16.mxu0 %v2611_v1 }
  0x50   : > { %2426 = vmatpush3.bf16.msra.mxu0 %v2611_v1 }
  0x55   : > { %1282 = vmatmul.mubr.bf16.gmra.mxu0 %v2569_v61  ;;  %1411 = vmatmul.mubr.bf16.gmra.mxu1 %v2570_v62 }
  0x56   : > { %1289 = vmatprep.mubr.bf16.mxu0 %v2572_v63  ;;  %1418 = vmatprep.mubr.bf16.mxu1 %v2574_v0 }
  0x5d   : > { %1290 = vmatmul.mubr.bf16.gmra.mxu0 %v2576_v2  ;;  %1419 = vmatmul.mubr.bf16.gmra.mxu1 %v2577_v3 }
  0x5e   : > { %1297 = vmatprep.mubr.bf16.mxu0 %v2579_v4  ;;  %1426 = vmatprep.mubr.bf16.mxu1 %v2581_v5 }
  0x65   : > { %1298 = vmatmul.mubr.bf16.gmra.mxu0 %v2583_v6  ;;  %1427 = vmatmul.mubr.bf16.gmra.mxu1 %v2584_v7 }
  0x66   : > { %1305 = vmatprep.mubr.bf16.mxu0 %v2585_v8  ;;  %1434 = vmatprep.mubr.bf16.mxu1 %v2587_v9 }
  0x6d   : > { %1306 = vmatmul.mubr.bf16.gmra.mxu0 %v2589_v10  ;;  %1435 = vmatmul.mubr.bf16.gmra.mxu1 %v2590_v11 }
  0x6e   : > { %1313 = vmatprep.mubr.bf16.mxu0 %v2592_v12  ;;  %1442 = vmatprep.mubr.bf16.mxu1 %v2594_v13 }
  0x75   : > { %1314 = vmatmul.mubr.bf16.gmra.mxu0 %v2596_v14  ;;  %1443 = vmatmul.mubr.bf16.gmra.mxu1 %v2597_v15 }
  0x76   : > { %1321 = vmatprep.mubr.bf16.mxu0 %v2599_v16  ;;  %1450 = vmatprep.mubr.bf16.mxu1 %v2601_v17 }
  0x7d   : > { %1322 = vmatmul.mubr.bf16.gmra.mxu0 %v2603_v18  ;;  %1451 = vmatmul.mubr.bf16.gmra.mxu1 %v2604_v19 }
  0x7e   : > { %1329 = vmatprep.mubr.bf16.mxu0 %v2605_v20  ;;  %1458 = vmatprep.mubr.bf16.mxu1 %v2607_v21 }
  0x85   : > { %1330 = vmatmul.mubr.bf16.gmra.mxu0 %v2609_v22  ;;  %1459 = vmatmul.mubr.bf16.gmra.mxu1 %v2610_v23 }
  0x86   : > { %1466 = vmatprep.mubr.bf16.mxu1 %v2612_v24  ;;  %2427 = vmatprep.mubr.bf16.mxu0 %v2614_v25 }
  0x8d   : > { %1467 = vmatmul.mubr.bf16.gmra.mxu1 %v2615_v26  ;;  %2428 = vmatmul.mubr.bf16.vlgmr.msra.gmra.mxu0 %v2616_v27 }
  0x8e   : > { %1474 = vmatprep.mubr.bf16.mxu1 %v2617_v28  ;;  %2431 = vmatprep.mubr.bf16.mxu0 %v2619_v29 }
  0x95   : > { %1475 = vmatmul.mubr.bf16.gmra.mxu1 %v2620_v30  ;;  %2432 = vmatmul.mubr.bf16.gmra.mxu0 %v2621_v31 }
  0x96   : > { %1482 = vmatprep.mubr.bf16.mxu1 %v2622_v32  ;;  %2435 = vmatprep.mubr.bf16.mxu0 %v2624_v33 }
  0x9d   : > { %1483 = vmatmul.mubr.bf16.gmra.mxu1 %v2625_v34  ;;  %2436 = vmatmul.mubr.bf16.gmra.mxu0 %v2626_v35 }
  0x9e   : > { %1490 = vmatprep.mubr.bf16.mxu1 %v2627_v36  ;;  %2439 = vmatprep.mubr.bf16.mxu0 %v2629_v37 }
  0xa5   : > { %1491 = vmatmul.mubr.bf16.gmra.mxu1 %v2630_v38  ;;  %2440 = vmatmul.mubr.bf16.gmra.mxu0 %v2631_v39 }
  0xa6   : > { %1498 = vmatprep.mubr.bf16.mxu1 %v2632_v40  ;;  %2443 = vmatprep.mubr.bf16.mxu0 %v2634_v41 }
  0xad   : > { %1499 = vmatmul.mubr.bf16.gmra.mxu1 %v2635_v42  ;;  %2444 = vmatmul.mubr.bf16.gmra.mxu0 %v2636_v43 }
  0xae   : > { %1506 = vmatprep.mubr.bf16.mxu1 %v2637_v44  ;;  %2447 = vmatprep.mubr.bf16.mxu0 %v2639_v45 }
  0xb5   : > { %1507 = vmatmul.mubr.bf16.gmra.mxu1 %v2640_v46  ;;  %2448 = vmatmul.mubr.bf16.gmra.mxu0 %v2641_v47 }
  0xb6   : > { %1514 = vmatprep.mubr.bf16.mxu1 %v2642_v48  ;;  %2451 = vmatprep.mubr.bf16.mxu0 %v2644_v49 }
  0xbd   : > { %1515 = vmatmul.mubr.bf16.gmra.mxu1 %v2645_v50  ;;  %2452 = vmatmul.mubr.bf16.gmra.mxu0 %v2646_v51 }
  0xbe   : > { %1522 = vmatprep.mubr.bf16.mxu1 %v2647_v52  ;;  %2455 = vmatprep.mubr.bf16.mxu0 %v2649_v53 }
  0xc5   : > { %1523 = vmatmul.mubr.bf16.gmra.mxu1 %v2650_v54  ;;  %2456 = vmatmul.mubr.bf16.gmra.mxu0 %v2651_v55 }
  0xed   : > { %v2179_v56 = vpop.f32.mrf.mxu0  ;;  %v2251_v57 = vpop.f32.mrf.mxu1 }
  0xef   : > { %v2180_v58 = vpop.f32.mrf.mxu0  ;;  %v2252_v59 = vpop.f32.mrf.mxu1 }
  0xf0   : > { %v2927_v60 = vadd.f32 %v2180_v58, %v2179_v56  ;;  %v2929_v61 = vadd.f32 %v2252_v59, %v2251_v57 }
  0xf1   : > { %v2182_v62 = vpop.f32.mrf.mxu0  ;;  %v2254_v63 = vpop.f32.mrf.mxu1 }
  0xf2   : > { %3287 = vst [vmem:[#allocation3_spill] sm:$0xff] %v2929_v61 }
  0xf3   : > { %v2183_v0 = vpop.f32.mrf.mxu0  ;;  %v2255_v1 = vpop.f32.mrf.mxu1 }
  0xf4   : > { %v2931_v2 = vadd.f32 %v2183_v0, %v2182_v62  ;;  %v2933_v3 = vadd.f32 %v2255_v1, %v2254_v63 }
  0xf5   : > { %v2185_v4 = vpop.f32.mrf.mxu0  ;;  %v2257_v5 = vpop.f32.mrf.mxu1 }
  0xf6   : > { %3288 = vst [vmem:[#allocation4_spill] sm:$0xff] %v2933_v3 }
  0xf7   : > { %v2186_v6 = vpop.f32.mrf.mxu0  ;;  %v2258_v7 = vpop.f32.mrf.mxu1 }
  0xf8   : > { %v2935_v8 = vadd.f32 %v2186_v6, %v2185_v4  ;;  %v2937_v9 = vadd.f32 %v2258_v7, %v2257_v5 }
  0xf9   : > { %v2188_v10 = vpop.f32.mrf.mxu0  ;;  %v2260_v11 = vpop.f32.mrf.mxu1 }
  0xfa   : > { %3289 = vst [vmem:[#allocation5_spill] sm:$0xff] %v2937_v9 }
  0xfb   : > { %v2189_v12 = vpop.f32.mrf.mxu0  ;;  %v2261_v13 = vpop.f32.mrf.mxu1 }
  0xfc   : > { %v2939_v14 = vadd.f32 %v2189_v12, %v2188_v10  ;;  %v2941_v15 = vadd.f32 %v2261_v13, %v2260_v11 }
  0xfd   : > { %v2191_v16 = vpop.f32.mrf.mxu0  ;;  %v2263_v17 = vpop.f32.mrf.mxu1 }
  0xfe   : > { %3290 = vst [vmem:[#allocation6_spill] sm:$0xff] %v2941_v15 }
  0xff   : > { %v2192_v18 = vpop.f32.mrf.mxu0  ;;  %v2264_v19 = vpop.f32.mrf.mxu1 }
 0x100   : > { %v2943_v20 = vadd.f32 %v2192_v18, %v2191_v16  ;;  %v2945_v21 = vadd.f32 %v2264_v19, %v2263_v17 }
 0x101   : > { %v2194_v22 = vpop.f32.mrf.mxu0  ;;  %v2266_v23 = vpop.f32.mrf.mxu1 }
 0x102   : > { %3291 = vst [vmem:[#allocation7_spill] sm:$0xff] %v2945_v21 }
 0x103   : > { %v2195_v24 = vpop.f32.mrf.mxu0  ;;  %v2267_v25 = vpop.f32.mrf.mxu1 }
 0x104   : > { %v2947_v26 = vadd.f32 %v2195_v24, %v2194_v22  ;;  %v2949_v27 = vadd.f32 %v2267_v25, %v2266_v23 }
 0x105   : > { %v2197_v28 = vpop.f32.mrf.mxu0  ;;  %v2269_v29 = vpop.f32.mrf.mxu1 }
 0x106   : > { %3292 = vst [vmem:[#allocation8_spill] sm:$0xff] %v2949_v27 }
 0x107   : > { %v2198_v30 = vpop.f32.mrf.mxu0  ;;  %v2270_v31 = vpop.f32.mrf.mxu1 }
 0x108   : > { %v2951_v32 = vadd.f32 %v2198_v30, %v2197_v28  ;;  %v2953_v33 = vadd.f32 %v2270_v31, %v2269_v29 }
 0x109   : > { %v2200_v34 = vpop.f32.mrf.mxu0  ;;  %v2272_v35 = vpop.f32.mrf.mxu1 }
 0x10a   : > { %3293 = vst [vmem:[#allocation9_spill] sm:$0xff] %v2953_v33 }
 0x10b   : > { %v2201_v36 = vpop.f32.mrf.mxu0  ;;  %v2273_v37 = vpop.f32.mrf.mxu1 }
 0x10c   : > { %v2955_v38 = vadd.f32 %v2201_v36, %v2200_v34  ;;  %v2957_v39 = vadd.f32 %v2273_v37, %v2272_v35 }
 0x10d   : > { %v2203_v40 = vpop.f32.mrf.mxu0  ;;  %v2959_v41 = vpop.f32.mrf.mxu1 }
 0x10e   : > { %3294 = vst [vmem:[#allocation10_spill] sm:$0xff] %v2957_v39 }
 0x10f   : > { %v2204_v42 = vpop.f32.mrf.mxu0  ;;  %v2961_v43 = vpop.f32.mrf.mxu1 }
 0x110   : > { %v2963_v44 = vadd.f32 %v2204_v42, %v2203_v40 }
 0x111   : > { %v2206_v45 = vpop.f32.mrf.mxu0  ;;  %v2965_v46 = vpop.f32.mrf.mxu1 }
 0x113   : > { %v2207_v47 = vpop.f32.mrf.mxu0  ;;  %v2967_v48 = vpop.f32.mrf.mxu1 }
 0x114   : > { %v2969_v49 = vadd.f32 %v2207_v47, %v2206_v45 }
 0x115   : > { %v2209_v50 = vpop.f32.mrf.mxu0  ;;  %v2297_v51 = vpop.f32.mrf.mxu1 }
 0x117   : > { %v2210_v52 = vpop.f32.mrf.mxu0  ;;  %v2298_v53 = vpop.f32.mrf.mxu1 }
 0x118   : > { %v2971_v54 = vadd.f32 %v2210_v52, %v2209_v50  ;;  %v2299_v61 = vadd.f32 %v2298_v53, %v2297_v51  ;;  %v3069_v53 = vld [vmem:[%s3284_s2] ss:$0 sm:$0xff] }
 0x119   : > { %v2212_v55 = vpop.f32.mrf.mxu0  ;;  %v2300_v56 = vpop.f32.mrf.mxu1 }
 0x11b   : > { %v2213_v57 = vpop.f32.mrf.mxu0  ;;  %v2301_v58 = vpop.f32.mrf.mxu1 }
 0x11c   : > { %v2973_v59 = vadd.f32 %v2213_v57, %v2212_v55 }
 0x11d   : > { %v2215_v62 = vpop.f32.mrf.mxu0  ;;  %v2975_v63 = vpop.f32.mrf.mxu1 }
 0x11f   : > { %v2216_v0 = vpop.f32.mrf.mxu0  ;;  %v2977_v1 = vpop.f32.mrf.mxu1 }
 0x120   : > { %v2979_v4 = vadd.f32 %v2216_v0, %v2215_v62 }
 0x121   : > { %v2218_v5 = vpop.f32.mrf.mxu0  ;;  %v2981_v6 = vpop.f32.mrf.mxu1 }
 0x123   : > { %v2219_v7 = vpop.f32.mrf.mxu0  ;;  %v2983_v10 = vpop.f32.mrf.mxu1 }
 0x124   : > { %v2985_v11 = vadd.f32 %v2219_v7, %v2218_v5 }
 0x125   : > { %v2987_v12 = vpop.f32.mrf.mxu0  ;;  %v2309_v13 = vpop.f32.mrf.mxu1 }
 0x127   : > { %v2989_v16 = vpop.f32.mrf.mxu0  ;;  %v2310_v17 = vpop.f32.mrf.mxu1 }
 0x129   : > { %v2991_v18 = vpop.f32.mrf.mxu0  ;;  %v2312_v19 = vpop.f32.mrf.mxu1 }
 0x12b   : > { %v2993_v22 = vpop.f32.mrf.mxu0  ;;  %v2313_v23 = vpop.f32.mrf.mxu1 }
 0x12d   : > { %v2995_v24 = vpop.f32.mrf.mxu0  ;;  %v2997_v25 = vpop.f32.mrf.mxu1 }
 0x12f   : > { %v2999_v28 = vpop.f32.mrf.mxu0  ;;  %v3001_v29 = vpop.f32.mrf.mxu1 }
 0x131   : > { %v3003_v30 = vpop.f32.mrf.mxu0  ;;  %v3005_v31 = vpop.f32.mrf.mxu1 }
 0x132   : > { %3295 = vst [vmem:[#allocation11_spill] sm:$0xff] %v3003_v30 }
 0x133   : > { %v3007_v34 = vpop.f32.mrf.mxu0  ;;  %v3009_v35 = vpop.f32.mrf.mxu1 }
 0x134   : > { %3296 = vst [vmem:[#allocation12_spill] sm:$0xff] %v3007_v34  ;;  %v1413_v34 = vadd.f32 %v2299_v61, %v2935_v8 }
 0x135   : > { %v3011_v36 = vpop.f32.mrf.mxu0  ;;  %v3013_v37 = vpop.f32.mrf.mxu1 }
 0x137   : > { %v3015_v40 = vpop.f32.mrf.mxu0  ;;  %v3017_v42 = vpop.f32.mrf.mxu1 }
 0x139   : > { %v3019_v45 = vpop.f32.mrf.mxu0  ;;  %v3021_v47 = vpop.f32.mrf.mxu1 }
 0x13b   : > { %v3023_v50 = vpop.f32.mrf.mxu0  ;;  %v3025_v52 = vpop.f32.mrf.mxu1 }
 0x13d   : > { %v3027_v55 = vpop.f32.mrf.mxu0  ;;  %v3029_v57 = vpop.f32.mrf.mxu1 }
 0x13e   : > { %3297 = vst [vmem:[#allocation13_spill] sm:$0xff] %v3027_v55 }
 0x13f   : > { %v3031_v62 = vpop.f32.mrf.mxu0  ;;  %v3033_v0 = vpop.f32.mrf.mxu1 }
 0x140   : > { %3298 = vst [vmem:[#allocation14_spill] sm:$0xff] %v3031_v62 }
 0x141   : > { %v3035_v5 = vpop.f32.mrf.mxu0  ;;  %v3037_v7 = vpop.f32.mrf.mxu1 }
 0x142   : > { %3299 = vst [vmem:[#allocation15_spill] sm:$0xff] %v3035_v5  ;;  %v2293_v5 = vadd.f32 %v2961_v43, %v2959_v41 }
 0x143   : > { %v3039_v39 = vpop.f32.mrf.mxu0  ;;  %v3041_v27 = vpop.f32.mrf.mxu1 }
 0x144   : > { %3300 = vst [vmem:[#allocation16_spill] sm:$0xff] %v3039_v39  ;;  %v1405_v43 = vadd.f32 %v2293_v5, %v2927_v60 }
 0x145   : > { %v3043_v33 = vpop.f32.mrf.mxu0  ;;  %v3045_v21 = vpop.f32.mrf.mxu1 }
 0x146   : > { %3301 = vst [vmem:[#allocation17_spill] sm:$0xff] %v3043_v33  ;;  %v2302_v33 = vadd.f32 %v2301_v58, %v2300_v56  ;;  %v3076_v56 = vld [vmem:[%s3285_s3] ss:$0 sm:$0xff] }
 0x147   : > { %v3047_v3 = vpop.f32.mrf.mxu0  ;;  %v3049_v15 = vpop.f32.mrf.mxu1 }
 0x148   : > { %3302 = vst [vmem:[#allocation18_spill] sm:$0xff] %v3047_v3  ;;  %v2296_v3 = vadd.f32 %v2967_v48, %v2965_v46  ;;  %v2311_v46 = vadd.f32 %v2310_v17, %v2309_v13  ;;  %v2305_v13 = vadd.f32 %v2977_v1, %v2975_v63  ;;  %v2308_v63 = vadd.f32 %v2983_v10, %v2981_v6 }
 0x149   : > { %v3051_v9 = vpop.f32.mrf.mxu0  ;;  %v3053_v62 = vpop.f32.mrf.mxu1  ;;  %v2323_v6 = vadd.f32 %v3017_v42, %v3013_v37 }
 0x14a   : > { %3303 = vst [vmem:[#allocation19_spill] sm:$0xff] %v3051_v9  ;;  %v1408_v5 = vadd.f32 %v2296_v3, %v2931_v2  ;;  %v1429_v3 = vadd.f32 %v2311_v46, %v2951_v32 }
 0x14b   : > { %v3057_v39 = vpop.f32.mrf.mxu0  ;;  %v3059_v55 = vpop.f32.mrf.mxu1 }
 0x14c   : > { %3304 = vst [vmem:[#allocation20_spill] sm:$0xff] %v3057_v39  ;;  %v1416_v39 = vadd.f32 %v2302_v33, %v2939_v14  ;;  %v2314_v33 = vadd.f32 %v2313_v23, %v2312_v19 }
 0x14d   : > { %v3064_v30 = vpop.f32.mrf.mxu1  ;;  %v2429_v51 = vpop.f32.mrf.mxu0 }
 0x14e   : > { %v1574_v41 = vadd.f32 %v2429_v51, %v1413_v34  ;;  %v1432_v32 = vadd.f32 %v2314_v33, %v2955_v38 }
 0x14f   : > { %v3078_v61 = vpop.f32.mrf.mxu1  ;;  %v1565_v8 = vpop.f32.mrf.mxu0 }
 0x150   : > { %v1800_v48 = vmul.f32 %v3069_v53, %v1574_v41  ;;  %v1566_v58 = vadd.f32 %v1565_v8, %v1405_v43 }
 0x151   : > { %v3087_v60 = vpop.f32.mrf.mxu1  ;;  %v2430_v34 = vpop.f32.mrf.mxu0 }
 0x152   : > { %v1839_v17 = vadd.f32 %v3076_v56, %v1800_v48  ;;  %v1798_v51 = vmul.f32 %v3069_v53, %v1566_v58  ;;  %v1577_v14 = vadd.f32 %v2430_v34, %v1416_v39  ;;  %v1421_v58 = vadd.f32 %v2305_v13, %v2943_v20 }
 0x153   : > { %v3094_v41 = vpop.f32.mrf.mxu1  ;;  %v1568_v43 = vpop.f32.mrf.mxu0  ;;  %v1424_v20 = vadd.f32 %v2308_v63, %v2947_v26  ;;  %v2317_v13 = vadd.f32 %v3001_v29, %v2997_v25  ;;  %v1445_v29 = vadd.f32 %v2323_v6, %v2971_v54 }
 0x154   : > { %1871 = vst [vmem:[%s3085_s21 + $0x10] sm:$0xff] %v1839_v17  ;;  %v1837_v8 = vadd.f32 %v3076_v56, %v1798_v51  ;;  %v1801_v9 = vmul.f32 %v3069_v53, %v1577_v14  ;;  %v1569_v2 = vadd.f32 %v1568_v43, %v1408_v5  ;;  %v2326_v14 = vadd.f32 %v3025_v52, %v3021_v47 }
 0x155   : > { %v3102_v1 = vpop.f32.mrf.mxu1  ;;  %v2433_v48 = vpop.f32.mrf.mxu0 }
 0x156   : > { %1869 = vst [vmem:[%s3085_s21] sm:$0xff] %v1837_v8  ;;  %v1840_v39 = vadd.f32 %v3076_v56, %v1801_v9  ;;  %v1799_v19 = vmul.f32 %v3069_v53, %v1569_v2  ;;  %v1590_v23 = vadd.f32 %v2433_v48, %v1429_v3  ;;  %v2320_v2 = vadd.f32 %v3009_v35, %v3005_v31 }
 0x157   : > { %v3108_v34 = vpop.f32.mrf.mxu1  ;;  %v1581_v5 = vpop.f32.mrf.mxu0  ;;  %v1448_v54 = vadd.f32 %v2326_v14, %v2973_v59  ;;  %v2335_v31 = vadd.f32 %v3049_v15, %v3045_v21  ;;  %v2329_v59 = vadd.f32 %v3033_v0, %v3029_v57 }
 0x158   : > { %1872 = vst [vmem:[%s3085_s21 + $0x18] sm:$0xff] %v1840_v39  ;;  %v1838_v10 = vadd.f32 %v3076_v56, %v1799_v19  ;;  %v1804_v9 = vmul.f32 %v3069_v53, %v1590_v23  ;;  %v1582_v46 = vadd.f32 %v1581_v5, %v1421_v58  ;;  %v1437_v39 = vadd.f32 %v2317_v13, %v2963_v44 }
 0x159   : > { %v3116_v17 = vpop.f32.mrf.mxu1  ;;  %v2434_v51 = vpop.f32.mrf.mxu0  ;;  %v2332_v13 = vadd.f32 %v3041_v27, %v3037_v7  ;;  %v1453_v14 = vadd.f32 %v2329_v59, %v2979_v4 }
 0x15a   : > { %1870 = vst [vmem:[%s3085_s21 + $0x8] sm:$0xff] %v1838_v10  ;;  %v1843_v38 = vadd.f32 %v3076_v56, %v1804_v9  ;;  %v1802_v37 = vmul.f32 %v3069_v53, %v1582_v46  ;;  %v1593_v42 = vadd.f32 %v2434_v51, %v1432_v32  ;;  %v2223_v32 = vadd.f32 %v2989_v16, %v2987_v12 }
 0x15b   : > { %v3126_v33 = vpop.f32.mrf.mxu1  ;;  %v1584_v43 = vpop.f32.mrf.mxu0  ;;  %v1440_v10 = vadd.f32 %v2320_v2, %v2969_v49  ;;  %v2338_v46 = vadd.f32 %v3059_v55, %v3053_v62  ;;  %v1456_v4 = vadd.f32 %v2332_v13, %v2985_v11  ;;  %v3309_v13 = vld [vmem:[#allocation13_spill] sm:$0xff] }
 0x15c   : > { %1875 = vst [vmem:[%s3085_s21 + $0x30] sm:$0xff] %v1843_v38  ;;  %v1841_v8 = vadd.f32 %v3076_v56, %v1802_v37  ;;  %v1805_v26 = vmul.f32 %v3069_v53, %v1593_v42  ;;  %v1585_v25 = vadd.f32 %v1584_v43, %v1424_v20  ;;  %v1461_v0 = vadd.f32 %v2335_v31, %v2223_v32 }
 0x15d   : > { %v3134_v3 = vpop.f32.mrf.mxu1  ;;  %v2437_v63 = vpop.f32.mrf.mxu0  ;;  %v2226_v20 = vadd.f32 %v2993_v22, %v2991_v18  ;;  %v2347_v18 = vadd.f32 %v3108_v34, %v3102_v1 }
 0x15e   : > { %1873 = vst [vmem:[%s3085_s21 + $0x20] sm:$0xff] %v1841_v8  ;;  %v1844_v47 = vadd.f32 %v3076_v56, %v1805_v26  ;;  %v1803_v52 = vmul.f32 %v3069_v53, %v1585_v25  ;;  %v1606_v48 = vadd.f32 %v2437_v63, %v1445_v29  ;;  %v2235_v25 = vadd.f32 %v3015_v40, %v3011_v36 }
 0x15f   : > { %v3140_v19 = vpop.f32.mrf.mxu1  ;;  %v1597_v23 = vpop.f32.mrf.mxu0  ;;  %v1464_v26 = vadd.f32 %v2338_v46, %v2226_v20  ;;  %v2341_v63 = vadd.f32 %v3078_v61, %v3064_v30  ;;  %v2350_v36 = vadd.f32 %v3126_v33, %v3116_v17 }
 0x160   : > { %1876 = vst [vmem:[%s3085_s21 + $0x38] sm:$0xff] %v1844_v47  ;;  %v1842_v35 = vadd.f32 %v3076_v56, %v1803_v52  ;;  %v1808_v58 = vmul.f32 %v3069_v53, %v1606_v48  ;;  %v1598_v5 = vadd.f32 %v1597_v23, %v1437_v39  ;;  %v2229_v52 = vadd.f32 %v2999_v28, %v2995_v24 }
 0x161   : > { %v3150_v6 = vpop.f32.mrf.mxu1  ;;  %v2438_v44 = vpop.f32.mrf.mxu0  ;;  %v1477_v39 = vadd.f32 %v2347_v18, %v2235_v25  ;;  %v2238_v23 = vadd.f32 %v3023_v50, %v3019_v45 }
 0x162   : > { %1874 = vst [vmem:[%s3085_s21 + $0x28] sm:$0xff] %v1842_v35  ;;  %v1847_v15 = vadd.f32 %v3076_v56, %v1808_v58  ;;  %v1806_v21 = vmul.f32 %v3069_v53, %v1598_v5  ;;  %v1609_v9 = vadd.f32 %v2438_v44, %v1448_v54  ;;  %v2344_v54 = vadd.f32 %v3094_v41, %v3087_v60  ;;  %v3305_v58 = vld [vmem:[#allocation11_spill] sm:$0xff]  ;;  %v3306_v5 = vld [vmem:[#allocation12_spill] sm:$0xff] }
 0x163   : > { %v3160_v51 = vpop.f32.mrf.mxu1  ;;  %v1600_v12 = vpop.f32.mrf.mxu0  ;;  %v1469_v35 = vadd.f32 %v2341_v63, %v2229_v52  ;;  %v2232_v32 = vadd.f32 %v3306_v5, %v3305_v58  ;;  %v1480_v59 = vadd.f32 %v2350_v36, %v2238_v23  ;;  %v3313_v63 = vld [vmem:[#allocation15_spill] sm:$0xff] }
 0x164   : > { %1879 = vst [vmem:[%s3085_s21 + $0x50] sm:$0xff] %v1847_v15  ;;  %v1845_v16 = vadd.f32 %v3076_v56, %v1806_v21  ;;  %v1809_v49 = vmul.f32 %v3069_v53, %v1609_v9  ;;  %v1601_v57 = vadd.f32 %v1600_v12, %v1440_v10  ;;  %v3307_v15 = vld [vmem:[#allocation17_spill] sm:$0xff]  ;;  %v3308_v21 = vld [vmem:[#allocation18_spill] sm:$0xff] }
 0x165   : > { %v2357_v38 = vpop.f32.mrf.mxu1  ;;  %v2441_v37 = vpop.f32.mrf.mxu0  ;;  %v2247_v9 = vadd.f32 %v3308_v21, %v3307_v15 }
 0x166   : > { %1877 = vst [vmem:[%s3085_s21 + $0x40] sm:$0xff] %v1845_v16  ;;  %v1848_v55 = vadd.f32 %v3076_v56, %v1809_v49  ;;  %v1807_v62 = vmul.f32 %v3069_v53, %v1601_v57  ;;  %v1622_v42 = vadd.f32 %v2441_v37, %v1461_v0  ;;  %v1472_v16 = vadd.f32 %v2344_v54, %v2232_v32 }
 0x167   : > { %v2358_v43 = vpop.f32.mrf.mxu1  ;;  %v1613_v8 = vpop.f32.mrf.mxu0  ;;  %v2353_v49 = vadd.f32 %v3140_v19, %v3134_v3 }
 0x168   : > { %1880 = vst [vmem:[%s3085_s21 + $0x58] sm:$0xff] %v1848_v55  ;;  %v1846_v27 = vadd.f32 %v3076_v56, %v1807_v62  ;;  %v1812_v22 = vmul.f32 %v3069_v53, %v1622_v42  ;;  %v1614_v7 = vadd.f32 %v1613_v8, %v1453_v14  ;;  %v2359_v45 = vadd.f32 %v2358_v43, %v2357_v38  ;;  %v3310_v38 = vld [vmem:[#allocation14_spill] sm:$0xff]  ;;  %v3311_v8 = vld [vmem:[#allocation19_spill] sm:$0xff] }
 0x169   : > { %v2360_v29 = vpop.f32.mrf.mxu1  ;;  %v2442_v2 = vpop.f32.mrf.mxu0  ;;  %v2241_v37 = vadd.f32 %v3310_v38, %v3309_v13  ;;  %v3318_v13 = vld [vmem:[#allocation4_spill] sm:$0xff] }
 0x16a   : > { %1878 = vst [vmem:[%s3085_s21 + $0x48] sm:$0xff] %v1846_v27  ;;  %v1851_v1 = vadd.f32 %v3076_v56, %v1812_v22  ;;  %v1810_v34 = vmul.f32 %v3069_v53, %v1614_v7  ;;  %v1625_v47 = vadd.f32 %v2442_v2, %v1464_v26  ;;  %v1493_v19 = vadd.f32 %v2359_v45, %v2247_v9  ;;  %v3312_v26 = vld [vmem:[#allocation20_spill] sm:$0xff] }
 0x16b   : > { %v2361_v40 = vpop.f32.mrf.mxu1  ;;  %v1616_v48 = vpop.f32.mrf.mxu0  ;;  %v2250_v18 = vadd.f32 %v3312_v26, %v3311_v8  ;;  %v2356_v27 = vadd.f32 %v3160_v51, %v3150_v6 }
 0x16c   : > { %1883 = vst [vmem:[%s3085_s21 + $0x70] sm:$0xff] %v1851_v1  ;;  %v1849_v11 = vadd.f32 %v3076_v56, %v1810_v34  ;;  %v1813_v30 = vmul.f32 %v3069_v53, %v1625_v47  ;;  %v1617_v61 = vadd.f32 %v1616_v48, %v1456_v4  ;;  %v2362_v55 = vadd.f32 %v2361_v40, %v2360_v29  ;;  %v3314_v1 = vld [vmem:[#allocation16_spill] sm:$0xff] }
 0x16d   : > { %v2363_v24 = vpop.f32.mrf.mxu1  ;;  %v2445_v28 = vpop.f32.mrf.mxu0  ;;  %v1485_v4 = vadd.f32 %v2353_v49, %v2241_v37  ;;  %v2244_v34 = vadd.f32 %v3314_v1, %v3313_v63  ;;  %v3317_v49 = vld [vmem:[#allocation6_spill] sm:$0xff] }
 0x16e   : > { %1881 = vst [vmem:[%s3085_s21 + $0x60] sm:$0xff] %v1849_v11  ;;  %v1852_v17 = vadd.f32 %v3076_v56, %v1813_v30  ;;  %v1811_v33 = vmul.f32 %v3069_v53, %v1617_v61  ;;  %v1638_v31 = vadd.f32 %v2445_v28, %v1477_v39  ;;  %v1496_v36 = vadd.f32 %v2362_v55, %v2250_v18 }
 0x16f   : > { %v2364_v44 = vpop.f32.mrf.mxu1  ;;  %v1629_v10 = vpop.f32.mrf.mxu0  ;;  %v1488_v61 = vadd.f32 %v2356_v27, %v2244_v34 }
 0x170   : > { %1884 = vst [vmem:[%s3085_s21 + $0x78] sm:$0xff] %v1852_v17  ;;  %v1850_v50 = vadd.f32 %v3076_v56, %v1811_v33  ;;  %v1816_v60 = vmul.f32 %v3069_v53, %v1638_v31  ;;  %v1630_v41 = vadd.f32 %v1629_v10, %v1469_v35  ;;  %v2365_v39 = vadd.f32 %v2364_v44, %v2363_v24  ;;  %v3315_v31 = vld [vmem:[#allocation5_spill] sm:$0xff] }
 0x171   : > { %v2366_v46 = vpop.f32.mrf.mxu1  ;;  %v2446_v12 = vpop.f32.mrf.mxu0 }
 0x172   : > { %1882 = vst [vmem:[%s3085_s21 + $0x68] sm:$0xff] %v1850_v50  ;;  %v1855_v57 = vadd.f32 %v3076_v56, %v1816_v60  ;;  %v1814_v0 = vmul.f32 %v3069_v53, %v1630_v41  ;;  %v1641_v20 = vadd.f32 %v2446_v12, %v1480_v59  ;;  %v3316_v41 = vld [vmem:[#allocation3_spill] sm:$0xff] }
 0x173   : > { %v2367_v62 = vpop.f32.mrf.mxu1  ;;  %v1632_v42 = vpop.f32.mrf.mxu0  ;;  %v1501_v15 = vadd.f32 %v2365_v39, %v3316_v41 }
 0x174   : > { %1887 = vst [vmem:[%s3085_s21 + $0x90] sm:$0xff] %v1855_v57  ;;  %v1853_v14 = vadd.f32 %v3076_v56, %v1814_v0  ;;  %v1817_v43 = vmul.f32 %v3069_v53, %v1641_v20  ;;  %v1633_v3 = vadd.f32 %v1632_v42, %v1472_v16  ;;  %v2368_v24 = vadd.f32 %v2367_v62, %v2366_v46 }
 0x175   : > { %v2369_v22 = vpop.f32.mrf.mxu1  ;;  %v2449_v7 = vpop.f32.mrf.mxu0 }
 0x176   : > { %1885 = vst [vmem:[%s3085_s21 + $0x80] sm:$0xff] %v1853_v14  ;;  %v1856_v25 = vadd.f32 %v3076_v56, %v1817_v43  ;;  %v1815_v29 = vmul.f32 %v3069_v53, %v1633_v3  ;;  %v1654_v2 = vadd.f32 %v2449_v7, %v1493_v19  ;;  %v1504_v38 = vadd.f32 %v2368_v24, %v3318_v13 }
 0x177   : > { %v2370_v47 = vpop.f32.mrf.mxu1  ;;  %v1645_v52 = vpop.f32.mrf.mxu0 }
 0x178   : > { %1888 = vst [vmem:[%s3085_s21 + $0x98] sm:$0xff] %v1856_v25  ;;  %v1854_v6 = vadd.f32 %v3076_v56, %v1815_v29  ;;  %v1820_v51 = vmul.f32 %v3069_v53, %v1654_v2  ;;  %v2371_v40 = vadd.f32 %v2370_v47, %v2369_v22  ;;  %v1646_v48 = vadd.f32 %v1645_v52, %v1485_v4  ;;  %v3319_v25 = vld [vmem:[#allocation7_spill] sm:$0xff] }
 0x179   : > { %v2372_v11 = vpop.f32.mrf.mxu1  ;;  %v2450_v30 = vpop.f32.mrf.mxu0 }
 0x17a   : > { %1886 = vst [vmem:[%s3085_s21 + $0x88] sm:$0xff] %v1854_v6  ;;  %v1859_v23 = vadd.f32 %v3076_v56, %v1820_v51  ;;  %v1818_v54 = vmul.f32 %v3069_v53, %v1646_v48  ;;  %v1657_v28 = vadd.f32 %v2450_v30, %v1496_v36  ;;  %v1509_v35 = vadd.f32 %v2371_v40, %v3315_v31  ;;  %v3320_v36 = vld [vmem:[#allocation9_spill] sm:$0xff]  ;;  %v3321_v40 = vld [vmem:[#allocation8_spill] sm:$0xff] }
 0x17b   : > { %v2373_v17 = vpop.f32.mrf.mxu1  ;;  %v1648_v33 = vpop.f32.mrf.mxu0 }
 0x17c   : > { %1891 = vst [vmem:[%s3085_s21 + $0xb0] sm:$0xff] %v1859_v23  ;;  %v1857_v58 = vadd.f32 %v3076_v56, %v1818_v54  ;;  %v1821_v5 = vmul.f32 %v3069_v53, %v1657_v28  ;;  %v2374_v32 = vadd.f32 %v2373_v17, %v2372_v11  ;;  %v1649_v10 = vadd.f32 %v1648_v33, %v1488_v61  ;;  %v3322_v17 = vld [vmem:[#allocation10_spill] sm:$0xff] }
 0x17d   : > { %v2375_v44 = vpop.f32.mrf.mxu1  ;;  %v2453_v59 = vpop.f32.mrf.mxu0 }
 0x17e   : > { %1889 = vst [vmem:[%s3085_s21 + $0xa0] sm:$0xff] %v1857_v58  ;;  %v1860_v45 = vadd.f32 %v3076_v56, %v1821_v5  ;;  %v1819_v50 = vmul.f32 %v3069_v53, %v1649_v10  ;;  %v1670_v60 = vadd.f32 %v2453_v59, %v1509_v35  ;;  %v1512_v57 = vadd.f32 %v2374_v32, %v3317_v49 }
 0x17f   : > { %v2376_v21 = vpop.f32.mrf.mxu1  ;;  %v1661_v9 = vpop.f32.mrf.mxu0 }
 0x180   : > { %1892 = vst [vmem:[%s3085_s21 + $0xb8] sm:$0xff] %v1860_v45  ;;  %v1858_v12 = vadd.f32 %v3076_v56, %v1819_v50  ;;  %v1824_v16 = vmul.f32 %v3069_v53, %v1670_v60  ;;  %v1662_v46 = vadd.f32 %v1661_v9, %v1501_v15  ;;  %v2377_v55 = vadd.f32 %v2376_v21, %v2375_v44 }
 0x181   : > { %v2378_v0 = vpop.f32.mrf.mxu1  ;;  %v2454_v20 = vpop.f32.mrf.mxu0 }
 0x182   : > { %1890 = vst [vmem:[%s3085_s21 + $0xa8] sm:$0xff] %v1858_v12  ;;  %v1863_v37 = vadd.f32 %v3076_v56, %v1824_v16  ;;  %v1822_v62 = vmul.f32 %v3069_v53, %v1662_v46  ;;  %v1673_v42 = vadd.f32 %v2454_v20, %v1512_v57  ;;  %v1517_v29 = vadd.f32 %v2377_v55, %v3319_v25 }
 0x183   : > { %v2379_v14 = vpop.f32.mrf.mxu1  ;;  %v1664_v43 = vpop.f32.mrf.mxu0 }
 0x184   : > { %1895 = vst [vmem:[%s3085_s21 + $0xd0] sm:$0xff] %v1863_v37  ;;  %v1861_v3 = vadd.f32 %v3076_v56, %v1822_v62  ;;  %v1825_v19 = vmul.f32 %v3069_v53, %v1673_v42  ;;  %v1665_v8 = vadd.f32 %v1664_v43, %v1504_v38  ;;  %v2380_v22 = vadd.f32 %v2379_v14, %v2378_v0 }
 0x185   : > { %v2381_v26 = vpop.f32.mrf.mxu1  ;;  %v2457_v18 = vpop.f32.mrf.mxu0 }
 0x186   : > { %1893 = vst [vmem:[%s3085_s21 + $0xc0] sm:$0xff] %v1861_v3  ;;  %v1864_v27 = vadd.f32 %v3076_v56, %v1825_v19  ;;  %v1823_v7 = vmul.f32 %v3069_v53, %v1665_v8  ;;  %v1520_v48 = vadd.f32 %v2380_v22, %v3321_v40 }
 0x187   : > { %v2382_v2 = vpop.f32.mrf.mxu1  ;;  %v1677_v4 = vpop.f32.mrf.mxu0 }
 0x188   : > { %1896 = vst [vmem:[%s3085_s21 + $0xd8] sm:$0xff] %v1864_v27  ;;  %v1862_v63 = vadd.f32 %v3076_v56, %v1823_v7  ;;  %v2383_v1 = vadd.f32 %v2382_v2, %v2381_v26  ;;  %v1678_v34 = vadd.f32 %v1677_v4, %v1517_v29 }
 0x189   : > { %v2384_v47 = vpop.f32.mrf.mxu1  ;;  %v2458_v52 = vpop.f32.mrf.mxu0 }
 0x18a   : > { %1894 = vst [vmem:[%s3085_s21 + $0xc8] sm:$0xff] %v1862_v63  ;;  %v1525_v6 = vadd.f32 %v2383_v1, %v3320_v36  ;;  %v1826_v51 = vmul.f32 %v3069_v53, %v1678_v34 }
 0x18b   : > { %v2385_v11 = vpop.f32.mrf.mxu1  ;;  %v1680_v30 = vpop.f32.mrf.mxu0 }
 0x18c   : > { %v1686_v61 = vadd.f32 %v2457_v18, %v1525_v6  ;;  %v1865_v39 = vadd.f32 %v3076_v56, %v1826_v51  ;;  %v2386_v23 = vadd.f32 %v2385_v11, %v2384_v47  ;;  %v1681_v54 = vadd.f32 %v1680_v30, %v1520_v48 }
 0x18e   : > { %v1828_v28 = vmul.f32 %v3069_v53, %v1686_v61  ;;  %1897 = vst [vmem:[%s3085_s21 + $0xe0] sm:$0xff] %v1865_v39  ;;  %v1528_v33 = vadd.f32 %v2386_v23, %v3322_v17  ;;  %v1827_v31 = vmul.f32 %v3069_v53, %v1681_v54 }
 0x190   : > { %v1867_v35 = vadd.f32 %v3076_v56, %v1828_v28  ;;  %v1689_v58 = vadd.f32 %v2458_v52, %v1528_v33  ;;  %v1866_v5 = vadd.f32 %v3076_v56, %v1827_v31 }
 0x192   : > { %1899 = vst [vmem:[%s3085_s21 + $0xf0] sm:$0xff] %v1867_v35  ;;  %v1829_v32 = vmul.f32 %v3069_v53, %v1689_v58  ;;  %1898 = vst [vmem:[%s3085_s21 + $0xe8] sm:$0xff] %v1866_v5 }
 0x194   : > { %v1868_v10 = vadd.f32 %v3076_v56, %v1829_v32 }
 0x196   : > { %1900 = vst [vmem:[%s3085_s21 + $0xf8] sm:$0xff] %v1868_v10 }
 0x197 PF: > { %s14_s17 = sadd.s32 1, %s2674_s17   ;;  %s3323_s15 = smov %s2670_s16 }
 0x198   : > { %p11_p5 = scmp.ge.s32.totalorder %s14_s17, 4   ;;  %s3324_s16 = smov %s3326_s18 }
 0x19a   :  { %13 = sbr.rel (!%p11_p5) target bundleno = 2 (0x2), region = 83 }

// kernel: inception_b_forward.9
= control target key start
LH: loop header
LB: loop body
LE: loop exit
PB: predicated region body
PF: predicated region fallthrough
CT: control target
= control target key end

     0   :  { %s1798_s15 = smov 0   ;;  %s1800_s16 = smov 0   ;;  %s2084_s0 = inlined_call_operand.vmem [shape: bf16[112,896], index: 0, kind: input, shape index: {}]   ;;  %s2085_s1 = inlined_call_operand.vmem [shape: bf16[896,128], index: 1, kind: input, shape index: {}]   ;;  %s2086_s2 = inlined_call_operand.vmem [shape: f32[1,128], index: 2, kind: input, shape index: {}]   ;;  %s2087_s3 = inlined_call_operand.vmem [shape: f32[1,128], index: 3, kind: input, shape index: {}]   ;;  %s2088_s4 = inlined_call_operand.vmem [shape: f32[112,128], index: 4, kind: output, shape index: {}]  }
   0x1   :  { %s1802_s17 = smov 0  }
   0x2 LB: > { %s33_s18 = sadd.s32 1, %s1767_s16  ;;  %p1384_p0 = scmp.ge.s32.totalorder %s1771_s17, 1  ;;  %s1771_s17 = sphi %s1802_s17, %s14_s17   ;;  %s1767_s16 = sphi %s1800_s16, %s2090_s16   ;;  %s1763_s15 = sphi %s1798_s15, %s2089_s15  }
   0x3   : > { %p35_p1 = scmp.ge.s32.totalorder %s33_s18, 2  ;;  %p224_p2 = scmp.lt.s32.totalorder %s1771_s17, 3 }
   0x5   : > { %s2092_s18 = smov (%p35_p1, %s33_s18), 0  ;;  %p225_p3 = pnand %p1384_p0, %p224_p2 }
   0x6   : > { %s272_s25 = smul.u32 (!%p225_p3), 7, %s1763_s15 }
   0x7   : > { %228 = sbr.rel (%p225_p3) target bundleno = 308 (0x134), region = 36 }
   0x8   : > { %p274_p4 = scmp.lt.s32.totalorder (!%p225_p3), %s272_s25, 13 }
   0xc   : > { %v1656_v0 = vld [vmem:[%s2085_s1 + $0x78] sm:$0xff]   ;;  %v1660_v4 = vld [vmem:[%s2085_s1 + $0x70] sm:$0xff]   ;;  %v1664_v8 = vld [vmem:[%s2085_s1 + $0x68] sm:$0xff]   ;;  %s2094_s25 = smov (!%p274_p4, %s272_s25), 13 }
   0xd   : > { %v1657_v1 = vld [vmem:[%s2085_s1 + $0xf8] sm:$0xff]   ;;  %1475 = vmatprep.subr.bf16.mxu0 %v1656_v0  ;;  %v1661_v5 = vld [vmem:[%s2085_s1 + $0xf0] sm:$0xff]   ;;  %v1665_v9 = vld [vmem:[%s2085_s1 + $0xe8] sm:$0xff]   ;;  %s1631_s28 = smul.u32 28, %s2094_s25  ;;  %s1386_s29 = sshll.u32 %s2094_s25, 3 }
   0xe   : > { %v1658_v2 = vld [vmem:[%s2085_s1 + $0x38] sm:$0xff]   ;;  %1515 = vmatprep.subr.bf16.mxu1 %v1657_v1  ;;  %v1662_v6 = vld [vmem:[%s2085_s1 + $0x30] sm:$0xff]   ;;  %v1666_v10 = vld [vmem:[%s2085_s1 + $0x28] sm:$0xff]   ;;  %s2047_s15 = scalar_lea.vmem %s2088_s4, %s1386_s29 }
   0xf   : > { %v1659_v3 = vld [vmem:[%s2085_s1 + $0xb8] sm:$0xff]   ;;  %1476 = vmatpush3.bf16.msra.mxu0 %v1658_v2  ;;  %v1663_v7 = vld [vmem:[%s2085_s1 + $0xb0] sm:$0xff]   ;;  %v1667_v11 = vld [vmem:[%s2085_s1 + $0xa8] sm:$0xff]   ;;  %s1915_s12 = scalar_lea.vmem %s2084_s0, %s1631_s28 }
  0x10   : > { %1516 = vmatpush3.bf16.msra.mxu1 %v1659_v3  ;;  %1477 = vmatprep.subr.bf16.mxu0 %v1660_v4  ;;  %v1668_v12 = vld [vmem:[%s2085_s1 + $0x60] sm:$0xff]   ;;  %v1672_v16 = vld [vmem:[%s2085_s1 + $0x58] sm:$0xff]   ;;  %v1676_v20 = vld [vmem:[%s2085_s1 + $0x50] sm:$0xff]  }
  0x11   : > { %1517 = vmatprep.subr.bf16.mxu1 %v1661_v5  ;;  %v1669_v13 = vld [vmem:[%s2085_s1 + $0xe0] sm:$0xff]   ;;  %v1673_v17 = vld [vmem:[%s2085_s1 + $0xd8] sm:$0xff]   ;;  %v1677_v21 = vld [vmem:[%s2085_s1 + $0xd0] sm:$0xff]  }
  0x12   : > { %v1670_v14 = vld [vmem:[%s2085_s1 + $0x20] sm:$0xff]   ;;  %v1674_v18 = vld [vmem:[%s2085_s1 + $0x18] sm:$0xff]   ;;  %v1678_v22 = vld [vmem:[%s2085_s1 + $0x10] sm:$0xff]  }
  0x13   : > { %1478 = vmatpush3.bf16.msra.mxu0 %v1662_v6  ;;  %v1671_v15 = vld [vmem:[%s2085_s1 + $0xa0] sm:$0xff]   ;;  %v1675_v19 = vld [vmem:[%s2085_s1 + $0x98] sm:$0xff]   ;;  %v1679_v23 = vld [vmem:[%s2085_s1 + $0x90] sm:$0xff]  }
  0x14   : > { %1518 = vmatpush3.bf16.msra.mxu1 %v1663_v7  ;;  %1479 = vmatprep.subr.bf16.mxu0 %v1664_v8  ;;  %v1680_v24 = vld [vmem:[%s2085_s1 + $0x48] sm:$0xff]   ;;  %v1684_v28 = vld [vmem:[%s2085_s1 + $0x40] sm:$0xff]   ;;  %v1694_v36 = vld [vmem:[%s2085_s1 + $0x178] sm:$0xff]  }
  0x15   : > { %1519 = vmatprep.subr.bf16.mxu1 %v1665_v9  ;;  %v1681_v25 = vld [vmem:[%s2085_s1 + $0xc8] sm:$0xff]   ;;  %v1685_v29 = vld [vmem:[%s2085_s1 + $0xc0] sm:$0xff]   ;;  %v1695_v37 = vld [vmem:[%s2085_s1 + $0x138] sm:$0xff]  }
  0x16   : > { %v1682_v26 = vld [vmem:[%s2085_s1 + $0x8] sm:$0xff]   ;;  %v1686_v30 = vld [vmem:[%s2085_s1] sm:$0xff]   ;;  %v1696_v38 = vld [vmem:[%s2085_s1 + $0x170] sm:$0xff]  }
  0x17   : > { %1480 = vmatpush3.bf16.msra.mxu0 %v1666_v10  ;;  %v1683_v27 = vld [vmem:[%s2085_s1 + $0x88] sm:$0xff]   ;;  %v1687_v31 = vld [vmem:[%s2085_s1 + $0x80] sm:$0xff]   ;;  %v1697_v39 = vld [vmem:[%s2085_s1 + $0x1b8] sm:$0xff]  }
  0x18   : > { %1520 = vmatpush3.bf16.msra.mxu1 %v1667_v11  ;;  %1481 = vmatprep.subr.bf16.mxu0 %v1668_v12  ;;  %v1688_v32 = vld [vmem:[%s1915_s12] ss:$28 sps:$4 sm:$0xff]   ;;  %v1691_v34 = vld [vmem:[%s1915_s12 + $0x8] ss:$28 sps:$4 sm:$0xff]   ;;  %v1698_v40 = vld [vmem:[%s2085_s1 + $0x130] sm:$0xff]  }
  0x19   : > { %1521 = vmatprep.subr.bf16.mxu1 %v1669_v13  ;;  %v1690_v33 = vld [vmem:[%s1915_s12 + $0x4] ss:$28 sps:$4 sm:$0xff]   ;;  %v1693_v35 = vld [vmem:[%s1915_s12 + $0xc] ss:$28 sps:$4 sm:$0xff]   ;;  %v1699_v41 = vld [vmem:[%s1915_s12 + $0x3c] ss:$28 sps:$4 sm:$0xff]  }
  0x1a   : > { %968 = vmatprep.mubr.bf16.mxu0 %v1690_v33  ;;  %1032 = vmatprep.mubr.bf16.mxu1 %v1693_v35  ;;  %v1701_v42 = vld [vmem:[%s1915_s12 + $0x44] ss:$28 sps:$4 sm:$0xff]   ;;  %v1703_v43 = vld [vmem:[%s1915_s12 + $0x38] ss:$28 sps:$4 sm:$0xff]   ;;  %v1705_v45 = vld [vmem:[%s2085_s1 + $0x168] sm:$0xff]  }
  0x1b   : > { %1482 = vmatpush3.bf16.msra.mxu0 %v1670_v14  ;;  %v1704_v44 = vld [vmem:[%s1915_s12 + $0x40] ss:$28 sps:$4 sm:$0xff]   ;;  %v1706_v46 = vld [vmem:[%s2085_s1 + $0x1b0] sm:$0xff]   ;;  %v1707_v47 = vld [vmem:[%s2085_s1 + $0x128] sm:$0xff]  }
  0x1c   : > { %1522 = vmatpush3.bf16.msra.mxu1 %v1671_v15  ;;  %1483 = vmatprep.subr.bf16.mxu0 %v1672_v16  ;;  %v1708_v48 = vld [vmem:[%s2085_s1 + $0x160] sm:$0xff]   ;;  %v1709_v49 = vld [vmem:[%s2085_s1 + $0x1a8] sm:$0xff]   ;;  %v1711_v51 = vld [vmem:[%s1915_s12 + $0x74] ss:$28 sps:$4 sm:$0xff]  }
  0x1d   : > { %1523 = vmatprep.subr.bf16.mxu1 %v1673_v17  ;;  %v1710_v50 = vld [vmem:[%s2085_s1 + $0x120] sm:$0xff]   ;;  %v1713_v52 = vld [vmem:[%s1915_s12 + $0x7c] ss:$28 sps:$4 sm:$0xff]   ;;  %v1715_v53 = vld [vmem:[%s1915_s12 + $0x70] ss:$28 sps:$4 sm:$0xff]  }
  0x1e   : > { %v1716_v54 = vld [vmem:[%s1915_s12 + $0x78] ss:$28 sps:$4 sm:$0xff]   ;;  %v1718_v56 = vld [vmem:[%s2085_s1 + $0x1a0] sm:$0xff]   ;;  %v351_v61 = vld [vmem:[%s1915_s12 + $0xa8] sm:$0xff] }
  0x1f   : > { %1484 = vmatpush3.bf16.msra.mxu0 %v1674_v18  ;;  %v1717_v55 = vld [vmem:[%s2085_s1 + $0x158] sm:$0xff]   ;;  %v1720_v58 = vld [vmem:[%s2085_s1 + $0x150] sm:$0xff]   ;;  %v1409_v63 = vcombine.high %v351_v61, %v351_v61  ;;  %v1408_v1 = vcombine.low %v351_v61, %v351_v61  ;;  %v1727_v3 = vld [vmem:[%s2085_s1 + $0x148] sm:$0xff]  }
  0x20   : > { %1524 = vmatpush3.bf16.msra.mxu1 %v1675_v19  ;;  %1485 = vmatprep.subr.bf16.mxu0 %v1676_v20  ;;  %v1719_v57 = vld [vmem:[%s2085_s1 + $0x118] sm:$0xff]   ;;  %v1722_v60 = vld [vmem:[%s2085_s1 + $0x110] sm:$0xff]   ;;  %v1729_v5 = vld [vmem:[%s2085_s1 + $0x108] sm:$0xff]  }
  0x21   : > { %1525 = vmatprep.subr.bf16.mxu1 %v1677_v21  ;;  %v1721_v59 = vld [vmem:[%s2085_s1 + $0x198] sm:$0xff]   ;;  %v352_v62 = vld [vmem:[%s1915_s12 + $0xb0] sm:$0xff]  ;;  %v1730_v6 = vld [vmem:[%s2085_s1 + $0x140] sm:$0xff]  }
  0x22   : > { %v1411_v0 = vcombine.high %v352_v62, %v352_v62  ;;  %v1410_v2 = vcombine.low %v352_v62, %v352_v62  ;;  %v1728_v4 = vld [vmem:[%s2085_s1 + $0x190] sm:$0xff]   ;;  %v1731_v7 = vld [vmem:[%s2085_s1 + $0x188] sm:$0xff]   ;;  %v1732_v8 = vld [vmem:[%s2085_s1 + $0x100] sm:$0xff]  }
  0x23   : > { %1486 = vmatpush3.bf16.msra.mxu0 %v1678_v22  ;;  %v1733_v9 = vld [vmem:[%s1915_s12 + $0x10] ss:$28 sps:$4 sm:$0xff]   ;;  %v1736_v11 = vld [vmem:[%s2085_s1 + $0x180] sm:$0xff]   ;;  %v1737_v12 = vld [vmem:[%s1915_s12 + $0x18] ss:$28 sps:$4 sm:$0xff]  }
  0x24   : > { %1526 = vmatpush3.bf16.msra.mxu1 %v1679_v23  ;;  %1487 = vmatprep.subr.bf16.mxu0 %v1680_v24  ;;  %v1735_v10 = vld [vmem:[%s1915_s12 + $0x14] ss:$28 sps:$4 sm:$0xff]   ;;  %v1739_v13 = vld [vmem:[%s1915_s12 + $0x4c] ss:$28 sps:$4 sm:$0xff]   ;;  %v1742_v17 = vld [vmem:[%s1915_s12 + $0x84] ss:$28 sps:$4 sm:$0xff]  }
  0x25   : > { %1527 = vmatprep.subr.bf16.mxu1 %v1681_v25  ;;  %v1738_v14 = vld [vmem:[%s1915_s12 + $0x50] ss:$28 sps:$4 sm:$0xff]   ;;  %v1745_v15 = vld [vmem:[%s1915_s12 + $0x88] ss:$28 sps:$4 sm:$0xff]   ;;  %v1746_v18 = vld [vmem:[%s1915_s12 + $0xc0] ss:$0 sps:$4 sm:$0xff]  }
  0x26   : > { %v1741_v16 = vld [vmem:[%s1915_s12 + $0x48] ss:$28 sps:$4 sm:$0xff]   ;;  %v353_v19 = vld [vmem:[%s1915_s12 + $0xb8] sm:$0xff] }
  0x27   : > { %1488 = vmatpush3.bf16.msra.mxu0 %v1682_v26  ;;  %v1744_v20 = vld [vmem:[%s1915_s12 + $0x80] ss:$28 sps:$4 sm:$0xff]   ;;  %v1413_v21 = vcombine.high %v353_v19, %v353_v19  ;;  %v1412_v22 = vcombine.low %v353_v19, %v353_v19 }
  0x28   : > { %1528 = vmatpush3.bf16.msra.mxu1 %v1683_v27  ;;  %1489 = vmatprep.subr.bf16.mxu0 %v1684_v28 }
  0x29   : > { %1529 = vmatprep.subr.bf16.mxu1 %v1685_v29 }
  0x2b   : > { %1490 = vmatpush3.bf16.msra.mxu0 %v1686_v30 }
  0x2c   : > { %1530 = vmatpush3.bf16.msra.mxu1 %v1687_v31  ;;  %1555 = vmatprep.subr.bf16.mxu0 %v1694_v36 }
  0x2d   : > { %1607 = vmatprep.subr.bf16.mxu1 %v1697_v39 }
  0x2e   : > { %969 = vmatmul.mubr.bf16.vlgmr.msra.gmra.mxu0 %v1688_v32 }
  0x2f   : > { %1033 = vmatmul.mubr.bf16.vlgmr.msra.gmra.mxu1 %v1691_v34  ;;  %1556 = vmatpush3.bf16.msra.mxu0 %v1695_v37 }
  0x30   : > { %1557 = vmatprep.subr.bf16.mxu0 %v1696_v38  ;;  %1608 = vmatpush3.bf16.msra.mxu1 %v1697_v39 }
  0x31   : > { %976 = vmatprep.mubr.bf16.mxu0 %v1699_v41  ;;  %1040 = vmatprep.mubr.bf16.mxu1 %v1701_v42 }
  0x32   : > { %1609 = vmatprep.subr.bf16.mxu1 %v1706_v46 }
  0x33   : > { %1558 = vmatpush3.bf16.msra.mxu0 %v1698_v40 }
  0x34   : > { %1559 = vmatprep.subr.bf16.mxu0 %v1705_v45  ;;  %1610 = vmatpush3.bf16.msra.mxu1 %v1706_v46 }
  0x35   : > { %1611 = vmatprep.subr.bf16.mxu1 %v1709_v49 }
  0x36   : > { %977 = vmatmul.mubr.bf16.gmra.mxu0 %v1703_v43 }
  0x37   : > { %1041 = vmatmul.mubr.bf16.gmra.mxu1 %v1704_v44  ;;  %1560 = vmatpush3.bf16.msra.mxu0 %v1707_v47 }
  0x38   : > { %1561 = vmatprep.subr.bf16.mxu0 %v1708_v48  ;;  %1612 = vmatpush3.bf16.msra.mxu1 %v1709_v49 }
  0x39   : > { %984 = vmatprep.mubr.bf16.mxu0 %v1711_v51  ;;  %1048 = vmatprep.mubr.bf16.mxu1 %v1713_v52 }
  0x3a   : > { %1613 = vmatprep.subr.bf16.mxu1 %v1718_v56 }
  0x3b   : > { %1562 = vmatpush3.bf16.msra.mxu0 %v1710_v50 }
  0x3c   : > { %1563 = vmatprep.subr.bf16.mxu0 %v1717_v55  ;;  %1614 = vmatpush3.bf16.msra.mxu1 %v1718_v56 }
  0x3d   : > { %1615 = vmatprep.subr.bf16.mxu1 %v1721_v59 }
  0x3e   : > { %985 = vmatmul.mubr.bf16.gmra.mxu0 %v1715_v53 }
  0x3f   : > { %1049 = vmatmul.mubr.bf16.gmra.mxu1 %v1716_v54  ;;  %1564 = vmatpush3.bf16.msra.mxu0 %v1719_v57 }
  0x40   : > { %1565 = vmatprep.subr.bf16.mxu0 %v1720_v58  ;;  %1616 = vmatpush3.bf16.msra.mxu1 %v1721_v59 }
  0x41   : > { %992 = vmatprep.mubr.bf16.mxu0 %v1409_v63  ;;  %1056 = vmatprep.mubr.bf16.mxu1 %v1411_v0 }
  0x42   : > { %1617 = vmatprep.subr.bf16.mxu1 %v1728_v4 }
  0x43   : > { %1566 = vmatpush3.bf16.msra.mxu0 %v1722_v60 }
  0x44   : > { %1567 = vmatprep.subr.bf16.mxu0 %v1727_v3  ;;  %1618 = vmatpush3.bf16.msra.mxu1 %v1728_v4 }
  0x45   : > { %1619 = vmatprep.subr.bf16.mxu1 %v1731_v7 }
  0x46   : > { %993 = vmatmul.mubr.bf16.gmra.mxu0 %v1408_v1 }
  0x47   : > { %1057 = vmatmul.mubr.bf16.gmra.mxu1 %v1410_v2  ;;  %1568 = vmatpush3.bf16.msra.mxu0 %v1729_v5  ;;  %v2035_v5 = vld [vmem:[%s2086_s2] ss:$0 sm:$0xff] }
  0x48   : > { %1569 = vmatprep.subr.bf16.mxu0 %v1730_v6  ;;  %1096 = vmatprep.mubr.bf16.mxu0 %v1735_v10  ;;  %v2041_v10 = vld [vmem:[%s2087_s3] ss:$0 sm:$0xff] }
  0x49   : > { %1620 = vmatpush3.bf16.msra.mxu1 %v1731_v7  ;;  %1623 = vmatprep.mubr.bf16.mxu1 %v1737_v12 }
  0x4a   : > { %1621 = vmatprep.subr.bf16.mxu1 %v1736_v11 }
  0x4b   : > { %1570 = vmatpush3.bf16.msra.mxu0 %v1732_v8 }
  0x4d   : > { %1622 = vmatpush3.bf16.msra.mxu1 %v1736_v11 }
  0x4e   : > { %1097 = vmatmul.mubr.bf16.vlgmr.msra.gmra.mxu0 %v1733_v9 }
  0x4f   : > { %1104 = vmatprep.mubr.bf16.mxu0 %v1739_v13 }
  0x50   : > { %1624 = vmatmul.mubr.bf16.vlgmr.msra.gmra.mxu1 %v1738_v14 }
  0x51   : > { %1627 = vmatprep.mubr.bf16.mxu1 %v1745_v15 }
  0x56   : > { %1105 = vmatmul.mubr.bf16.gmra.mxu0 %v1741_v16 }
  0x57   : > { %1112 = vmatprep.mubr.bf16.mxu0 %v1742_v17 }
  0x58   : > { %1628 = vmatmul.mubr.bf16.gmra.mxu1 %v1746_v18 }
  0x5e   : > { %1113 = vmatmul.mubr.bf16.gmra.mxu0 %v1744_v20 }
  0x5f   : > { %1120 = vmatprep.mubr.bf16.mxu0 %v1413_v21 }
  0x66   : > { %1121 = vmatmul.mubr.bf16.gmra.mxu0 %v1412_v22 }
  0xee   : > { %v1491_v23 = vpop.f32.mrf.mxu0 }
  0xef   : > { %v1531_v24 = vpop.f32.mrf.mxu1 }
  0xf0   : > { %v1492_v25 = vpop.f32.mrf.mxu0 }
  0xf1   : > { %v1532_v26 = vpop.f32.mrf.mxu1  ;;  %v1493_v55 = vadd.f32 %v1492_v25, %v1491_v23 }
  0xf2   : > { %v1494_v27 = vpop.f32.mrf.mxu0  ;;  %v1533_v56 = vadd.f32 %v1532_v26, %v1531_v24 }
  0xf3   : > { %v1534_v28 = vpop.f32.mrf.mxu1 }
  0xf4   : > { %v1495_v29 = vpop.f32.mrf.mxu0  ;;  %v1035_v61 = vadd.f32 %v1533_v56, %v1493_v55 }
  0xf5   : > { %v1535_v30 = vpop.f32.mrf.mxu1  ;;  %v1496_v58 = vadd.f32 %v1495_v29, %v1494_v27 }
  0xf6   : > { %v1497_v31 = vpop.f32.mrf.mxu0  ;;  %v1536_v59 = vadd.f32 %v1535_v30, %v1534_v28 }
  0xf7   : > { %v1537_v32 = vpop.f32.mrf.mxu1 }
  0xf8   : > { %v1498_v33 = vpop.f32.mrf.mxu0  ;;  %v1038_v2 = vadd.f32 %v1536_v59, %v1496_v58 }
  0xf9   : > { %v1538_v34 = vpop.f32.mrf.mxu1  ;;  %v1499_v6 = vadd.f32 %v1498_v33, %v1497_v31 }
  0xfa   : > { %v1500_v35 = vpop.f32.mrf.mxu0  ;;  %v1539_v7 = vadd.f32 %v1538_v34, %v1537_v32 }
  0xfb   : > { %v1540_v36 = vpop.f32.mrf.mxu1 }
  0xfc   : > { %v1501_v37 = vpop.f32.mrf.mxu0  ;;  %v1043_v19 = vadd.f32 %v1539_v7, %v1499_v6 }
  0xfd   : > { %v1541_v38 = vpop.f32.mrf.mxu1  ;;  %v1502_v15 = vadd.f32 %v1501_v37, %v1500_v35 }
  0xfe   : > { %v1503_v39 = vpop.f32.mrf.mxu0  ;;  %v1542_v16 = vadd.f32 %v1541_v38, %v1540_v36 }
  0xff   : > { %v1543_v40 = vpop.f32.mrf.mxu1 }
 0x100   : > { %v1504_v41 = vpop.f32.mrf.mxu0  ;;  %v1046_v27 = vadd.f32 %v1542_v16, %v1502_v15 }
 0x101   : > { %v1544_v42 = vpop.f32.mrf.mxu1  ;;  %v1505_v28 = vadd.f32 %v1504_v41, %v1503_v39 }
 0x102   : > { %v2020_v43 = vpop.f32.mrf.mxu0  ;;  %v1545_v31 = vadd.f32 %v1544_v42, %v1543_v40 }
 0x103   : > { %v2022_v44 = vpop.f32.mrf.mxu1 }
 0x104   : > { %v1507_v45 = vpop.f32.mrf.mxu0  ;;  %v1051_v39 = vadd.f32 %v1545_v31, %v1505_v28 }
 0x105   : > { %v1547_v46 = vpop.f32.mrf.mxu1 }
 0x106   : > { %v2024_v47 = vpop.f32.mrf.mxu0 }
 0x107   : > { %v2026_v48 = vpop.f32.mrf.mxu1 }
 0x108   : > { %v2028_v49 = vpop.f32.mrf.mxu0 }
 0x109   : > { %v2030_v50 = vpop.f32.mrf.mxu1  ;;  %v1511_v58 = vadd.f32 %v2028_v49, %v2024_v47 }
 0x10a   : > { %v1512_v51 = vpop.f32.mrf.mxu0 }
 0x10b   : > { %v1552_v52 = vpop.f32.mrf.mxu1  ;;  %v1508_v51 = vadd.f32 %v1507_v45, %v2020_v43  ;;  %v1551_v43 = vadd.f32 %v2030_v50, %v2026_v48 }
 0x10c   : > { %v1513_v53 = vpop.f32.mrf.mxu0  ;;  %v1548_v52 = vadd.f32 %v1547_v46, %v2022_v44 }
 0x10d   : > { %v1553_v54 = vpop.f32.mrf.mxu1 }
 0x10e   : > { %v1571_v57 = vpop.f32.mrf.mxu0 }
 0x110   : > { %v1572_v60 = vpop.f32.mrf.mxu0  ;;  %v1625_v0 = vpop.f32.mrf.mxu1 }
 0x111   : > { %v1573_v62 = vadd.f32 %v1572_v60, %v1571_v57  ;;  %v1054_v57 = vadd.f32 %v1548_v52, %v1508_v51 }
 0x112   : > { %v1574_v63 = vpop.f32.mrf.mxu0  ;;  %v1162_v4 = vpop.f32.mrf.mxu1 }
 0x113   : > { %v1099_v1 = vadd.f32 %v1573_v62, %v1035_v61 }
 0x114   : > { %v1575_v3 = vpop.f32.mrf.mxu0  ;;  %v1626_v12 = vpop.f32.mrf.mxu1 }
 0x115   : > { %v1576_v8 = vadd.f32 %v1575_v3, %v1574_v63  ;;  %v1163_v9 = vadd.f32 %v1162_v4, %v1099_v1  ;;  %v1059_v1 = vadd.f32 %v1551_v43, %v1511_v58 }
 0x116   : > { %v1577_v11 = vpop.f32.mrf.mxu0  ;;  %v1165_v18 = vpop.f32.mrf.mxu1 }
 0x117   : > { %v1223_v13 = vmul.f32 %v2035_v5, %v1163_v9  ;;  %v1102_v14 = vadd.f32 %v1576_v8, %v1038_v2 }
 0x118   : > { %v1578_v17 = vpop.f32.mrf.mxu0  ;;  %v1629_v24 = vpop.f32.mrf.mxu1 }
 0x119   : > { %v1237_v20 = vadd.f32 %v2041_v10, %v1223_v13  ;;  %v1579_v21 = vadd.f32 %v1578_v17, %v1577_v11  ;;  %v1166_v22 = vadd.f32 %v1165_v18, %v1102_v14 }
 0x11a   : > { %v1580_v23 = vpop.f32.mrf.mxu0  ;;  %v1178_v30 = vpop.f32.mrf.mxu1 }
 0x11b   : > { %1244 = vst [vmem:[%s2047_s15] sm:$0xff] %v1237_v20  ;;  %v1107_v25 = vadd.f32 %v1579_v21, %v1043_v19  ;;  %v1224_v26 = vmul.f32 %v2035_v5, %v1166_v22 }
 0x11c   : > { %v1581_v29 = vpop.f32.mrf.mxu0  ;;  %v1630_v36 = vpop.f32.mrf.mxu1 }
 0x11d   : > { %v1171_v32 = vadd.f32 %v1625_v0, %v1107_v25  ;;  %v1238_v33 = vadd.f32 %v2041_v10, %v1224_v26  ;;  %v1582_v34 = vadd.f32 %v1581_v29, %v1580_v23 }
 0x11e   : > { %v1583_v35 = vpop.f32.mrf.mxu0  ;;  %v1181_v63 = vpop.f32.mrf.mxu1 }
 0x11f   : > { %v1225_v37 = vmul.f32 %v2035_v5, %v1171_v32  ;;  %1245 = vst [vmem:[%s2047_s15 + $0x8] sm:$0xff] %v1238_v33  ;;  %v1110_v38 = vadd.f32 %v1582_v34, %v1046_v27 }
 0x120   : > { %v1584_v53 = vpop.f32.mrf.mxu0 }
 0x121   : > { %v1239_v40 = vadd.f32 %v2041_v10, %v1225_v37  ;;  %v1174_v41 = vadd.f32 %v1626_v12, %v1110_v38  ;;  %v1585_v42 = vadd.f32 %v1584_v53, %v1583_v35 }
 0x122   : > { %v1586_v54 = vpop.f32.mrf.mxu0 }
 0x123   : > { %1246 = vst [vmem:[%s2047_s15 + $0x10] sm:$0xff] %v1239_v40  ;;  %v1226_v55 = vmul.f32 %v2035_v5, %v1174_v41  ;;  %v1115_v56 = vadd.f32 %v1585_v42, %v1051_v39 }
 0x124   : > { %v1587_v59 = vpop.f32.mrf.mxu0 }
 0x125   : > { %v1240_v44 = vadd.f32 %v2041_v10, %v1226_v55  ;;  %v1179_v45 = vadd.f32 %v1178_v30, %v1115_v56  ;;  %v1588_v46 = vadd.f32 %v1587_v59, %v1586_v54 }
 0x126   : > { %v1589_v60 = vpop.f32.mrf.mxu0 }
 0x127   : > { %1247 = vst [vmem:[%s2047_s15 + $0x18] sm:$0xff] %v1240_v44  ;;  %v1227_v61 = vmul.f32 %v2035_v5, %v1179_v45  ;;  %v1118_v62 = vadd.f32 %v1588_v46, %v1054_v57 }
 0x128   : > { %v1590_v0 = vpop.f32.mrf.mxu0 }
 0x129   : > { %v1241_v47 = vadd.f32 %v2041_v10, %v1227_v61  ;;  %v1182_v49 = vadd.f32 %v1181_v63, %v1118_v62  ;;  %v1591_v2 = vadd.f32 %v1590_v0, %v1589_v60 }
 0x12a   : > { %v1592_v3 = vpop.f32.mrf.mxu0 }
 0x12b   : > { %1248 = vst [vmem:[%s2047_s15 + $0x20] sm:$0xff] %v1241_v47  ;;  %v1228_v48 = vmul.f32 %v2035_v5, %v1182_v49  ;;  %v1123_v50 = vadd.f32 %v1591_v2, %v1059_v1 }
 0x12c   : > { %v1593_v4 = vpop.f32.mrf.mxu0 }
 0x12d   : > { %v1242_v6 = vadd.f32 %v2041_v10, %v1228_v48  ;;  %v1187_v7 = vadd.f32 %v1629_v24, %v1123_v50 }
 0x12f   : > { %1249 = vst [vmem:[%s2047_s15 + $0x28] sm:$0xff] %v1242_v6  ;;  %v1229_v8 = vmul.f32 %v2035_v5, %v1187_v7 }
 0x131   : > { %v1243_v9 = vadd.f32 %v2041_v10, %v1229_v8 }
 0x133   : > { %1250 = vst [vmem:[%s2047_s15 + $0x30] sm:$0xff] %v1243_v9 }
 0x134 PF: > { %s14_s17 = sadd.s32 1, %s1771_s17   ;;  %s2089_s15 = smov %s1767_s16 }
 0x135   : > { %p11_p5 = scmp.ge.s32.totalorder %s14_s17, 4   ;;  %s2090_s16 = smov %s2092_s18 }
 0x137   :  { %13 = sbr.rel (!%p11_p5) target bundleno = 2 (0x2), region = 83 }

// kernel: inception_b_forward.6
= control target key start
LH: loop header
LB: loop body
LE: loop exit
PB: predicated region body
PF: predicated region fallthrough
CT: control target
= control target key end

     0   :  { %s1180_s15 = smov 0   ;;  %s1182_s16 = smov 0   ;;  %s1385_s0 = inlined_call_operand.vmem [shape: bf16[112,128], index: 0, kind: input, shape index: {}]   ;;  %s1386_s1 = inlined_call_operand.vmem [shape: bf16[128,384], index: 1, kind: input, shape index: {}]   ;;  %s1387_s2 = inlined_call_operand.vmem [shape: f32[1,384], index: 2, kind: input, shape index: {}]   ;;  %s1388_s3 = inlined_call_operand.vmem [shape: f32[1,384], index: 3, kind: input, shape index: {}]   ;;  %s1389_s4 = inlined_call_operand.vmem [shape: f32[112,384], index: 4, kind: output, shape index: {}]  }
   0x1   :  { %s1184_s17 = smov 0  }
   0x2 LB: > { %s33_s18 = sadd.s32 1, %s1148_s16  ;;  %p999_p0 = scmp.ge.s32.totalorder %s1152_s17, 1  ;;  %s1152_s17 = sphi %s1184_s17, %s14_s17   ;;  %s1148_s16 = sphi %s1182_s16, %s1391_s16   ;;  %s1144_s15 = sphi %s1180_s15, %s1390_s15  }
   0x3   : > { %p35_p1 = scmp.ge.s32.totalorder %s33_s18, 2  ;;  %p228_p2 = scmp.lt.s32.totalorder %s1152_s17, 3 }
   0x5   : > { %s1393_s18 = smov (%p35_p1, %s33_s18), 0  ;;  %p229_p3 = pnand %p999_p0, %p228_p2 }
   0x6   : > { %s280_s21 = smul.u32 (!%p229_p3), 7, %s1144_s15 }
   0x7   : > { %232 = sbr.rel (%p229_p3) target bundleno = 269 (0x10d), region = 36 }
   0x8   : > { %p281_p4 = scmp.lt.s32.totalorder (!%p229_p3), %s280_s21, 13 }
   0xc   : > { %v1094_v0 = vld [vmem:[%s1386_s1 + $0xac] ss:$12 sps:$4 sm:$0xff]   ;;  %v1096_v1 = vld [vmem:[%s1386_s1 + $0xa8] ss:$12 sps:$4 sm:$0xff]   ;;  %v1154_v2 = vmov 0   ;;  %s1395_s21 = smov (!%p281_p4, %s280_s21), 13  ;;  %v762_v29 = vlaneseq }
   0xd   : > { %591 = vmatprep.mubr.bf16.mxu0 %v1154_v2  ;;  %559 = vmatprep.subr.bf16.mxu0 %v1094_v0  ;;  %v1097_v3 = vld [vmem:[%s1386_s1 + $0x94] ss:$12 sps:$4 sm:$0xff]   ;;  %v1099_v4 = vld [vmem:[%s1386_s1 + $0x90] ss:$12 sps:$4 sm:$0xff]   ;;  %v1103_v7 = vld [vmem:[%s1386_s1 + $0x78] ss:$12 sps:$4 sm:$0xff]  }
   0xe   : > { %560 = vmatpush1.bf16.msra.mxu0 %v1096_v1  ;;  %v1100_v5 = vld [vmem:[%s1386_s1 + $0xb0] ss:$12 sps:$4 sm:$0xff]   ;;  %v1104_v8 = vld [vmem:[%s1386_s1 + $0x98] ss:$12 sps:$4 sm:$0xff]   ;;  %v1108_v10 = vld [vmem:[%s1386_s1 + $0x80] ss:$12 sps:$4 sm:$0xff]  }
   0xf   : > { %561 = vmatprep.subr.bf16.mxu0 %v1097_v3  ;;  %v1101_v6 = vld [vmem:[%s1386_s1 + $0x7c] ss:$12 sps:$4 sm:$0xff]   ;;  %1044 = vmatprep.subr.bf16.mxu1 %v1100_v5  ;;  %v1105_v9 = vld [vmem:[%s1386_s1 + $0x64] ss:$12 sps:$4 sm:$0xff]   ;;  %v1107_v11 = vld [vmem:[%s1386_s1 + $0x60] ss:$12 sps:$4 sm:$0xff]  }
  0x10   : > { %1045 = vmatpush3.bf16.msra.mxu1 %v1100_v5  ;;  %v1112_v12 = vld [vmem:[%s1386_s1 + $0x68] ss:$12 sps:$4 sm:$0xff]   ;;  %s1000_s22 = sshll.u32 %s1395_s21, 2  ;;  %v1109_v13 = vld [vmem:[%s1386_s1 + $0x4c] ss:$12 sps:$4 sm:$0xff]   ;;  %v763_v30 = vshrl.u32 %v762_v29, 7 }
  0x11   : > { %1046 = vmatprep.subr.bf16.mxu1 %v1104_v8  ;;  %v1111_v14 = vld [vmem:[%s1386_s1 + $0x48] ss:$12 sps:$4 sm:$0xff]   ;;  %v1116_v15 = vld [vmem:[%s1386_s1 + $0x50] ss:$12 sps:$4 sm:$0xff]   ;;  %s1253_s5 = scalar_lea.vmem %s1385_s0, %s1000_s22  ;;  %v1120_v19 = vld [vmem:[%s1386_s1 + $0x38] ss:$12 sps:$4 sm:$0xff]  }
  0x12   : > { %562 = vmatpush1.bf16.msra.mxu0 %v1099_v4  ;;  %v1113_v16 = vld [vmem:[%s1386_s1 + $0x34] ss:$12 sps:$4 sm:$0xff]   ;;  %v1115_v17 = vld [vmem:[%s1386_s1 + $0x30] ss:$12 sps:$4 sm:$0xff]   ;;  %v1119_v21 = vld [vmem:[%s1386_s1 + $0x18] ss:$12 sps:$4 sm:$0xff]  }
  0x13   : > { %563 = vmatprep.subr.bf16.mxu0 %v1101_v6  ;;  %v1125_v18 = vld [vmem:[%s1253_s5] sm:$0xff]   ;;  %v1117_v20 = vld [vmem:[%s1386_s1 + $0x1c] ss:$12 sps:$4 sm:$0xff]   ;;  %v1128_v27 = vld [vmem:[%s1253_s5 + $0x10] sm:$0xff]   ;;  %v764_v31 = vsub.s32 0, %v763_v30  ;;  %v768_v33 = vsub.s32 1, %v763_v30 }
  0x14   : > { %1047 = vmatpush3.bf16.msra.mxu1 %v1104_v8  ;;  %1060 = vmatprep.mubr.bf16.mxu1 %v1125_v18  ;;  %v1124_v22 = vld [vmem:[%s1386_s1 + $0x20] ss:$12 sps:$4 sm:$0xff]   ;;  %v1121_v23 = vld [vmem:[%s1386_s1 + $0x4] ss:$12 sps:$4 sm:$0xff]   ;;  %v1126_v25 = vld [vmem:[%s1386_s1 + $0x8] ss:$12 sps:$4 sm:$0xff]  }
  0x15   : > { %1048 = vmatprep.subr.bf16.mxu1 %v1108_v10  ;;  %v1123_v24 = vld [vmem:[%s1386_s1] ss:$12 sps:$4 sm:$0xff]   ;;  %v1129_v28 = vld [vmem:[%s1253_s5 + $0x18] ss:$0 sps:$4 sm:$0xff]   ;;  %v772_v35 = vsub.s32 2, %v763_v30 }
  0x16   : > { %564 = vmatpush1.bf16.msra.mxu0 %v1103_v7  ;;  %v1127_v26 = vld [vmem:[%s1253_s5 + $0x8] sm:$0xff]   ;;  %v760_v32 = vld [vmem:[%s1387_s2] sm:$0x7]  ;;  %s1068_s5 = smul.u32 24, %s1395_s21 }
  0x17   : > { %565 = vmatprep.subr.bf16.mxu0 %v1105_v9  ;;  %v798_v34 = vld [vmem:[%s1388_s3] sm:$0x7]  ;;  %v1295_v36 = vrot.slane %v760_v32, %v764_v31  ;;  %v1300_v38 = vrot.slane %v760_v32, %v768_v33  ;;  %v1302_v40 = vrot.slane %v760_v32, %v772_v35 }
  0x18   : > { %1049 = vmatpush3.bf16.msra.mxu1 %v1108_v10  ;;  %v1298_v37 = vrot.slane %v798_v34, %v764_v31  ;;  %v1305_v42 = vrot.slane %v798_v34, %v768_v33  ;;  %s1310_s9 = scalar_lea.vmem %s1389_s4, %s1068_s5  ;;  %v1312_v44 = vrot.slane %v798_v34, %v772_v35 }
  0x19   : > { %1050 = vmatprep.subr.bf16.mxu1 %v1112_v12 }
  0x1a   : > { %566 = vmatpush1.bf16.msra.mxu0 %v1107_v11 }
  0x1b   : > { %567 = vmatprep.subr.bf16.mxu0 %v1109_v13 }
  0x1c   : > { %1051 = vmatpush3.bf16.msra.mxu1 %v1112_v12 }
  0x1d   : > { %1052 = vmatprep.subr.bf16.mxu1 %v1116_v15 }
  0x1e   : > { %568 = vmatpush1.bf16.msra.mxu0 %v1111_v14 }
  0x1f   : > { %569 = vmatprep.subr.bf16.mxu0 %v1113_v16 }
  0x20   : > { %1053 = vmatpush3.bf16.msra.mxu1 %v1116_v15 }
  0x21   : > { %1054 = vmatprep.subr.bf16.mxu1 %v1120_v19 }
  0x22   : > { %570 = vmatpush1.bf16.msra.mxu0 %v1115_v17 }
  0x23   : > { %571 = vmatprep.subr.bf16.mxu0 %v1117_v20 }
  0x24   : > { %1055 = vmatpush3.bf16.msra.mxu1 %v1120_v19 }
  0x25   : > { %1056 = vmatprep.subr.bf16.mxu1 %v1124_v22 }
  0x26   : > { %572 = vmatpush1.bf16.msra.mxu0 %v1119_v21 }
  0x27   : > { %573 = vmatprep.subr.bf16.mxu0 %v1121_v23 }
  0x28   : > { %1057 = vmatpush3.bf16.msra.mxu1 %v1124_v22 }
  0x29   : > { %1058 = vmatprep.subr.bf16.mxu1 %v1126_v25 }
  0x2a   : > { %574 = vmatpush1.bf16.msra.mxu0 %v1123_v24 }
  0x2c   : > { %1059 = vmatpush3.bf16.msra.mxu1 %v1126_v25 }
  0x2d   : > { %592 = vmatmul.mubr.bf16.vlgmr.msra.gmra.mxu0 %v1125_v18 }
  0x2e   : > { %601 = vmatprep.mubr.bf16.mxu0 %v1154_v2 }
  0x2f   : > { %1061 = vmatmul.mubr.bf16.vlgmr.msra.gmra.mxu1 %v1127_v26 }
  0x30   : > { %1064 = vmatprep.mubr.bf16.mxu1 %v1128_v27 }
  0x35   : > { %602 = vmatmul.mubr.bf16.gmra.mxu0 %v1127_v26 }
  0x36   : > { %611 = vmatprep.mubr.bf16.mxu0 %v1154_v2 }
  0x37   : > { %1065 = vmatmul.mubr.bf16.gmra.mxu1 %v1129_v28 }
  0x3d   : > { %612 = vmatmul.mubr.bf16.gmra.mxu0 %v1128_v27 }
  0x3e   : > { %621 = vmatprep.mubr.bf16.mxu0 %v1154_v2 }
  0x45   : > { %622 = vmatmul.mubr.bf16.gmra.mxu0 %v1129_v28 }
  0xed   : > { %v593_v39 = vpop.f32.mrf.mxu0 }
  0xee   : > { %v777_v41 = vmul.f32 %v1295_v36, %v593_v39 }
  0xef   : > { %v595_v43 = vpop.f32.mrf.mxu0  ;;  %v1062_v47 = vpop.f32.mrf.mxu1 }
  0xf0   : > { %v815_v45 = vadd.f32 %v1298_v37, %v777_v41  ;;  %v778_v46 = vmul.f32 %v1300_v38, %v595_v43  ;;  %v785_v49 = vmul.f32 %v1062_v47, %v1302_v40 }
  0xf1   : > { %v597_v48 = vpop.f32.mrf.mxu0  ;;  %v664_v52 = vpop.f32.mrf.mxu1 }
  0xf2   : > { %836 = vst [vmem:[%s1310_s9] sm:$0xff] %v815_v45  ;;  %v816_v50 = vadd.f32 %v1305_v42, %v778_v46  ;;  %v780_v51 = vmul.f32 %v1295_v36, %v597_v48  ;;  %v823_v54 = vadd.f32 %v1312_v44, %v785_v49  ;;  %v779_v55 = vmul.f32 %v1302_v40, %v664_v52 }
  0xf3   : > { %v599_v53 = vpop.f32.mrf.mxu0  ;;  %v1063_v58 = vpop.f32.mrf.mxu1 }
  0xf4   : > { %837 = vst [vmem:[%s1310_s9 + $0x8] sm:$0xff] %v816_v50  ;;  %v818_v56 = vadd.f32 %v1298_v37, %v780_v51  ;;  %v781_v57 = vmul.f32 %v1300_v38, %v599_v53  ;;  %844 = vst [vmem:[%s1310_s9 + $0x40] sm:$0xff] %v823_v54  ;;  %v817_v60 = vadd.f32 %v1312_v44, %v779_v55 }
  0xf5   : > { %v603_v59 = vpop.f32.mrf.mxu0  ;;  %v788_v61 = vmul.f32 %v1063_v58, %v1302_v40  ;;  %v667_v0 = vpop.f32.mrf.mxu1 }
  0xf6   : > { %839 = vst [vmem:[%s1310_s9 + $0x18] sm:$0xff] %v818_v56  ;;  %v819_v62 = vadd.f32 %v1305_v42, %v781_v57  ;;  %v783_v63 = vmul.f32 %v1295_v36, %v603_v59  ;;  %838 = vst [vmem:[%s1310_s9 + $0x10] sm:$0xff] %v817_v60  ;;  %v782_v3 = vmul.f32 %v1302_v40, %v667_v0 }
  0xf7   : > { %v605_v1 = vpop.f32.mrf.mxu0  ;;  %v826_v2 = vadd.f32 %v1312_v44, %v788_v61  ;;  %v1066_v6 = vpop.f32.mrf.mxu1 }
  0xf8   : > { %840 = vst [vmem:[%s1310_s9 + $0x20] sm:$0xff] %v819_v62  ;;  %v821_v4 = vadd.f32 %v1298_v37, %v783_v63  ;;  %v784_v5 = vmul.f32 %v1300_v38, %v605_v1  ;;  %v820_v8 = vadd.f32 %v1312_v44, %v782_v3  ;;  %v797_v9 = vmul.f32 %v1066_v6, %v1302_v40 }
  0xf9   : > { %847 = vst [vmem:[%s1310_s9 + $0x58] sm:$0xff] %v826_v2  ;;  %v607_v7 = vpop.f32.mrf.mxu0  ;;  %v680_v12 = vpop.f32.mrf.mxu1 }
  0xfa   : > { %842 = vst [vmem:[%s1310_s9 + $0x30] sm:$0xff] %v821_v4  ;;  %v822_v10 = vadd.f32 %v1305_v42, %v784_v5  ;;  %v786_v11 = vmul.f32 %v1295_v36, %v607_v7  ;;  %841 = vst [vmem:[%s1310_s9 + $0x28] sm:$0xff] %v820_v8  ;;  %v835_v14 = vadd.f32 %v1312_v44, %v797_v9 }
  0xfb   : > { %v609_v13 = vpop.f32.mrf.mxu0  ;;  %v791_v15 = vmul.f32 %v1302_v40, %v680_v12  ;;  %v1067_v18 = vpop.f32.mrf.mxu1 }
  0xfc   : > { %843 = vst [vmem:[%s1310_s9 + $0x38] sm:$0xff] %v822_v10  ;;  %v824_v16 = vadd.f32 %v1298_v37, %v786_v11  ;;  %v787_v17 = vmul.f32 %v1300_v38, %v609_v13  ;;  %856 = vst [vmem:[%s1310_s9 + $0xa0] sm:$0xff] %v835_v14 }
  0xfd   : > { %v613_v19 = vpop.f32.mrf.mxu0  ;;  %v829_v20 = vadd.f32 %v1312_v44, %v791_v15  ;;  %v683_v23 = vpop.f32.mrf.mxu1 }
  0xfe   : > { %845 = vst [vmem:[%s1310_s9 + $0x48] sm:$0xff] %v824_v16  ;;  %v825_v21 = vadd.f32 %v1305_v42, %v787_v17  ;;  %v789_v22 = vmul.f32 %v1295_v36, %v613_v19  ;;  %v794_v25 = vmul.f32 %v1302_v40, %v683_v23 }
  0xff   : > { %850 = vst [vmem:[%s1310_s9 + $0x70] sm:$0xff] %v829_v20  ;;  %v615_v24 = vpop.f32.mrf.mxu0 }
 0x100   : > { %846 = vst [vmem:[%s1310_s9 + $0x50] sm:$0xff] %v825_v21  ;;  %v827_v26 = vadd.f32 %v1298_v37, %v789_v22  ;;  %v790_v27 = vmul.f32 %v1300_v38, %v615_v24  ;;  %v832_v29 = vadd.f32 %v1312_v44, %v794_v25 }
 0x101   : > { %v617_v28 = vpop.f32.mrf.mxu0 }
 0x102   : > { %848 = vst [vmem:[%s1310_s9 + $0x60] sm:$0xff] %v827_v26  ;;  %v828_v30 = vadd.f32 %v1305_v42, %v790_v27  ;;  %v792_v31 = vmul.f32 %v1295_v36, %v617_v28  ;;  %853 = vst [vmem:[%s1310_s9 + $0x88] sm:$0xff] %v832_v29 }
 0x103   : > { %v619_v32 = vpop.f32.mrf.mxu0 }
 0x104   : > { %849 = vst [vmem:[%s1310_s9 + $0x68] sm:$0xff] %v828_v30  ;;  %v830_v33 = vadd.f32 %v1298_v37, %v792_v31  ;;  %v793_v34 = vmul.f32 %v1300_v38, %v619_v32 }
 0x105   : > { %v623_v35 = vpop.f32.mrf.mxu0 }
 0x106   : > { %851 = vst [vmem:[%s1310_s9 + $0x78] sm:$0xff] %v830_v33  ;;  %v831_v39 = vadd.f32 %v1305_v42, %v793_v34  ;;  %v795_v40 = vmul.f32 %v1295_v36, %v623_v35 }
 0x107   : > { %v625_v41 = vpop.f32.mrf.mxu0 }
 0x108   : > { %852 = vst [vmem:[%s1310_s9 + $0x80] sm:$0xff] %v831_v39  ;;  %v833_v43 = vadd.f32 %v1298_v37, %v795_v40  ;;  %v796_v44 = vmul.f32 %v1300_v38, %v625_v41 }
 0x109   : > { %v627_v45 = vpop.f32.mrf.mxu0 }
 0x10a   : > { %854 = vst [vmem:[%s1310_s9 + $0x90] sm:$0xff] %v833_v43  ;;  %v834_v46 = vadd.f32 %v1305_v42, %v796_v44 }
 0x10b   : > { %v628_v47 = vpop.f32.mrf.mxu0 }
 0x10c   : > { %855 = vst [vmem:[%s1310_s9 + $0x98] sm:$0xff] %v834_v46 }
 0x10d PF: > { %s14_s17 = sadd.s32 1, %s1152_s17   ;;  %s1390_s15 = smov %s1148_s16 }
 0x10e   : > { %p11_p5 = scmp.ge.s32.totalorder %s14_s17, 4   ;;  %s1391_s16 = smov %s1393_s18 }
 0x110   :  { %13 = sbr.rel (!%p11_p5) target bundleno = 2 (0x2), region = 83 }

// kernel: inception_b_forward.5
= control target key start
LH: loop header
LB: loop body
LE: loop exit
PB: predicated region body
PF: predicated region fallthrough
CT: control target
= control target key end

     0   :  { %s856_s30 = smov 0   ;;  %s1005_s0 = inlined_call_operand.vmem [shape: f32[2,49,8], index: 0, kind: input, shape index: {}]   ;;  %s1006_s1 = inlined_call_operand.vmem [shape: f32[2,49,8], index: 1, kind: input, shape index: {}]   ;;  %s1007_s2 = inlined_call_operand.vmem [shape: f32[2,49,8], index: 2, kind: input, shape index: {}]   ;;  %s1008_s3 = inlined_call_operand.vmem [shape: f32[2,49,8], index: 3, kind: input, shape index: {}]   ;;  %s1009_s4 = inlined_call_operand.vmem [shape: f32[2,49,8], index: 4, kind: input, shape index: {}]   ;;  %s1010_s5 = inlined_call_operand.vmem [shape: f32[2,49,8], index: 5, kind: input, shape index: {}]   ;;  %s1011_s6 = inlined_call_operand.vmem [shape: f32[2,49,8], index: 6, kind: input, shape index: {}]   ;;  %s1012_s7 = inlined_call_operand.vmem [shape: f32[2,49,8], index: 7, kind: input, shape index: {}]   ;;  %s1013_s8 = inlined_call_operand.vmem [shape: f32[2,49,8], index: 8, kind: input, shape index: {}]   ;;  %s1014_s9 = inlined_call_operand.vmem [shape: f32[2,49,8], index: 9, kind: output, shape index: {}]  }
   0x1 LB: > { %s772_s10 = sadd.s32 4294967295, %s804_s30   ;;  %p776_p0 = scmp.ge.s32.totalorder %s804_s30, 1  ;;  %s804_s30 = sphi %s856_s30, %s19_s30  }
   0x2   : > { %p367_p1 = scmp.lt.s32.totalorder %s804_s30, 3 }
   0x4   : > { %p368_p2 = pnand %p776_p0, %p367_p1 }
   0x5   : > { %p443_p3 = scmp.lt.s32.totalorder (!%p368_p2), %s772_s10, 1 }
   0x6   : > { %371 = sbr.rel (%p368_p2) target bundleno = 48 (0x30), region = 56 }
   0xb   : > { %s1016_s10 = smov (!%p443_p3, %s772_s10), 1  ;;  %vm612_vm0 = vcmask 64512   ;;  %vm619_vm1 = vcmask 57344  }
   0xc   : > { %s864_s11 = smul.u32 56, %s1016_s10 }
   0xe   : > { %s870_s14 = scalar_lea.vmem %s1005_s0, %s864_s11  ;;  %s876_s17 = scalar_lea.vmem %s1006_s1, %s864_s11 }
   0xf   : > { %s882_s20 = scalar_lea.vmem %s1007_s2, %s864_s11  ;;  %s888_s23 = scalar_lea.vmem %s1008_s3, %s864_s11  ;;  %v493_v0 = vld [vmem:[%s870_s14] sm:$0xff]  ;;  %v494_v2 = vld [vmem:[%s870_s14 + $0x8] sm:$0xff]  ;;  %v495_v17 = vld [vmem:[%s870_s14 + $0x10] sm:$0xff] }
  0x10   : > { %v500_v1 = vld [vmem:[%s876_s17] sm:$0xff]  ;;  %s897_s26 = scalar_lea.vmem %s1009_s4, %s864_s11  ;;  %v501_v5 = vld [vmem:[%s876_s17 + $0x8] sm:$0xff]  ;;  %s905_s29 = scalar_lea.vmem %s1010_s5, %s864_s11  ;;  %v502_v18 = vld [vmem:[%s876_s17 + $0x10] sm:$0xff] }
  0x11   : > { %v507_v3 = vmax.f32 %v493_v0, %v500_v1  ;;  %v514_v4 = vld [vmem:[%s882_s20] sm:$0xff]  ;;  %v508_v7 = vmax.f32 %v494_v2, %v501_v5  ;;  %v515_v8 = vld [vmem:[%s882_s20 + $0x8] sm:$0xff]  ;;  %s915_s13 = scalar_lea.vmem %s1011_s6, %s864_s11  ;;  %v516_v19 = vld [vmem:[%s882_s20 + $0x10] sm:$0xff]  ;;  %s926_s18 = scalar_lea.vmem %s1012_s7, %s864_s11  ;;  %v509_v22 = vmax.f32 %v495_v17, %v502_v18 }
  0x12   : > { %v528_v6 = vld [vmem:[%s888_s23] sm:$0xff]  ;;  %v529_v10 = vld [vmem:[%s888_s23 + $0x8] sm:$0xff]  ;;  %s932_s22 = scalar_lea.vmem %s1013_s8, %s864_s11  ;;  %v530_v26 = vld [vmem:[%s888_s23 + $0x10] sm:$0xff]  ;;  %s956_s27 = scalar_lea.vmem %s1014_s9, %s864_s11 }
  0x13   : > { %v521_v9 = vmax.f32 %v507_v3, %v514_v4  ;;  %v542_v11 = vld [vmem:[%s897_s26] sm:$0xff]  ;;  %v522_v12 = vmax.f32 %v508_v7, %v515_v8  ;;  %v543_v15 = vld [vmem:[%s897_s26 + $0x8] sm:$0xff]  ;;  %v523_v28 = vmax.f32 %v509_v22, %v516_v19  ;;  %v496_v29 = vld [vmem:[%s870_s14 + $0x18] sm:$0xff] }
  0x14   : > { %v556_v14 = vld [vmem:[%s905_s29] sm:$0xff]  ;;  %v557_v21 = vld [vmem:[%s905_s29 + $0x8] sm:$0xff]  ;;  %v503_v30 = vld [vmem:[%s876_s17 + $0x18] sm:$0xff] }
  0x15   : > { %v535_v13 = vmax.f32 %v521_v9, %v528_v6  ;;  %v536_v16 = vmax.f32 %v522_v12, %v529_v10  ;;  %v570_v23 = vld [vmem:[%s915_s13] sm:$0xff]  ;;  %v571_v25 = vld [vmem:[%s915_s13 + $0x8] sm:$0xff]  ;;  %v517_v31 = vld [vmem:[%s882_s20 + $0x18] sm:$0xff]  ;;  %v510_v36 = vmax.f32 %v496_v29, %v503_v30  ;;  %v537_v39 = vmax.f32 %v523_v28, %v530_v26 }
  0x16   : > { %v584_v32 = vld [vmem:[%s926_s18] sm:$0xff]  ;;  %v544_v35 = vld [vmem:[%s897_s26 + $0x10] sm:$0xff]  ;;  %v585_v38 = vld [vmem:[%s926_s18 + $0x8] sm:$0xff] }
  0x17   : > { %v549_v20 = vmax.f32 %v535_v13, %v542_v11  ;;  %v550_v24 = vmax.f32 %v536_v16, %v543_v15  ;;  %v598_v33 = vld [vmem:[%s932_s22] sm:$0xff]  ;;  %v558_v40 = vld [vmem:[%s905_s29 + $0x10] sm:$0xff]  ;;  %v531_v41 = vld [vmem:[%s888_s23 + $0x18] sm:$0xff]  ;;  %v524_v43 = vmax.f32 %v510_v36, %v517_v31  ;;  %v551_v49 = vmax.f32 %v537_v39, %v544_v35 }
  0x18   : > { %v497_v44 = vld [vmem:[%s870_s14 + $0x20] sm:$0xff]  ;;  %v599_v48 = vld [vmem:[%s932_s22 + $0x8] sm:$0xff]  ;;  %v545_v50 = vld [vmem:[%s897_s26 + $0x18] sm:$0xff] }
  0x19   : > { %v563_v27 = vmax.f32 %v549_v20, %v556_v14  ;;  %v564_v34 = vmax.f32 %v550_v24, %v557_v21  ;;  %v504_v45 = vld [vmem:[%s876_s17 + $0x20] sm:$0xff]  ;;  %v572_v53 = vld [vmem:[%s915_s13 + $0x10] sm:$0xff]  ;;  %v538_v54 = vmax.f32 %v524_v43, %v531_v41  ;;  %v559_v55 = vld [vmem:[%s905_s29 + $0x18] sm:$0xff]  ;;  %v565_v58 = vmax.f32 %v551_v49, %v558_v40 }
  0x1a   : > { %v518_v46 = vld [vmem:[%s882_s20 + $0x20] sm:$0xff]  ;;  %v511_v51 = vmax.f32 %v497_v44, %v504_v45  ;;  %v498_v60 = vld [vmem:[%s870_s14 + $0x28] sm:$0xff]  ;;  %v586_v0 = vld [vmem:[%s926_s18 + $0x10] sm:$0xff] }
  0x1b   : > { %v577_v37 = vmax.f32 %v563_v27, %v570_v23  ;;  %v578_v42 = vmax.f32 %v564_v34, %v571_v25  ;;  %v532_v56 = vld [vmem:[%s888_s23 + $0x20] sm:$0xff]  ;;  %v505_v61 = vld [vmem:[%s876_s17 + $0x28] sm:$0xff]  ;;  %v600_v1 = vld [vmem:[%s932_s22 + $0x10] sm:$0xff]  ;;  %v552_v2 = vmax.f32 %v538_v54, %v545_v50  ;;  %v579_v5 = vmax.f32 %v565_v58, %v572_v53 }
  0x1c   : > { %v525_v59 = vmax.f32 %v511_v51, %v518_v46  ;;  %v519_v62 = vld [vmem:[%s882_s20 + $0x28] sm:$0xff]  ;;  %v546_v3 = vld [vmem:[%s897_s26 + $0x20] sm:$0xff]  ;;  %v512_v4 = vmax.f32 %v498_v60, %v505_v61  ;;  %v573_v6 = vld [vmem:[%s915_s13 + $0x18] sm:$0xff] }
  0x1d   : > { %v591_v47 = vmax.f32 %v577_v37, %v584_v32  ;;  %v592_v52 = vmax.f32 %v578_v42, %v585_v38  ;;  %v560_v8 = vld [vmem:[%s905_s29 + $0x20] sm:$0xff]  ;;  %v533_v9 = vld [vmem:[%s888_s23 + $0x28] sm:$0xff]  ;;  %v566_v10 = vmax.f32 %v552_v2, %v559_v55  ;;  %v499_v12 = vld [vmem:[%s870_s14 + $0x30] sm:$0x1]  ;;  %v593_v15 = vmax.f32 %v579_v5, %v586_v0 }
  0x1e   : > { %v539_v7 = vmax.f32 %v525_v59, %v532_v56  ;;  %v526_v11 = vmax.f32 %v512_v4, %v519_v62  ;;  %v506_v13 = vld [vmem:[%s876_s17 + $0x30] sm:$0x1]  ;;  %v587_v16 = vld [vmem:[%s926_s18 + $0x18] sm:$0xff]  ;;  %v547_v18 = vld [vmem:[%s897_s26 + $0x28] sm:$0xff] }
  0x1f   : > { %v605_v57 = vmax.f32 %v591_v47, %v598_v33  ;;  %v606_v63 = vmax.f32 %v592_v52, %v599_v48  ;;  %v520_v14 = vld [vmem:[%s882_s20 + $0x30] sm:$0x1]  ;;  %v513_v19 = vmax.f32 %v499_v12, %v506_v13  ;;  %v580_v20 = vmax.f32 %v566_v10, %v573_v6  ;;  %v574_v21 = vld [vmem:[%s915_s13 + $0x20] sm:$0xff]  ;;  %v601_v25 = vld [vmem:[%s932_s22 + $0x18] sm:$0xff] }
  0x20   : > { %v553_v17 = vmax.f32 %v539_v7, %v546_v3  ;;  %v540_v22 = vmax.f32 %v526_v11, %v533_v9  ;;  %v534_v23 = vld [vmem:[%s888_s23 + $0x30] sm:$0x1]  ;;  %v607_v24 = vmax.f32 %v593_v15, %v600_v1  ;;  %v561_v27 = vld [vmem:[%s905_s29 + $0x28] sm:$0xff]  ;;  %v588_v30 = vld [vmem:[%s926_s18 + $0x20] sm:$0xff] }
  0x21   : > { %613 = vst.msk [vmem:[%s956_s27] sm:$0xff] %vm612_vm0, %v605_v57  ;;  %614 = vst.msk [vmem:[%s956_s27 + $0x8] sm:$0xff] %vm612_vm0, %v606_v63  ;;  %v527_v28 = vmax.f32 %v513_v19, %v520_v14  ;;  %v594_v29 = vmax.f32 %v580_v20, %v587_v16  ;;  %v548_v32 = vld [vmem:[%s897_s26 + $0x30] sm:$0x1]  ;;  %v575_v34 = vld [vmem:[%s915_s13 + $0x28] sm:$0xff] }
  0x22   : > { %v567_v26 = vmax.f32 %v553_v17, %v560_v8  ;;  %v554_v31 = vmax.f32 %v540_v22, %v547_v18  ;;  %615 = vst.msk [vmem:[%s956_s27 + $0x10] sm:$0xff] %vm612_vm0, %v607_v24  ;;  %v602_v37 = vld [vmem:[%s932_s22 + $0x20] sm:$0xff]  ;;  %v562_v39 = vld [vmem:[%s905_s29 + $0x30] sm:$0x1]  ;;  %v589_v41 = vld [vmem:[%s926_s18 + $0x28] sm:$0xff] }
  0x23   : > { %v541_v35 = vmax.f32 %v527_v28, %v534_v23  ;;  %v608_v36 = vmax.f32 %v594_v29, %v601_v25  ;;  %v576_v44 = vld [vmem:[%s915_s13 + $0x30] sm:$0x1]  ;;  %v603_v46 = vld [vmem:[%s932_s22 + $0x28] sm:$0xff] }
  0x24   : > { %v581_v33 = vmax.f32 %v567_v26, %v574_v21  ;;  %v568_v38 = vmax.f32 %v554_v31, %v561_v27  ;;  %v590_v49 = vld [vmem:[%s926_s18 + $0x30] sm:$0x1] }
  0x25   : > { %v555_v42 = vmax.f32 %v541_v35, %v548_v32  ;;  %616 = vst.msk [vmem:[%s956_s27 + $0x18] sm:$0xff] %vm612_vm0, %v608_v36  ;;  %v604_v52 = vld [vmem:[%s932_s22 + $0x30] sm:$0x1] }
  0x26   : > { %v595_v40 = vmax.f32 %v581_v33, %v588_v30  ;;  %v582_v43 = vmax.f32 %v568_v38, %v575_v34 }
  0x27   : > { %v569_v47 = vmax.f32 %v555_v42, %v562_v39 }
  0x28   : > { %v609_v45 = vmax.f32 %v595_v40, %v602_v37  ;;  %v596_v48 = vmax.f32 %v582_v43, %v589_v41 }
  0x29   : > { %v583_v50 = vmax.f32 %v569_v47, %v576_v44 }
  0x2a   : > { %617 = vst.msk [vmem:[%s956_s27 + $0x20] sm:$0xff] %vm612_vm0, %v609_v45  ;;  %v610_v51 = vmax.f32 %v596_v48, %v603_v46 }
  0x2b   : > { %v597_v53 = vmax.f32 %v583_v50, %v590_v49 }
  0x2c   : > { %618 = vst.msk [vmem:[%s956_s27 + $0x28] sm:$0xff] %vm612_vm0, %v610_v51 }
  0x2d   : > { %v611_v54 = vmax.f32 %v597_v53, %v604_v52 }
  0x2f   : > { %620 = vst.msk [vmem:[%s956_s27 + $0x30] sm:$0x1] %vm619_vm1, %v611_v54 }
  0x30 PF: > { %s19_s30 = sadd.s32 1, %s804_s30  }
  0x31   : > { %p16_p4 = scmp.ge.s32.totalorder %s19_s30, 4  }
  0x33   :  { %18 = sbr.rel (!%p16_p4) target bundleno = 1 (0x1), region = 110 }

</bundles_post_ra>
